<compile_context>
chip_gen: v7x
topology: tpu7x:2x2x1
jax: 0.10.0
libtpu: 0.0.40
codegen_flags: <defaults>
</compile_context>

<pallas_src>
import functools

import jax
import jax.numpy as jnp
from jax.experimental import pallas as pl
from jax.experimental.pallas import tpu as pltpu

_LANE = 128
_VMEM_LIMIT = 32 * 1024 * 1024  # explicit scoped-VMEM budget; safe on v5e/v6e/v7x


def _cp(*sems):
    return pltpu.CompilerParams(dimension_semantics=tuple(sems),
                                vmem_limit_bytes=_VMEM_LIMIT)


def _round_up(x, m):
    return (x + m - 1) // m * m


def _pick_row_tile(m, cap):
    """Largest divisor of m that is <= cap and sublane-aligned (or m itself)."""
    for t in range(min(m, cap), 0, -1):
        if m % t == 0 and (t % 8 == 0 or t == m):
            return t
    return m


def _pick_h_tile(ho, wo, cap_rows=512):
    """Output-row tile (in image rows) for the stride-1 conv kernel."""
    for th in range(ho, 0, -1):
        if ho % th == 0 and th * wo <= cap_rows and (th * wo) % 8 == 0:
            return th
    return ho


# ----------------------------- Pallas kernels ------------------------------

def _conv3x3_s1_stats_kernel(x_ref, w_ref, o_ref, s_ref, ss_ref, *, th, wo):
    """3x3 / stride-1 conv with fused BN-stats accumulation.

    x_ref : (H+2, W+2, Cin_p)  bf16  halo-padded input, resident per batch elem
    w_ref : (9, Cin_p, Cout_p) bf16  weights, resident
    o_ref : (th*wo, Cout_p)    f32   one tile of flattened output rows
    s_ref : (1, Cout_p)        f32   per-channel sum       (resident accumulator)
    ss_ref: (1, Cout_p)        f32   per-channel sum of sq (resident accumulator)
    """
    i = pl.program_id(0)
    m = pl.program_id(1)
    h0 = pl.multiple_of(m * th, th)
    cin = x_ref.shape[-1]

    acc = jnp.zeros(o_ref.shape, jnp.float32)
    for kh in range(3):
        for kw in range(3):
            tap = x_ref[pl.ds(h0 + kh, th), pl.ds(kw, wo), :]      # (th, wo, cin)
            acc += jnp.dot(tap.reshape(th * wo, cin), w_ref[kh * 3 + kw],
                           preferred_element_type=jnp.float32)
    o_ref[...] = acc

    ps = jnp.sum(acc, axis=0, keepdims=True)
    pss = jnp.sum(acc * acc, axis=0, keepdims=True)
    first = jnp.logical_and(i == 0, m == 0)

    @pl.when(first)
    def _():
        s_ref[...] = ps
        ss_ref[...] = pss

    @pl.when(jnp.logical_not(first))
    def _():
        s_ref[...] += ps
        ss_ref[...] += pss


def _conv_patches_stats_kernel(p_ref, w_ref, o_ref, s_ref, ss_ref):
    """Strided conv as im2col matmul (TM, 9*Cin_p) @ (9*Cin_p, Cout_p) + BN stats."""
    acc = jnp.dot(p_ref[...], w_ref[...], preferred_element_type=jnp.float32)
    o_ref[...] = acc

    ps = jnp.sum(acc, axis=0, keepdims=True)
    pss = jnp.sum(acc * acc, axis=0, keepdims=True)

    @pl.when(pl.program_id(0) == 0)
    def _():
        s_ref[...] = ps
        ss_ref[...] = pss

    @pl.when(pl.program_id(0) > 0)
    def _():
        s_ref[...] += ps
        ss_ref[...] += pss


def _scale_shift_relu_kernel(x_ref, a_ref, b_ref, o_ref):
    """BN1 apply: relu(x * scale + shift), cast to output dtype (bf16)."""
    y = jnp.maximum(x_ref[...] * a_ref[...] + b_ref[...], 0.0)
    o_ref[...] = y.astype(o_ref.dtype)


def _dual_bn_add_relu_kernel(x_ref, ax_ref, bx_ref, r_ref, ar_ref, br_ref, o_ref):
    """Fused epilogue: relu(BN2(main) + BN_s(shortcut)) in one HBM pass."""
    y = x_ref[...] * ax_ref[...] + bx_ref[...]
    r = r_ref[...].astype(jnp.float32) * ar_ref[...] + br_ref[...]
    o_ref[...] = jnp.maximum(y + r, 0.0)


# ------------------------------- wrappers -----------------------------------

def conv3x3(xpad, w9, stride):
    """Conv2d(k=3, pad=1, stride), no bias, with fused BN statistics.

    xpad: (N, H+2, W+2, Cin_p) bf16 halo-padded, channel-padded input
    w9:   (9, Cin_p, Cout_p)   bf16 weights
    Returns (out (N*Ho*Wo, Cout_p) f32, sum (1,Cout_p), sumsq (1,Cout_p), dims).
    """
    n, hp, wp, cin = xpad.shape
    h, w = hp - 2, wp - 2
    cout = w9.shape[-1]
    ho = (h - 1) // stride + 1
    wo = (w - 1) // stride + 1

    if stride == 1:
        th = _pick_h_tile(ho, wo)
        out, s, ss = pl.pallas_call(
            functools.partial(_conv3x3_s1_stats_kernel, th=th, wo=wo),
            out_shape=(jax.ShapeDtypeStruct((n, ho * wo, cout), jnp.float32),
                       jax.ShapeDtypeStruct((1, cout), jnp.float32),
                       jax.ShapeDtypeStruct((1, cout), jnp.float32)),
            grid=(n, ho // th),
            in_specs=[
                pl.BlockSpec((None, hp, wp, cin), lambda i, m: (i, 0, 0, 0)),
                pl.BlockSpec((9, cin, cout), lambda i, m: (0, 0, 0)),
            ],
            out_specs=(pl.BlockSpec((None, th * wo, cout), lambda i, m: (i, m, 0)),
                       pl.BlockSpec((1, cout), lambda i, m: (0, 0)),
                       pl.BlockSpec((1, cout), lambda i, m: (0, 0))),
            compiler_params=_cp("arbitrary", "arbitrary"),
        )(xpad, w9)
        return out.reshape(n * ho * wo, cout), s, ss, (n, ho, wo, cout)

    # stride > 1: gather bf16 patches directly at the strided output positions.
    taps = [xpad[:, kh:kh + (ho - 1) * stride + 1:stride,
                 kw:kw + (wo - 1) * stride + 1:stride, :]
            for kh in range(3) for kw in range(3)]
    patches = jnp.concatenate(taps, axis=-1).reshape(n * ho * wo, 9 * cin)
    m_rows = n * ho * wo
    tm = _pick_row_tile(m_rows, 512)
    out, s, ss = pl.pallas_call(
        _conv_patches_stats_kernel,
        out_shape=(jax.ShapeDtypeStruct((m_rows, cout), jnp.float32),
                   jax.ShapeDtypeStruct((1, cout), jnp.float32),
                   jax.ShapeDtypeStruct((1, cout), jnp.float32)),
        grid=(m_rows // tm,),
        in_specs=[
            pl.BlockSpec((tm, 9 * cin), lambda m: (m, 0)),
            pl.BlockSpec((9 * cin, cout), lambda m: (0, 0)),
        ],
        out_specs=(pl.BlockSpec((tm, cout), lambda m: (m, 0)),
                   pl.BlockSpec((1, cout), lambda m: (0, 0)),
                   pl.BlockSpec((1, cout), lambda m: (0, 0))),
        compiler_params=_cp("arbitrary"),
    )(patches, w9.reshape(9 * cin, cout))
    return out, s, ss, (n, ho, wo, cout)


# TODO(synk): BatchNorm running_mean/running_var buffer updates (training-time
# bookkeeping) are not materialized; they do not affect the forward output.
def bn_coeffs(s, ss, count, gamma, beta, eps=1e-5):
    """Training-mode BN: per-channel (scale, shift) from fused conv stats."""
    mean = s / count
    var = jnp.maximum(ss / count - mean * mean, 0.0)   # biased variance (PyTorch train)
    scale = gamma * jax.lax.rsqrt(var + eps)
    shift = beta - mean * scale
    return scale, shift


def bn_relu_apply(x2d, scale, shift):
    """relu(x*scale + shift), emitted as bf16 (it feeds the next bf16 conv)."""
    m, c = x2d.shape
    tm = _pick_row_tile(m, 1024)
    return pl.pallas_call(
        _scale_shift_relu_kernel,
        out_shape=jax.ShapeDtypeStruct((m, c), jnp.bfloat16),
        grid=(m // tm,),
        in_specs=[pl.BlockSpec((tm, c), lambda i: (i, 0)),
                  pl.BlockSpec((1, c), lambda i: (0, 0)),
                  pl.BlockSpec((1, c), lambda i: (0, 0))],
        out_specs=pl.BlockSpec((tm, c), lambda i: (i, 0)),
        compiler_params=_cp("parallel"),
    )(x2d, scale, shift)


def dual_bn_add_relu(x2d, ax, bx, r2d, ar, br):
    m, c = x2d.shape
    tm = _pick_row_tile(m, 1024)
    return pl.pallas_call(
        _dual_bn_add_relu_kernel,
        out_shape=jax.ShapeDtypeStruct((m, c), jnp.float32),
        grid=(m // tm,),
        in_specs=[pl.BlockSpec((tm, c), lambda i: (i, 0)),
                  pl.BlockSpec((1, c), lambda i: (0, 0)),
                  pl.BlockSpec((1, c), lambda i: (0, 0)),
                  pl.BlockSpec((tm, c), lambda i: (i, 0)),
                  pl.BlockSpec((1, c), lambda i: (0, 0)),
                  pl.BlockSpec((1, c), lambda i: (0, 0))],
        out_specs=pl.BlockSpec((tm, c), lambda i: (i, 0)),
        compiler_params=_cp("parallel"),
    )(x2d, ax, bx, r2d, ar, br)


def _pad_weight(w_hwio, cin_p, cout_p):
    kh, kw, cin, cout = w_hwio.shape
    w = jnp.pad(w_hwio, ((0, 0), (0, 0), (0, cin_p - cin), (0, cout_p - cout)))
    return w.reshape(kh * kw, cin_p, cout_p).astype(jnp.bfloat16)


def _pad_vec(v, c_p):
    return jnp.pad(v, (0, c_p - v.shape[0])).reshape(1, c_p).astype(jnp.float32)


def _halo_pad_bf16(x_nhwc_f32):
    return jnp.pad(x_nhwc_f32.astype(jnp.bfloat16),
                   ((0, 0), (1, 1), (1, 1), (0, 0)))


def res_block_forward(x_nchw, params, *, stride=1, eps=1e-5):
    n, cin, h, w = x_nchw.shape
    cout = params["w1"].shape[-1]
    cin_p = _round_up(cin, _LANE)
    cout_p = _round_up(cout, _LANE)

    # NCHW -> NHWC once; zero-pad channels to a lane-dense multiple of 128.
    # Padded channels stay exactly zero through conv/BN/add/ReLU (zero weights
    # and zero gamma in the padded slots) and are sliced off at the end.
    x = jnp.transpose(x_nchw, (0, 2, 3, 1)).astype(jnp.float32)
    x = jnp.pad(x, ((0, 0), (0, 0), (0, 0), (0, cin_p - cin)))
    xpad = _halo_pad_bf16(x)                       # shared by conv1 and shortcut

    w1 = _pad_weight(params["w1"], cin_p, cout_p)
    w2 = _pad_weight(params["w2"], cout_p, cout_p)
    g1, be1 = _pad_vec(params["g1"], cout_p), _pad_vec(params["be1"], cout_p)
    g2, be2 = _pad_vec(params["g2"], cout_p), _pad_vec(params["be2"], cout_p)
    # conv biases (params["b1"/"b2"/"bs"]) are intentionally unused: a per-channel
    # bias is exactly cancelled by training-mode BN's batch-mean subtraction.

    # main branch: conv1(+stats) -> BN1+ReLU -> conv2(+stats); BN2 deferred.
    c1, s1, ss1, (_, ho, wo, _) = conv3x3(xpad, w1, stride)
    m = n * ho * wo
    a1, b1 = bn_coeffs(s1, ss1, m, g1, be1, eps)
    h1 = bn_relu_apply(c1, a1, b1)                                   # bf16
    h1pad = jnp.pad(h1.reshape(n, ho, wo, cout_p),
                    ((0, 0), (1, 1), (1, 1), (0, 0)))
    c2, s2, ss2, _ = conv3x3(h1pad, w2, 1)
    a2, b2 = bn_coeffs(s2, ss2, m, g2, be2, eps)

    # shortcut branch
    if "ws" in params:
        ws = _pad_weight(params["ws"], cin_p, cout_p)
        gs, bes = _pad_vec(params["gs"], cout_p), _pad_vec(params["bes"], cout_p)
        r, sr, ssr, _ = conv3x3(xpad, ws, stride)
        ar, br = bn_coeffs(sr, ssr, m, gs, bes, eps)
    else:
        r = x.reshape(m, cin_p)            # identity (cin == cout, stride == 1)
        ar = jnp.ones((1, cout_p), jnp.float32)
        br = jnp.zeros((1, cout_p), jnp.float32)

    # fused epilogue: relu(BN2(main) + BN_s(shortcut)) in a single HBM pass
    out = dual_bn_add_relu(c2, a2, b2, r, ar, br)
    out = out.reshape(n, ho, wo, cout_p)[..., :cout]
    return jnp.transpose(out, (0, 3, 1, 2))                     # NHWC -> NCHW


def init_params(key, in_channel, out_channel, stride=1):
    """Deterministic synthetic parameters (PyTorch-like uniform fan-in init)."""
    ks = jax.random.split(key, 6)

    def conv_w(k, cin, cout):
        bound = (1.0 / (9 * cin)) ** 0.5
        return jax.random.uniform(k, (3, 3, cin, cout), jnp.float32, -bound, bound)

    def conv_b(k, cin, cout):
        bound = (1.0 / (9 * cin)) ** 0.5
        return jax.random.uniform(k, (cout,), jnp.float32, -bound, bound)

    params = {
        "w1": conv_w(ks[0], in_channel, out_channel),
        "b1": conv_b(ks[1], in_channel, out_channel),   # unused (cancelled by BN)
        "g1": jnp.ones((out_channel,), jnp.float32),
        "be1": jnp.zeros((out_channel,), jnp.float32),
        "w2": conv_w(ks[2], out_channel, out_channel),
        "b2": conv_b(ks[3], out_channel, out_channel),  # unused (cancelled by BN)
        "g2": jnp.ones((out_channel,), jnp.float32),
        "be2": jnp.zeros((out_channel,), jnp.float32),
    }
    if in_channel != out_channel or stride > 1:
        params.update({
            "ws": conv_w(ks[4], in_channel, out_channel),
            "bs": conv_b(ks[5], in_channel, out_channel),  # unused
            "gs": jnp.ones((out_channel,), jnp.float32),
            "bes": jnp.zeros((out_channel,), jnp.float32),
        })
    return params


if __name__ == "__main__":
    key = jax.random.PRNGKey(0)
    n, cin, cout, h, w, stride = 2, 4, 8, 16, 16, 1

    kx, kp = jax.random.split(key)
    x = jax.random.normal(kx, (n, cin, h, w), jnp.float32)      # NCHW like PyTorch
    params = init_params(kp, cin, cout, stride)

    fwd = jax.jit(functools.partial(res_block_forward, stride=stride))
    out = fwd(x, params)
    jax.block_until_ready(out)
    assert out.shape == (n, cout, h // stride, w // stride)
    print("KERNEL_OK")
</pallas_src>

<mosaic_0001>
module attributes {stable_mosaic.version = 11 : i64} {
  func.func @_conv3x3_s1_stats_kernel(%arg0: i32, %arg1: i32, %arg2: memref<1x18x18x128xbf16, #tpu.memory_space<vmem>>, %arg3: memref<9x128x128xbf16, #tpu.memory_space<vmem>>, %arg4: memref<1x256x128xf32, #tpu.memory_space<vmem>>, %arg5: memref<1x128xf32, #tpu.memory_space<vmem>>, %arg6: memref<1x128xf32, #tpu.memory_space<vmem>>) attributes {dimension_semantics = [#tpu.dimension_semantics<arbitrary>, #tpu.dimension_semantics<arbitrary>], iteration_bounds = array<i64: 2, 1>, scalar_prefetch = 0 : i64, scratch_operands = 0 : i64, tpu.core_type = #tpu.core_type<tc>, window_params = [{transform_indices = @transform_0, window_bounds = array<i64: 1, 18, 18, 128>}, {pipeline_mode = #tpu.pipeline_mode<synchronous>, transform_indices = @transform_1, window_bounds = array<i64: 9, 128, 128>}, {transform_indices = @transform_2, window_bounds = array<i64: 1, 256, 128>}, {pipeline_mode = #tpu.pipeline_mode<synchronous>, transform_indices = @transform_3, window_bounds = array<i64: 1, 128>}, {pipeline_mode = #tpu.pipeline_mode<synchronous>, transform_indices = @transform_4, window_bounds = array<i64: 1, 128>}]} {
    %c16_i32 = arith.constant 16 : i32
    %0 = arith.muli %arg1, %c16_i32 : i32
    %1 = tpu.assume_multiple %0, 16 : i32
    %cst = arith.constant 0.000000e+00 : f32
    %2 = vector.broadcast %cst : f32 to vector<256x128xf32>
    %c0_i32 = arith.constant 0 : i32
    %3 = arith.addi %1, %c0_i32 : i32
    %c0 = arith.constant 0 : index
    %4 = arith.index_cast %3 : i32 to index
    %c0_0 = arith.constant 0 : index
    %c0_1 = arith.constant 0 : index
    %5 = vector.load %arg2[%c0, %4, %c0_0, %c0_1] : memref<1x18x18x128xbf16, #tpu.memory_space<vmem>>, vector<1x16x16x128xbf16>
    %6 = vector.shape_cast %5 : vector<1x16x16x128xbf16> to vector<16x16x128xbf16>
    %7 = vector.shape_cast %6 : vector<16x16x128xbf16> to vector<256x128xbf16>
    %c0_2 = arith.constant 0 : index
    %c0_3 = arith.constant 0 : index
    %c0_4 = arith.constant 0 : index
    %8 = vector.load %arg3[%c0_2, %c0_3, %c0_4] : memref<9x128x128xbf16, #tpu.memory_space<vmem>>, vector<1x128x128xbf16>
    %9 = vector.shape_cast %8 : vector<1x128x128xbf16> to vector<128x128xbf16>
    %cst_5 = arith.constant dense<0.000000e+00> : vector<256x128xf32>
    %10 = tpu.matmul %7, %9, %cst_5 {dimension_numbers = #tpu.dot_dimension_numbers<[1], [0], [0], [1], [0, 0, 1, 1], [], []>} : vector<256x128xbf16>, vector<128x128xbf16>, vector<256x128xf32> -> vector<256x128xf32>
    %11 = arith.addf %2, %10 : vector<256x128xf32>
    %c0_i32_6 = arith.constant 0 : i32
    %12 = arith.addi %1, %c0_i32_6 : i32
    %c0_7 = arith.constant 0 : index
    %13 = arith.index_cast %12 : i32 to index
    %c1 = arith.constant 1 : index
    %c0_8 = arith.constant 0 : index
    %14 = vector.load %arg2[%c0_7, %13, %c1, %c0_8] : memref<1x18x18x128xbf16, #tpu.memory_space<vmem>>, vector<1x16x16x128xbf16>
    %15 = vector.shape_cast %14 : vector<1x16x16x128xbf16> to vector<16x16x128xbf16>
    %16 = vector.shape_cast %15 : vector<16x16x128xbf16> to vector<256x128xbf16>
    %c1_9 = arith.constant 1 : index
    %c0_10 = arith.constant 0 : index
    %c0_11 = arith.constant 0 : index
    %17 = vector.load %arg3[%c1_9, %c0_10, %c0_11] : memref<9x128x128xbf16, #tpu.memory_space<vmem>>, vector<1x128x128xbf16>
    %18 = vector.shape_cast %17 : vector<1x128x128xbf16> to vector<128x128xbf16>
    %cst_12 = arith.constant dense<0.000000e+00> : vector<256x128xf32>
    %19 = tpu.matmul %16, %18, %cst_12 {dimension_numbers = #tpu.dot_dimension_numbers<[1], [0], [0], [1], [0, 0, 1, 1], [], []>} : vector<256x128xbf16>, vector<128x128xbf16>, vector<256x128xf32> -> vector<256x128xf32>
    %20 = arith.addf %11, %19 : vector<256x128xf32>
    %c0_i32_13 = arith.constant 0 : i32
    %21 = arith.addi %1, %c0_i32_13 : i32
    %c0_14 = arith.constant 0 : index
    %22 = arith.index_cast %21 : i32 to index
    %c2 = arith.constant 2 : index
    %c0_15 = arith.constant 0 : index
    %23 = vector.load %arg2[%c0_14, %22, %c2, %c0_15] : memref<1x18x18x128xbf16, #tpu.memory_space<vmem>>, vector<1x16x16x128xbf16>
    %24 = vector.shape_cast %23 : vector<1x16x16x128xbf16> to vector<16x16x128xbf16>
    %25 = vector.shape_cast %24 : vector<16x16x128xbf16> to vector<256x128xbf16>
    %c2_16 = arith.constant 2 : index
    %c0_17 = arith.constant 0 : index
    %c0_18 = arith.constant 0 : index
    %26 = vector.load %arg3[%c2_16, %c0_17, %c0_18] : memref<9x128x128xbf16, #tpu.memory_space<vmem>>, vector<1x128x128xbf16>
    %27 = vector.shape_cast %26 : vector<1x128x128xbf16> to vector<128x128xbf16>
    %cst_19 = arith.constant dense<0.000000e+00> : vector<256x128xf32>
    %28 = tpu.matmul %25, %27, %cst_19 {dimension_numbers = #tpu.dot_dimension_numbers<[1], [0], [0], [1], [0, 0, 1, 1], [], []>} : vector<256x128xbf16>, vector<128x128xbf16>, vector<256x128xf32> -> vector<256x128xf32>
    %29 = arith.addf %20, %28 : vector<256x128xf32>
    %c1_i32 = arith.constant 1 : i32
    %30 = arith.addi %1, %c1_i32 : i32
    %c0_20 = arith.constant 0 : index
    %31 = arith.index_cast %30 : i32 to index
    %c0_21 = arith.constant 0 : index
    %c0_22 = arith.constant 0 : index
    %32 = vector.load %arg2[%c0_20, %31, %c0_21, %c0_22] : memref<1x18x18x128xbf16, #tpu.memory_space<vmem>>, vector<1x16x16x128xbf16>
    %33 = vector.shape_cast %32 : vector<1x16x16x128xbf16> to vector<16x16x128xbf16>
    %34 = vector.shape_cast %33 : vector<16x16x128xbf16> to vector<256x128xbf16>
    %c3 = arith.constant 3 : index
    %c0_23 = arith.constant 0 : index
    %c0_24 = arith.constant 0 : index
    %35 = vector.load %arg3[%c3, %c0_23, %c0_24] : memref<9x128x128xbf16, #tpu.memory_space<vmem>>, vector<1x128x128xbf16>
    %36 = vector.shape_cast %35 : vector<1x128x128xbf16> to vector<128x128xbf16>
    %cst_25 = arith.constant dense<0.000000e+00> : vector<256x128xf32>
    %37 = tpu.matmul %34, %36, %cst_25 {dimension_numbers = #tpu.dot_dimension_numbers<[1], [0], [0], [1], [0, 0, 1, 1], [], []>} : vector<256x128xbf16>, vector<128x128xbf16>, vector<256x128xf32> -> vector<256x128xf32>
    %38 = arith.addf %29, %37 : vector<256x128xf32>
    %c1_i32_26 = arith.constant 1 : i32
    %39 = arith.addi %1, %c1_i32_26 : i32
    %c0_27 = arith.constant 0 : index
    %40 = arith.index_cast %39 : i32 to index
    %c1_28 = arith.constant 1 : index
    %c0_29 = arith.constant 0 : index
    %41 = vector.load %arg2[%c0_27, %40, %c1_28, %c0_29] : memref<1x18x18x128xbf16, #tpu.memory_space<vmem>>, vector<1x16x16x128xbf16>
    %42 = vector.shape_cast %41 : vector<1x16x16x128xbf16> to vector<16x16x128xbf16>
    %43 = vector.shape_cast %42 : vector<16x16x128xbf16> to vector<256x128xbf16>
    %c4 = arith.constant 4 : index
    %c0_30 = arith.constant 0 : index
    %c0_31 = arith.constant 0 : index
    %44 = vector.load %arg3[%c4, %c0_30, %c0_31] : memref<9x128x128xbf16, #tpu.memory_space<vmem>>, vector<1x128x128xbf16>
    %45 = vector.shape_cast %44 : vector<1x128x128xbf16> to vector<128x128xbf16>
    %cst_32 = arith.constant dense<0.000000e+00> : vector<256x128xf32>
    %46 = tpu.matmul %43, %45, %cst_32 {dimension_numbers = #tpu.dot_dimension_numbers<[1], [0], [0], [1], [0, 0, 1, 1], [], []>} : vector<256x128xbf16>, vector<128x128xbf16>, vector<256x128xf32> -> vector<256x128xf32>
    %47 = arith.addf %38, %46 : vector<256x128xf32>
    %c1_i32_33 = arith.constant 1 : i32
    %48 = arith.addi %1, %c1_i32_33 : i32
    %c0_34 = arith.constant 0 : index
    %49 = arith.index_cast %48 : i32 to index
    %c2_35 = arith.constant 2 : index
    %c0_36 = arith.constant 0 : index
    %50 = vector.load %arg2[%c0_34, %49, %c2_35, %c0_36] : memref<1x18x18x128xbf16, #tpu.memory_space<vmem>>, vector<1x16x16x128xbf16>
    %51 = vector.shape_cast %50 : vector<1x16x16x128xbf16> to vector<16x16x128xbf16>
    %52 = vector.shape_cast %51 : vector<16x16x128xbf16> to vector<256x128xbf16>
    %c5 = arith.constant 5 : index
    %c0_37 = arith.constant 0 : index
    %c0_38 = arith.constant 0 : index
    %53 = vector.load %arg3[%c5, %c0_37, %c0_38] : memref<9x128x128xbf16, #tpu.memory_space<vmem>>, vector<1x128x128xbf16>
    %54 = vector.shape_cast %53 : vector<1x128x128xbf16> to vector<128x128xbf16>
    %cst_39 = arith.constant dense<0.000000e+00> : vector<256x128xf32>
    %55 = tpu.matmul %52, %54, %cst_39 {dimension_numbers = #tpu.dot_dimension_numbers<[1], [0], [0], [1], [0, 0, 1, 1], [], []>} : vector<256x128xbf16>, vector<128x128xbf16>, vector<256x128xf32> -> vector<256x128xf32>
    %56 = arith.addf %47, %55 : vector<256x128xf32>
    %c2_i32 = arith.constant 2 : i32
    %57 = arith.addi %1, %c2_i32 : i32
    %c0_40 = arith.constant 0 : index
    %58 = arith.index_cast %57 : i32 to index
    %c0_41 = arith.constant 0 : index
    %c0_42 = arith.constant 0 : index
    %59 = vector.load %arg2[%c0_40, %58, %c0_41, %c0_42] : memref<1x18x18x128xbf16, #tpu.memory_space<vmem>>, vector<1x16x16x128xbf16>
    %60 = vector.shape_cast %59 : vector<1x16x16x128xbf16> to vector<16x16x128xbf16>
    %61 = vector.shape_cast %60 : vector<16x16x128xbf16> to vector<256x128xbf16>
    %c6 = arith.constant 6 : index
    %c0_43 = arith.constant 0 : index
    %c0_44 = arith.constant 0 : index
    %62 = vector.load %arg3[%c6, %c0_43, %c0_44] : memref<9x128x128xbf16, #tpu.memory_space<vmem>>, vector<1x128x128xbf16>
    %63 = vector.shape_cast %62 : vector<1x128x128xbf16> to vector<128x128xbf16>
    %cst_45 = arith.constant dense<0.000000e+00> : vector<256x128xf32>
    %64 = tpu.matmul %61, %63, %cst_45 {dimension_numbers = #tpu.dot_dimension_numbers<[1], [0], [0], [1], [0, 0, 1, 1], [], []>} : vector<256x128xbf16>, vector<128x128xbf16>, vector<256x128xf32> -> vector<256x128xf32>
    %65 = arith.addf %56, %64 : vector<256x128xf32>
    %c2_i32_46 = arith.constant 2 : i32
    %66 = arith.addi %1, %c2_i32_46 : i32
    %c0_47 = arith.constant 0 : index
    %67 = arith.index_cast %66 : i32 to index
    %c1_48 = arith.constant 1 : index
    %c0_49 = arith.constant 0 : index
    %68 = vector.load %arg2[%c0_47, %67, %c1_48, %c0_49] : memref<1x18x18x128xbf16, #tpu.memory_space<vmem>>, vector<1x16x16x128xbf16>
    %69 = vector.shape_cast %68 : vector<1x16x16x128xbf16> to vector<16x16x128xbf16>
    %70 = vector.shape_cast %69 : vector<16x16x128xbf16> to vector<256x128xbf16>
    %c7 = arith.constant 7 : index
    %c0_50 = arith.constant 0 : index
    %c0_51 = arith.constant 0 : index
    %71 = vector.load %arg3[%c7, %c0_50, %c0_51] : memref<9x128x128xbf16, #tpu.memory_space<vmem>>, vector<1x128x128xbf16>
    %72 = vector.shape_cast %71 : vector<1x128x128xbf16> to vector<128x128xbf16>
    %cst_52 = arith.constant dense<0.000000e+00> : vector<256x128xf32>
    %73 = tpu.matmul %70, %72, %cst_52 {dimension_numbers = #tpu.dot_dimension_numbers<[1], [0], [0], [1], [0, 0, 1, 1], [], []>} : vector<256x128xbf16>, vector<128x128xbf16>, vector<256x128xf32> -> vector<256x128xf32>
    %74 = arith.addf %65, %73 : vector<256x128xf32>
    %c2_i32_53 = arith.constant 2 : i32
    %75 = arith.addi %1, %c2_i32_53 : i32
    %c0_54 = arith.constant 0 : index
    %76 = arith.index_cast %75 : i32 to index
    %c2_55 = arith.constant 2 : index
    %c0_56 = arith.constant 0 : index
    %77 = vector.load %arg2[%c0_54, %76, %c2_55, %c0_56] : memref<1x18x18x128xbf16, #tpu.memory_space<vmem>>, vector<1x16x16x128xbf16>
    %78 = vector.shape_cast %77 : vector<1x16x16x128xbf16> to vector<16x16x128xbf16>
    %79 = vector.shape_cast %78 : vector<16x16x128xbf16> to vector<256x128xbf16>
    %c8 = arith.constant 8 : index
    %c0_57 = arith.constant 0 : index
    %c0_58 = arith.constant 0 : index
    %80 = vector.load %arg3[%c8, %c0_57, %c0_58] : memref<9x128x128xbf16, #tpu.memory_space<vmem>>, vector<1x128x128xbf16>
    %81 = vector.shape_cast %80 : vector<1x128x128xbf16> to vector<128x128xbf16>
    %cst_59 = arith.constant dense<0.000000e+00> : vector<256x128xf32>
    %82 = tpu.matmul %79, %81, %cst_59 {dimension_numbers = #tpu.dot_dimension_numbers<[1], [0], [0], [1], [0, 0, 1, 1], [], []>} : vector<256x128xbf16>, vector<128x128xbf16>, vector<256x128xf32> -> vector<256x128xf32>
    %83 = arith.addf %74, %82 : vector<256x128xf32>
    %c0_60 = arith.constant 0 : index
    %c0_61 = arith.constant 0 : index
    %c0_62 = arith.constant 0 : index
    %84 = vector.load %arg4[%c0_60, %c0_61, %c0_62] : memref<1x256x128xf32, #tpu.memory_space<vmem>>, vector<1x256x128xf32>
    %85 = vector.shape_cast %84 : vector<1x256x128xf32> to vector<256x128xf32>
    %86 = vector.shape_cast %83 : vector<256x128xf32> to vector<1x256x128xf32>
    tpu.vector_store %arg4[%c0_60, %c0_61, %c0_62], %86 {strides = array<i32>} : memref<1x256x128xf32, #tpu.memory_space<vmem>>, vector<1x256x128xf32>,
    %cst_63 = arith.constant dense<0.000000e+00> : vector<128xf32>
    %87 = vector.multi_reduction <add>, %83, %cst_63 [0] : vector<256x128xf32> to vector<128xf32>
    %88 = vector.shape_cast %87 : vector<128xf32> to vector<1x128xf32>
    %89 = arith.mulf %83, %83 : vector<256x128xf32>
    %cst_64 = arith.constant dense<0.000000e+00> : vector<128xf32>
    %90 = vector.multi_reduction <add>, %89, %cst_64 [0] : vector<256x128xf32> to vector<128xf32>
    %91 = vector.shape_cast %90 : vector<128xf32> to vector<1x128xf32>
    %c0_i32_65 = arith.constant 0 : i32
    %92 = arith.cmpi eq, %arg0, %c0_i32_65 : i32
    %c0_i32_66 = arith.constant 0 : i32
    %93 = arith.cmpi eq, %arg1, %c0_i32_66 : i32
    %94 = arith.andi %92, %93 : i1
    %95 = arith.extui %94 : i1 to i32
    %c0_i32_67 = arith.constant 0 : i32
    %96 = arith.cmpi ne, %95, %c0_i32_67 : i32
    scf.if %96 {
      %c0_69 = arith.constant 0 : index
      %c0_70 = arith.constant 0 : index
      %100 = vector.load %arg5[%c0_69, %c0_70] : memref<1x128xf32, #tpu.memory_space<vmem>>, vector<1x128xf32>
      tpu.vector_store %arg5[%c0_69, %c0_70], %88 {strides = array<i32>} : memref<1x128xf32, #tpu.memory_space<vmem>>, vector<1x128xf32>,
      %c0_71 = arith.constant 0 : index
      %c0_72 = arith.constant 0 : index
      %101 = vector.load %arg6[%c0_71, %c0_72] : memref<1x128xf32, #tpu.memory_space<vmem>>, vector<1x128xf32>
      tpu.vector_store %arg6[%c0_71, %c0_72], %91 {strides = array<i32>} : memref<1x128xf32, #tpu.memory_space<vmem>>, vector<1x128xf32>,
    } else {
    }
    %true = arith.constant true
    %97 = arith.xori %94, %true : i1
    %98 = arith.extui %97 : i1 to i32
    %c0_i32_68 = arith.constant 0 : i32
    %99 = arith.cmpi ne, %98, %c0_i32_68 : i32
    scf.if %99 {
      %c0_69 = arith.constant 0 : index
      %c0_70 = arith.constant 0 : index
      %100 = vector.load %arg5[%c0_69, %c0_70] : memref<1x128xf32, #tpu.memory_space<vmem>>, vector<1x128xf32>
      %101 = arith.addf %100, %88 : vector<1x128xf32>
      %c0_71 = arith.constant 0 : index
      %c0_72 = arith.constant 0 : index
      %102 = vector.load %arg5[%c0_71, %c0_72] : memref<1x128xf32, #tpu.memory_space<vmem>>, vector<1x128xf32>
      tpu.vector_store %arg5[%c0_71, %c0_72], %101 {strides = array<i32>} : memref<1x128xf32, #tpu.memory_space<vmem>>, vector<1x128xf32>,
      %c0_73 = arith.constant 0 : index
      %c0_74 = arith.constant 0 : index
      %103 = vector.load %arg6[%c0_73, %c0_74] : memref<1x128xf32, #tpu.memory_space<vmem>>, vector<1x128xf32>
      %104 = arith.addf %103, %91 : vector<1x128xf32>
      %c0_75 = arith.constant 0 : index
      %c0_76 = arith.constant 0 : index
      %105 = vector.load %arg6[%c0_75, %c0_76] : memref<1x128xf32, #tpu.memory_space<vmem>>, vector<1x128xf32>
      tpu.vector_store %arg6[%c0_75, %c0_76], %104 {strides = array<i32>} : memref<1x128xf32, #tpu.memory_space<vmem>>, vector<1x128xf32>,
    } else {
    }
    return
  }
  func.func @transform_0(%arg0: i32, %arg1: i32) -> (i32, i32, i32, i32) {
    %c0_i32 = arith.constant 0 : i32
    %c0_i32_0 = arith.constant 0 : i32
    %c0_i32_1 = arith.constant 0 : i32
    %c0_i32_2 = arith.constant 0 : i32
    return %arg0, %c0_i32, %c0_i32_0, %c0_i32_1 : i32, i32, i32, i32
  }
  func.func @transform_1(%arg0: i32, %arg1: i32) -> (i32, i32, i32) {
    %c0_i32 = arith.constant 0 : i32
    %c0_i32_0 = arith.constant 0 : i32
    %c0_i32_1 = arith.constant 0 : i32
    %c0_i32_2 = arith.constant 0 : i32
    return %c0_i32, %c0_i32_0, %c0_i32_1 : i32, i32, i32
  }
  func.func @transform_2(%arg0: i32, %arg1: i32) -> (i32, i32, i32) {
    %c0_i32 = arith.constant 0 : i32
    %c0_i32_0 = arith.constant 0 : i32
    return %arg0, %arg1, %c0_i32 : i32, i32, i32
  }
  func.func @transform_3(%arg0: i32, %arg1: i32) -> (i32, i32) {
    %c0_i32 = arith.constant 0 : i32
    %c0_i32_0 = arith.constant 0 : i32
    %c0_i32_1 = arith.constant 0 : i32
    return %c0_i32, %c0_i32_0 : i32, i32
  }
  func.func @transform_4(%arg0: i32, %arg1: i32) -> (i32, i32) {
    %c0_i32 = arith.constant 0 : i32
    %c0_i32_0 = arith.constant 0 : i32
    %c0_i32_1 = arith.constant 0 : i32
    return %c0_i32, %c0_i32_0 : i32, i32
  }
}

module attributes {stable_mosaic.version = 11 : i64} {
  func.func @_scale_shift_relu_kernel(%arg0: i32, %arg1: memref<512x128xf32, #tpu.memory_space<vmem>>, %arg2: memref<1x128xf32, #tpu.memory_space<vmem>>, %arg3: memref<1x128xf32, #tpu.memory_space<vmem>>, %arg4: memref<512x128xbf16, #tpu.memory_space<vmem>>) attributes {dimension_semantics = [#tpu.dimension_semantics<parallel>], iteration_bounds = array<i64: 1>, scalar_prefetch = 0 : i64, scratch_operands = 0 : i64, tpu.core_type = #tpu.core_type<tc>, window_params = [{transform_indices = @transform_0, window_bounds = array<i64: 512, 128>}, {pipeline_mode = #tpu.pipeline_mode<synchronous>, transform_indices = @transform_1, window_bounds = array<i64: 1, 128>}, {pipeline_mode = #tpu.pipeline_mode<synchronous>, transform_indices = @transform_2, window_bounds = array<i64: 1, 128>}, {transform_indices = @transform_3, window_bounds = array<i64: 512, 128>}]} {
    %c0 = arith.constant 0 : index
    %c0_0 = arith.constant 0 : index
    %0 = vector.load %arg1[%c0, %c0_0] : memref<512x128xf32, #tpu.memory_space<vmem>>, vector<512x128xf32>
    %c0_1 = arith.constant 0 : index
    %c0_2 = arith.constant 0 : index
    %1 = vector.load %arg2[%c0_1, %c0_2] : memref<1x128xf32, #tpu.memory_space<vmem>>, vector<1x128xf32>
    %2 = vector.broadcast %1 : vector<1x128xf32> to vector<512x128xf32>
    %3 = arith.mulf %0, %2 : vector<512x128xf32>
    %c0_3 = arith.constant 0 : index
    %c0_4 = arith.constant 0 : index
    %4 = vector.load %arg3[%c0_3, %c0_4] : memref<1x128xf32, #tpu.memory_space<vmem>>, vector<1x128xf32>
    %5 = vector.broadcast %4 : vector<1x128xf32> to vector<512x128xf32>
    %6 = arith.addf %3, %5 : vector<512x128xf32>
    %cst = arith.constant 0.000000e+00 : f32
    %7 = vector.broadcast %cst : f32 to vector<512x128xf32>
    %8 = arith.maximumf %6, %7 : vector<512x128xf32>
    %9 = arith.truncf %8 : vector<512x128xf32> to vector<512x128xbf16>
    %c0_5 = arith.constant 0 : index
    %c0_6 = arith.constant 0 : index
    %10 = vector.load %arg4[%c0_5, %c0_6] : memref<512x128xbf16, #tpu.memory_space<vmem>>, vector<512x128xbf16>
    tpu.vector_store %arg4[%c0_5, %c0_6], %9 {strides = array<i32>} : memref<512x128xbf16, #tpu.memory_space<vmem>>, vector<512x128xbf16>,
    return
  }
  func.func @transform_0(%arg0: i32) -> (i32, i32) {
    %c0_i32 = arith.constant 0 : i32
    %c0_i32_0 = arith.constant 0 : i32
    return %arg0, %c0_i32 : i32, i32
  }
  func.func @transform_1(%arg0: i32) -> (i32, i32) {
    %c0_i32 = arith.constant 0 : i32
    %c0_i32_0 = arith.constant 0 : i32
    %c0_i32_1 = arith.constant 0 : i32
    return %c0_i32, %c0_i32_0 : i32, i32
  }
  func.func @transform_2(%arg0: i32) -> (i32, i32) {
    %c0_i32 = arith.constant 0 : i32
    %c0_i32_0 = arith.constant 0 : i32
    %c0_i32_1 = arith.constant 0 : i32
    return %c0_i32, %c0_i32_0 : i32, i32
  }
  func.func @transform_3(%arg0: i32) -> (i32, i32) {
    %c0_i32 = arith.constant 0 : i32
    %c0_i32_0 = arith.constant 0 : i32
    return %arg0, %c0_i32 : i32, i32
  }
}

module attributes {stable_mosaic.version = 11 : i64} {
  func.func @_dual_bn_add_relu_kernel(%arg0: i32, %arg1: memref<512x128xf32, #tpu.memory_space<vmem>>, %arg2: memref<1x128xf32, #tpu.memory_space<vmem>>, %arg3: memref<1x128xf32, #tpu.memory_space<vmem>>, %arg4: memref<512x128xf32, #tpu.memory_space<vmem>>, %arg5: memref<1x128xf32, #tpu.memory_space<vmem>>, %arg6: memref<1x128xf32, #tpu.memory_space<vmem>>, %arg7: memref<512x128xf32, #tpu.memory_space<vmem>>) attributes {dimension_semantics = [#tpu.dimension_semantics<parallel>], iteration_bounds = array<i64: 1>, scalar_prefetch = 0 : i64, scratch_operands = 0 : i64, tpu.core_type = #tpu.core_type<tc>, window_params = [{transform_indices = @transform_0, window_bounds = array<i64: 512, 128>}, {pipeline_mode = #tpu.pipeline_mode<synchronous>, transform_indices = @transform_1, window_bounds = array<i64: 1, 128>}, {pipeline_mode = #tpu.pipeline_mode<synchronous>, transform_indices = @transform_2, window_bounds = array<i64: 1, 128>}, {transform_indices = @transform_3, window_bounds = array<i64: 512, 128>}, {pipeline_mode = #tpu.pipeline_mode<synchronous>, transform_indices = @transform_4, window_bounds = array<i64: 1, 128>}, {pipeline_mode = #tpu.pipeline_mode<synchronous>, transform_indices = @transform_5, window_bounds = array<i64: 1, 128>}, {transform_indices = @transform_6, window_bounds = array<i64: 512, 128>}]} {
    %c0 = arith.constant 0 : index
    %c0_0 = arith.constant 0 : index
    %0 = vector.load %arg1[%c0, %c0_0] : memref<512x128xf32, #tpu.memory_space<vmem>>, vector<512x128xf32>
    %c0_1 = arith.constant 0 : index
    %c0_2 = arith.constant 0 : index
    %1 = vector.load %arg2[%c0_1, %c0_2] : memref<1x128xf32, #tpu.memory_space<vmem>>, vector<1x128xf32>
    %2 = vector.broadcast %1 : vector<1x128xf32> to vector<512x128xf32>
    %3 = arith.mulf %0, %2 : vector<512x128xf32>
    %c0_3 = arith.constant 0 : index
    %c0_4 = arith.constant 0 : index
    %4 = vector.load %arg3[%c0_3, %c0_4] : memref<1x128xf32, #tpu.memory_space<vmem>>, vector<1x128xf32>
    %5 = vector.broadcast %4 : vector<1x128xf32> to vector<512x128xf32>
    %6 = arith.addf %3, %5 : vector<512x128xf32>
    %c0_5 = arith.constant 0 : index
    %c0_6 = arith.constant 0 : index
    %7 = vector.load %arg4[%c0_5, %c0_6] : memref<512x128xf32, #tpu.memory_space<vmem>>, vector<512x128xf32>
    %c0_7 = arith.constant 0 : index
    %c0_8 = arith.constant 0 : index
    %8 = vector.load %arg5[%c0_7, %c0_8] : memref<1x128xf32, #tpu.memory_space<vmem>>, vector<1x128xf32>
    %9 = vector.broadcast %8 : vector<1x128xf32> to vector<512x128xf32>
    %10 = arith.mulf %7, %9 : vector<512x128xf32>
    %c0_9 = arith.constant 0 : index
    %c0_10 = arith.constant 0 : index
    %11 = vector.load %arg6[%c0_9, %c0_10] : memref<1x128xf32, #tpu.memory_space<vmem>>, vector<1x128xf32>
    %12 = vector.broadcast %11 : vector<1x128xf32> to vector<512x128xf32>
    %13 = arith.addf %10, %12 : vector<512x128xf32>
    %14 = arith.addf %6, %13 : vector<512x128xf32>
    %cst = arith.constant 0.000000e+00 : f32
    %15 = vector.broadcast %cst : f32 to vector<512x128xf32>
    %16 = arith.maximumf %14, %15 : vector<512x128xf32>
    %c0_11 = arith.constant 0 : index
    %c0_12 = arith.constant 0 : index
    %17 = vector.load %arg7[%c0_11, %c0_12] : memref<512x128xf32, #tpu.memory_space<vmem>>, vector<512x128xf32>
    tpu.vector_store %arg7[%c0_11, %c0_12], %16 {strides = array<i32>} : memref<512x128xf32, #tpu.memory_space<vmem>>, vector<512x128xf32>,
    return
  }
  func.func @transform_0(%arg0: i32) -> (i32, i32) {
    %c0_i32 = arith.constant 0 : i32
    %c0_i32_0 = arith.constant 0 : i32
    return %arg0, %c0_i32 : i32, i32
  }
  func.func @transform_1(%arg0: i32) -> (i32, i32) {
    %c0_i32 = arith.constant 0 : i32
    %c0_i32_0 = arith.constant 0 : i32
    %c0_i32_1 = arith.constant 0 : i32
    return %c0_i32, %c0_i32_0 : i32, i32
  }
  func.func @transform_2(%arg0: i32) -> (i32, i32) {
    %c0_i32 = arith.constant 0 : i32
    %c0_i32_0 = arith.constant 0 : i32
    %c0_i32_1 = arith.constant 0 : i32
    return %c0_i32, %c0_i32_0 : i32, i32
  }
  func.func @transform_3(%arg0: i32) -> (i32, i32) {
    %c0_i32 = arith.constant 0 : i32
    %c0_i32_0 = arith.constant 0 : i32
    return %arg0, %c0_i32 : i32, i32
  }
  func.func @transform_4(%arg0: i32) -> (i32, i32) {
    %c0_i32 = arith.constant 0 : i32
    %c0_i32_0 = arith.constant 0 : i32
    %c0_i32_1 = arith.constant 0 : i32
    return %c0_i32, %c0_i32_0 : i32, i32
  }
  func.func @transform_5(%arg0: i32) -> (i32, i32) {
    %c0_i32 = arith.constant 0 : i32
    %c0_i32_0 = arith.constant 0 : i32
    %c0_i32_1 = arith.constant 0 : i32
    return %c0_i32, %c0_i32_0 : i32, i32
  }
  func.func @transform_6(%arg0: i32) -> (i32, i32) {
    %c0_i32 = arith.constant 0 : i32
    %c0_i32_0 = arith.constant 0 : i32
    return %arg0, %c0_i32 : i32, i32
  }
}

</mosaic_0001>

<bundles_post_ra>
// kernel: res_block_forward.6
= control target key start
LH: loop header
LB: loop body
LE: loop exit
PB: predicated region body
PF: predicated region fallthrough
CT: control target
= control target key end

     0   :  { %s1375_s0 = inlined_call_operand.vmem [shape: f32[512,128], index: 0, kind: input, shape index: {}]   ;;  %s1376_s1 = inlined_call_operand.vmem [shape: f32[1,128], index: 1, kind: input, shape index: {}]   ;;  %s1377_s2 = inlined_call_operand.vmem [shape: f32[1,128], index: 2, kind: input, shape index: {}]   ;;  %s1378_s3 = inlined_call_operand.vmem [shape: bf16[512,128], index: 3, kind: output, shape index: {}]  }
   0x1   :  { %v14_v0 = vld [vmem:[%s1375_s0] sm:$0xff]  ;;  %v15_v1 = vld [vmem:[%s1375_s0 + $0x8] sm:$0xff]  ;;  %v16_v6 = vld [vmem:[%s1375_s0 + $0x10] sm:$0xff] }
   0x2   :  { %v958_v2 = vld [vmem:[%s1376_s1] ss:$0 sm:$0xff]  ;;  %v17_v7 = vld [vmem:[%s1375_s0 + $0x18] sm:$0xff]  ;;  %v19_v11 = vld [vmem:[%s1375_s0 + $0x28] sm:$0xff] }
   0x3   :  { %v85_v3 = vmul.f32 %v958_v2, %v14_v0  ;;  %v86_v4 = vmul.f32 %v958_v2, %v15_v1  ;;  %v965_v5 = vld [vmem:[%s1377_s2] ss:$0 sm:$0xff]  ;;  %v87_v8 = vmul.f32 %v958_v2, %v16_v6  ;;  %v88_v9 = vmul.f32 %v958_v2, %v17_v7  ;;  %v20_v12 = vld [vmem:[%s1375_s0 + $0x30] sm:$0xff]  ;;  %v21_v17 = vld [vmem:[%s1375_s0 + $0x38] sm:$0xff] }
   0x4   :  { %v18_v10 = vld [vmem:[%s1375_s0 + $0x20] sm:$0xff]  ;;  %v90_v16 = vmul.f32 %v958_v2, %v19_v11  ;;  %v91_v20 = vmul.f32 %v958_v2, %v20_v12  ;;  %v92_v21 = vmul.f32 %v958_v2, %v21_v17  ;;  %v23_v27 = vld [vmem:[%s1375_s0 + $0x48] sm:$0xff]  ;;  %v24_v32 = vld [vmem:[%s1375_s0 + $0x50] sm:$0xff] }
   0x5   :  { %v156_v13 = vadd.f32 %v965_v5, %v85_v3  ;;  %v157_v14 = vadd.f32 %v965_v5, %v86_v4  ;;  %v89_v15 = vmul.f32 %v958_v2, %v18_v10  ;;  %v158_v18 = vadd.f32 %v965_v5, %v87_v8  ;;  %v22_v22 = vld [vmem:[%s1375_s0 + $0x40] sm:$0xff]  ;;  %v25_v33 = vld [vmem:[%s1375_s0 + $0x58] sm:$0xff]  ;;  %v27_v39 = vld [vmem:[%s1375_s0 + $0x68] sm:$0xff] }
   0x6   :  { %v159_v19 = vadd.f32 %v965_v5, %v88_v9  ;;  %v161_v26 = vadd.f32 %v965_v5, %v90_v16  ;;  %v162_v30 = vadd.f32 %v965_v5, %v91_v20  ;;  %v163_v31 = vadd.f32 %v965_v5, %v92_v21  ;;  %v26_v38 = vld [vmem:[%s1375_s0 + $0x60] sm:$0xff]  ;;  %v28_v44 = vld [vmem:[%s1375_s0 + $0x70] sm:$0xff]  ;;  %v29_v49 = vld [vmem:[%s1375_s0 + $0x78] sm:$0xff] }
   0x7   :  { %v220_v23 = vmax.f32 %v156_v13, 0.0  ;;  %v221_v24 = vmax.f32 %v157_v14, 0.0  ;;  %v160_v25 = vadd.f32 %v965_v5, %v89_v15  ;;  %v222_v28 = vmax.f32 %v158_v18, 0.0  ;;  %v30_v54 = vld [vmem:[%s1375_s0 + $0x80] sm:$0xff]  ;;  %v31_v63 = vld [vmem:[%s1375_s0 + $0x88] sm:$0xff]  ;;  %v32_v6 = vld [vmem:[%s1375_s0 + $0x90] sm:$0xff] }
   0x8   :  { %v223_v29 = vmax.f32 %v159_v19, 0.0  ;;  %v225_v36 = vmax.f32 %v161_v26, 0.0  ;;  %v93_v37 = vmul.f32 %v958_v2, %v22_v22  ;;  %v226_v41 = vmax.f32 %v162_v30, 0.0  ;;  %v33_v7 = vld [vmem:[%s1375_s0 + $0x98] sm:$0xff]  ;;  %v34_v12 = vld [vmem:[%s1375_s0 + $0xa0] sm:$0xff]  ;;  %v35_v13 = vld [vmem:[%s1375_s0 + $0xa8] sm:$0xff] }
   0x9   :  { %v741_v34 = vpack.c.bf16 %v221_v24, %v220_v23  ;;  %v224_v35 = vmax.f32 %v160_v25, 0.0  ;;  %v227_v42 = vmax.f32 %v163_v31, 0.0  ;;  %v94_v43 = vmul.f32 %v958_v2, %v23_v27  ;;  %v36_v18 = vld [vmem:[%s1375_s0 + $0xb0] sm:$0xff]  ;;  %v37_v23 = vld [vmem:[%s1375_s0 + $0xb8] sm:$0xff] }
   0xa   :  { %v746_v40 = vpack.c.bf16 %v223_v29, %v222_v28  ;;  %v164_v46 = vadd.f32 %v965_v5, %v93_v37  ;;  %v95_v47 = vmul.f32 %v958_v2, %v24_v32  ;;  %v96_v48 = vmul.f32 %v958_v2, %v25_v33  ;;  %v38_v28 = vld [vmem:[%s1375_s0 + $0xc0] sm:$0xff]  ;;  %v39_v37 = vld [vmem:[%s1375_s0 + $0xc8] sm:$0xff] }
   0xb   :  { %742 = vst [vmem:[%s1378_s3] sm:$0xff] %v741_v34   ;;  %v751_v45 = vpack.c.bf16 %v225_v36, %v224_v35  ;;  %v756_v50 = vpack.c.bf16 %v227_v42, %v226_v41  ;;  %v165_v51 = vadd.f32 %v965_v5, %v94_v43  ;;  %v97_v52 = vmul.f32 %v958_v2, %v26_v38  ;;  %v40_v42 = vld [vmem:[%s1375_s0 + $0xd0] sm:$0xff]  ;;  %v41_v43 = vld [vmem:[%s1375_s0 + $0xd8] sm:$0xff] }
   0xc   :  { %898 = vst [vmem:[%s1378_s3 + $0x8] sm:$0xff] %v746_v40   ;;  %v98_v53 = vmul.f32 %v958_v2, %v27_v39  ;;  %v228_v55 = vmax.f32 %v164_v46, 0.0  ;;  %v166_v56 = vadd.f32 %v965_v5, %v95_v47  ;;  %v167_v57 = vadd.f32 %v965_v5, %v96_v48  ;;  %v42_v48 = vld [vmem:[%s1375_s0 + $0xe0] sm:$0xff] }
   0xd   :  { %899 = vst [vmem:[%s1378_s3 + $0x10] sm:$0xff] %v751_v45   ;;  %v99_v58 = vmul.f32 %v958_v2, %v28_v44  ;;  %900 = vst [vmem:[%s1378_s3 + $0x18] sm:$0xff] %v756_v50   ;;  %v229_v59 = vmax.f32 %v165_v51, 0.0  ;;  %v168_v60 = vadd.f32 %v965_v5, %v97_v52  ;;  %v100_v62 = vmul.f32 %v958_v2, %v29_v49  ;;  %v43_v49 = vld [vmem:[%s1375_s0 + $0xe8] sm:$0xff] }
   0xe   :  { %v169_v61 = vadd.f32 %v965_v5, %v98_v53  ;;  %v230_v0 = vmax.f32 %v166_v56, 0.0  ;;  %v231_v1 = vmax.f32 %v167_v57, 0.0  ;;  %v101_v4 = vmul.f32 %v958_v2, %v30_v54  ;;  %v44_v54 = vld [vmem:[%s1375_s0 + $0xf0] sm:$0xff] }
   0xf   :  { %v170_v3 = vadd.f32 %v965_v5, %v99_v58  ;;  %v761_v8 = vpack.c.bf16 %v229_v59, %v228_v55  ;;  %v232_v9 = vmax.f32 %v168_v60, 0.0  ;;  %v171_v11 = vadd.f32 %v965_v5, %v100_v62  ;;  %v45_v59 = vld [vmem:[%s1375_s0 + $0xf8] sm:$0xff] }
  0x10   :  { %v233_v10 = vmax.f32 %v169_v61, 0.0  ;;  %v766_v14 = vpack.c.bf16 %v231_v1, %v230_v0  ;;  %v102_v16 = vmul.f32 %v958_v2, %v31_v63  ;;  %v172_v17 = vadd.f32 %v965_v5, %v101_v4  ;;  %v46_v0 = vld [vmem:[%s1375_s0 + $0x100] sm:$0xff] }
  0x11   :  { %v234_v15 = vmax.f32 %v170_v3, 0.0  ;;  %901 = vst [vmem:[%s1378_s3 + $0x20] sm:$0xff] %v761_v8   ;;  %v235_v20 = vmax.f32 %v171_v11, 0.0  ;;  %v103_v21 = vmul.f32 %v958_v2, %v32_v6  ;;  %v104_v22 = vmul.f32 %v958_v2, %v33_v7  ;;  %v47_v11 = vld [vmem:[%s1375_s0 + $0x108] sm:$0xff] }
  0x12   :  { %v771_v19 = vpack.c.bf16 %v233_v10, %v232_v9  ;;  %902 = vst [vmem:[%s1378_s3 + $0x28] sm:$0xff] %v766_v14   ;;  %v173_v24 = vadd.f32 %v965_v5, %v102_v16  ;;  %v236_v25 = vmax.f32 %v172_v17, 0.0  ;;  %v105_v26 = vmul.f32 %v958_v2, %v34_v12  ;;  %v48_v16 = vld [vmem:[%s1375_s0 + $0x110] sm:$0xff]  ;;  %v49_v17 = vld [vmem:[%s1375_s0 + $0x118] sm:$0xff] }
  0x13   :  { %v106_v27 = vmul.f32 %v958_v2, %v35_v13  ;;  %v776_v29 = vpack.c.bf16 %v235_v20, %v234_v15  ;;  %v174_v30 = vadd.f32 %v965_v5, %v103_v21  ;;  %v175_v31 = vadd.f32 %v965_v5, %v104_v22  ;;  %v50_v22 = vld [vmem:[%s1375_s0 + $0x120] sm:$0xff] }
  0x14   :  { %903 = vst [vmem:[%s1378_s3 + $0x30] sm:$0xff] %v771_v19   ;;  %v107_v32 = vmul.f32 %v958_v2, %v36_v18  ;;  %v237_v33 = vmax.f32 %v173_v24, 0.0  ;;  %v176_v34 = vadd.f32 %v965_v5, %v105_v26  ;;  %v108_v36 = vmul.f32 %v958_v2, %v37_v23  ;;  %v51_v23 = vld [vmem:[%s1375_s0 + $0x128] sm:$0xff] }
  0x15   :  { %v177_v35 = vadd.f32 %v965_v5, %v106_v27  ;;  %904 = vst [vmem:[%s1378_s3 + $0x38] sm:$0xff] %v776_v29   ;;  %v238_v38 = vmax.f32 %v174_v30, 0.0  ;;  %v239_v39 = vmax.f32 %v175_v31, 0.0  ;;  %v109_v41 = vmul.f32 %v958_v2, %v38_v28  ;;  %v52_v28 = vld [vmem:[%s1375_s0 + $0x130] sm:$0xff] }
  0x16   :  { %v178_v40 = vadd.f32 %v965_v5, %v107_v32  ;;  %v781_v44 = vpack.c.bf16 %v237_v33, %v236_v25  ;;  %v240_v45 = vmax.f32 %v176_v34, 0.0  ;;  %v179_v47 = vadd.f32 %v965_v5, %v108_v36  ;;  %v53_v33 = vld [vmem:[%s1375_s0 + $0x138] sm:$0xff] }
  0x17   :  { %v241_v46 = vmax.f32 %v177_v35, 0.0  ;;  %v786_v50 = vpack.c.bf16 %v239_v39, %v238_v38  ;;  %v110_v52 = vmul.f32 %v958_v2, %v39_v37  ;;  %v180_v53 = vadd.f32 %v965_v5, %v109_v41  ;;  %v54_v38 = vld [vmem:[%s1375_s0 + $0x140] sm:$0xff] }
  0x18   :  { %v242_v51 = vmax.f32 %v178_v40, 0.0  ;;  %905 = vst [vmem:[%s1378_s3 + $0x40] sm:$0xff] %v781_v44   ;;  %v243_v56 = vmax.f32 %v179_v47, 0.0  ;;  %v111_v57 = vmul.f32 %v958_v2, %v40_v42  ;;  %v112_v58 = vmul.f32 %v958_v2, %v41_v43  ;;  %v55_v47 = vld [vmem:[%s1375_s0 + $0x148] sm:$0xff] }
  0x19   :  { %v791_v55 = vpack.c.bf16 %v241_v46, %v240_v45  ;;  %906 = vst [vmem:[%s1378_s3 + $0x48] sm:$0xff] %v786_v50   ;;  %v181_v60 = vadd.f32 %v965_v5, %v110_v52  ;;  %v244_v61 = vmax.f32 %v180_v53, 0.0  ;;  %v113_v62 = vmul.f32 %v958_v2, %v42_v48  ;;  %v56_v52 = vld [vmem:[%s1375_s0 + $0x150] sm:$0xff]  ;;  %v57_v53 = vld [vmem:[%s1375_s0 + $0x158] sm:$0xff] }
  0x1a   :  { %v114_v63 = vmul.f32 %v958_v2, %v43_v49  ;;  %v796_v1 = vpack.c.bf16 %v243_v56, %v242_v51  ;;  %v182_v3 = vadd.f32 %v965_v5, %v111_v57  ;;  %v183_v4 = vadd.f32 %v965_v5, %v112_v58  ;;  %v58_v58 = vld [vmem:[%s1375_s0 + $0x160] sm:$0xff] }
  0x1b   :  { %907 = vst [vmem:[%s1378_s3 + $0x50] sm:$0xff] %v791_v55   ;;  %v115_v6 = vmul.f32 %v958_v2, %v44_v54  ;;  %v245_v7 = vmax.f32 %v181_v60, 0.0  ;;  %v184_v8 = vadd.f32 %v965_v5, %v113_v62  ;;  %v116_v10 = vmul.f32 %v958_v2, %v45_v59  ;;  %v59_v59 = vld [vmem:[%s1375_s0 + $0x168] sm:$0xff] }
  0x1c   :  { %v185_v9 = vadd.f32 %v965_v5, %v114_v63  ;;  %908 = vst [vmem:[%s1378_s3 + $0x58] sm:$0xff] %v796_v1   ;;  %v246_v12 = vmax.f32 %v182_v3, 0.0  ;;  %v247_v13 = vmax.f32 %v183_v4, 0.0  ;;  %v117_v15 = vmul.f32 %v958_v2, %v46_v0  ;;  %v60_v0 = vld [vmem:[%s1375_s0 + $0x170] sm:$0xff] }
  0x1d   :  { %v186_v14 = vadd.f32 %v965_v5, %v115_v6  ;;  %v801_v18 = vpack.c.bf16 %v245_v7, %v244_v61  ;;  %v248_v19 = vmax.f32 %v184_v8, 0.0  ;;  %v187_v21 = vadd.f32 %v965_v5, %v116_v10  ;;  %v61_v7 = vld [vmem:[%s1375_s0 + $0x178] sm:$0xff] }
  0x1e   :  { %v249_v20 = vmax.f32 %v185_v9, 0.0  ;;  %v806_v24 = vpack.c.bf16 %v247_v13, %v246_v12  ;;  %v118_v26 = vmul.f32 %v958_v2, %v47_v11  ;;  %v188_v27 = vadd.f32 %v965_v5, %v117_v15  ;;  %v62_v12 = vld [vmem:[%s1375_s0 + $0x180] sm:$0xff] }
  0x1f   :  { %v250_v25 = vmax.f32 %v186_v14, 0.0  ;;  %909 = vst [vmem:[%s1378_s3 + $0x60] sm:$0xff] %v801_v18   ;;  %v251_v30 = vmax.f32 %v187_v21, 0.0  ;;  %v119_v31 = vmul.f32 %v958_v2, %v48_v16  ;;  %v120_v32 = vmul.f32 %v958_v2, %v49_v17  ;;  %v63_v21 = vld [vmem:[%s1375_s0 + $0x188] sm:$0xff] }
  0x20   :  { %v811_v29 = vpack.c.bf16 %v249_v20, %v248_v19  ;;  %910 = vst [vmem:[%s1378_s3 + $0x68] sm:$0xff] %v806_v24   ;;  %v189_v34 = vadd.f32 %v965_v5, %v118_v26  ;;  %v252_v35 = vmax.f32 %v188_v27, 0.0  ;;  %v121_v36 = vmul.f32 %v958_v2, %v50_v22  ;;  %v64_v26 = vld [vmem:[%s1375_s0 + $0x190] sm:$0xff]  ;;  %v65_v27 = vld [vmem:[%s1375_s0 + $0x198] sm:$0xff] }
  0x21   :  { %v122_v37 = vmul.f32 %v958_v2, %v51_v23  ;;  %v816_v39 = vpack.c.bf16 %v251_v30, %v250_v25  ;;  %v190_v40 = vadd.f32 %v965_v5, %v119_v31  ;;  %v191_v41 = vadd.f32 %v965_v5, %v120_v32  ;;  %v66_v32 = vld [vmem:[%s1375_s0 + $0x1a0] sm:$0xff] }
  0x22   :  { %911 = vst [vmem:[%s1378_s3 + $0x70] sm:$0xff] %v811_v29   ;;  %v123_v42 = vmul.f32 %v958_v2, %v52_v28  ;;  %v253_v43 = vmax.f32 %v189_v34, 0.0  ;;  %v192_v44 = vadd.f32 %v965_v5, %v121_v36  ;;  %v124_v46 = vmul.f32 %v958_v2, %v53_v33  ;;  %v67_v33 = vld [vmem:[%s1375_s0 + $0x1a8] sm:$0xff] }
  0x23   :  { %v193_v45 = vadd.f32 %v965_v5, %v122_v37  ;;  %912 = vst [vmem:[%s1378_s3 + $0x78] sm:$0xff] %v816_v39   ;;  %v254_v48 = vmax.f32 %v190_v40, 0.0  ;;  %v255_v49 = vmax.f32 %v191_v41, 0.0  ;;  %v125_v51 = vmul.f32 %v958_v2, %v54_v38  ;;  %v68_v38 = vld [vmem:[%s1375_s0 + $0x1b0] sm:$0xff] }
  0x24   :  { %v194_v50 = vadd.f32 %v965_v5, %v123_v42  ;;  %v821_v54 = vpack.c.bf16 %v253_v43, %v252_v35  ;;  %v256_v55 = vmax.f32 %v192_v44, 0.0  ;;  %v195_v57 = vadd.f32 %v965_v5, %v124_v46  ;;  %v69_v43 = vld [vmem:[%s1375_s0 + $0x1b8] sm:$0xff] }
  0x25   :  { %v257_v56 = vmax.f32 %v193_v45, 0.0  ;;  %v826_v60 = vpack.c.bf16 %v255_v49, %v254_v48  ;;  %v126_v62 = vmul.f32 %v958_v2, %v55_v47  ;;  %v196_v63 = vadd.f32 %v965_v5, %v125_v51  ;;  %v70_v48 = vld [vmem:[%s1375_s0 + $0x1c0] sm:$0xff] }
  0x26   :  { %v258_v61 = vmax.f32 %v194_v50, 0.0  ;;  %913 = vst [vmem:[%s1378_s3 + $0x80] sm:$0xff] %v821_v54   ;;  %v259_v3 = vmax.f32 %v195_v57, 0.0  ;;  %v127_v4 = vmul.f32 %v958_v2, %v56_v52  ;;  %v128_v6 = vmul.f32 %v958_v2, %v57_v53  ;;  %v71_v57 = vld [vmem:[%s1375_s0 + $0x1c8] sm:$0xff] }
  0x27   :  { %v831_v1 = vpack.c.bf16 %v257_v56, %v256_v55  ;;  %914 = vst [vmem:[%s1378_s3 + $0x88] sm:$0xff] %v826_v60   ;;  %v197_v8 = vadd.f32 %v965_v5, %v126_v62  ;;  %v260_v9 = vmax.f32 %v196_v63, 0.0  ;;  %v129_v10 = vmul.f32 %v958_v2, %v58_v58  ;;  %v72_v62 = vld [vmem:[%s1375_s0 + $0x1d0] sm:$0xff]  ;;  %v73_v63 = vld [vmem:[%s1375_s0 + $0x1d8] sm:$0xff] }
  0x28   :  { %v130_v11 = vmul.f32 %v958_v2, %v59_v59  ;;  %v836_v13 = vpack.c.bf16 %v259_v3, %v258_v61  ;;  %v198_v14 = vadd.f32 %v965_v5, %v127_v4  ;;  %v199_v15 = vadd.f32 %v965_v5, %v128_v6  ;;  %v74_v6 = vld [vmem:[%s1375_s0 + $0x1e0] sm:$0xff] }
  0x29   :  { %915 = vst [vmem:[%s1378_s3 + $0x90] sm:$0xff] %v831_v1   ;;  %v131_v16 = vmul.f32 %v958_v2, %v60_v0  ;;  %v261_v17 = vmax.f32 %v197_v8, 0.0  ;;  %v200_v18 = vadd.f32 %v965_v5, %v129_v10  ;;  %v132_v20 = vmul.f32 %v958_v2, %v61_v7  ;;  %v75_v7 = vld [vmem:[%s1375_s0 + $0x1e8] sm:$0xff] }
  0x2a   :  { %v201_v19 = vadd.f32 %v965_v5, %v130_v11  ;;  %916 = vst [vmem:[%s1378_s3 + $0x98] sm:$0xff] %v836_v13   ;;  %v262_v22 = vmax.f32 %v198_v14, 0.0  ;;  %v263_v23 = vmax.f32 %v199_v15, 0.0  ;;  %v133_v25 = vmul.f32 %v958_v2, %v62_v12  ;;  %v76_v12 = vld [vmem:[%s1375_s0 + $0x1f0] sm:$0xff] }
  0x2b   :  { %v202_v24 = vadd.f32 %v965_v5, %v131_v16  ;;  %v841_v28 = vpack.c.bf16 %v261_v17, %v260_v9  ;;  %v264_v29 = vmax.f32 %v200_v18, 0.0  ;;  %v203_v31 = vadd.f32 %v965_v5, %v132_v20  ;;  %v77_v17 = vld [vmem:[%s1375_s0 + $0x1f8] sm:$0xff] }
  0x2c   :  { %v265_v30 = vmax.f32 %v201_v19, 0.0  ;;  %v846_v34 = vpack.c.bf16 %v263_v23, %v262_v22  ;;  %v134_v36 = vmul.f32 %v958_v2, %v63_v21  ;;  %v204_v37 = vadd.f32 %v965_v5, %v133_v25 }
  0x2d   :  { %v266_v35 = vmax.f32 %v202_v24, 0.0  ;;  %917 = vst [vmem:[%s1378_s3 + $0xa0] sm:$0xff] %v841_v28   ;;  %v267_v40 = vmax.f32 %v203_v31, 0.0  ;;  %v135_v41 = vmul.f32 %v958_v2, %v64_v26  ;;  %v136_v42 = vmul.f32 %v958_v2, %v65_v27 }
  0x2e   :  { %v851_v39 = vpack.c.bf16 %v265_v30, %v264_v29  ;;  %918 = vst [vmem:[%s1378_s3 + $0xa8] sm:$0xff] %v846_v34   ;;  %v205_v44 = vadd.f32 %v965_v5, %v134_v36  ;;  %v268_v45 = vmax.f32 %v204_v37, 0.0  ;;  %v137_v46 = vmul.f32 %v958_v2, %v66_v32 }
  0x2f   :  { %v138_v47 = vmul.f32 %v958_v2, %v67_v33  ;;  %v856_v49 = vpack.c.bf16 %v267_v40, %v266_v35  ;;  %v206_v50 = vadd.f32 %v965_v5, %v135_v41  ;;  %v207_v51 = vadd.f32 %v965_v5, %v136_v42 }
  0x30   :  { %919 = vst [vmem:[%s1378_s3 + $0xb0] sm:$0xff] %v851_v39   ;;  %v139_v52 = vmul.f32 %v958_v2, %v68_v38  ;;  %v269_v53 = vmax.f32 %v205_v44, 0.0  ;;  %v208_v54 = vadd.f32 %v965_v5, %v137_v46  ;;  %v140_v56 = vmul.f32 %v958_v2, %v69_v43 }
  0x31   :  { %v209_v55 = vadd.f32 %v965_v5, %v138_v47  ;;  %920 = vst [vmem:[%s1378_s3 + $0xb8] sm:$0xff] %v856_v49   ;;  %v270_v58 = vmax.f32 %v206_v50, 0.0  ;;  %v271_v59 = vmax.f32 %v207_v51, 0.0  ;;  %v141_v61 = vmul.f32 %v958_v2, %v70_v48 }
  0x32   :  { %v210_v60 = vadd.f32 %v965_v5, %v139_v52  ;;  %v861_v0 = vpack.c.bf16 %v269_v53, %v268_v45  ;;  %v272_v1 = vmax.f32 %v208_v54, 0.0  ;;  %v211_v4 = vadd.f32 %v965_v5, %v140_v56 }
  0x33   :  { %v273_v3 = vmax.f32 %v209_v55, 0.0  ;;  %v866_v8 = vpack.c.bf16 %v271_v59, %v270_v58  ;;  %v142_v10 = vmul.f32 %v958_v2, %v71_v57  ;;  %v212_v11 = vadd.f32 %v965_v5, %v141_v61 }
  0x34   :  { %v274_v9 = vmax.f32 %v210_v60, 0.0  ;;  %921 = vst [vmem:[%s1378_s3 + $0xc0] sm:$0xff] %v861_v0   ;;  %v275_v14 = vmax.f32 %v211_v4, 0.0  ;;  %v143_v15 = vmul.f32 %v958_v2, %v72_v62  ;;  %v144_v16 = vmul.f32 %v958_v2, %v73_v63 }
  0x35   :  { %v871_v13 = vpack.c.bf16 %v273_v3, %v272_v1  ;;  %922 = vst [vmem:[%s1378_s3 + $0xc8] sm:$0xff] %v866_v8   ;;  %v213_v18 = vadd.f32 %v965_v5, %v142_v10  ;;  %v276_v19 = vmax.f32 %v212_v11, 0.0  ;;  %v145_v20 = vmul.f32 %v958_v2, %v74_v6 }
  0x36   :  { %v146_v21 = vmul.f32 %v958_v2, %v75_v7  ;;  %v876_v22 = vpack.c.bf16 %v275_v14, %v274_v9  ;;  %v214_v23 = vadd.f32 %v965_v5, %v143_v15  ;;  %v215_v24 = vadd.f32 %v965_v5, %v144_v16 }
  0x37   :  { %923 = vst [vmem:[%s1378_s3 + $0xd0] sm:$0xff] %v871_v13   ;;  %v147_v25 = vmul.f32 %v958_v2, %v76_v12  ;;  %v277_v26 = vmax.f32 %v213_v18, 0.0  ;;  %v216_v27 = vadd.f32 %v965_v5, %v145_v20  ;;  %v148_v29 = vmul.f32 %v958_v2, %v77_v17 }
  0x38   :  { %v217_v28 = vadd.f32 %v965_v5, %v146_v21  ;;  %924 = vst [vmem:[%s1378_s3 + $0xd8] sm:$0xff] %v876_v22   ;;  %v278_v30 = vmax.f32 %v214_v23, 0.0  ;;  %v279_v31 = vmax.f32 %v215_v24, 0.0 }
  0x39   :  { %v218_v32 = vadd.f32 %v965_v5, %v147_v25  ;;  %v881_v33 = vpack.c.bf16 %v277_v26, %v276_v19  ;;  %v280_v34 = vmax.f32 %v216_v27, 0.0  ;;  %v219_v36 = vadd.f32 %v965_v5, %v148_v29 }
  0x3a   :  { %v281_v35 = vmax.f32 %v217_v28, 0.0  ;;  %v886_v37 = vpack.c.bf16 %v279_v31, %v278_v30 }
  0x3b   :  { %v282_v38 = vmax.f32 %v218_v32, 0.0  ;;  %925 = vst [vmem:[%s1378_s3 + $0xe0] sm:$0xff] %v881_v33   ;;  %v283_v39 = vmax.f32 %v219_v36, 0.0 }
  0x3c   :  { %v891_v2 = vpack.c.bf16 %v281_v35, %v280_v34  ;;  %926 = vst [vmem:[%s1378_s3 + $0xe8] sm:$0xff] %v886_v37  }
  0x3d   :  { %v896_v40 = vpack.c.bf16 %v283_v39, %v282_v38 }
  0x3e   :  { %927 = vst [vmem:[%s1378_s3 + $0xf0] sm:$0xff] %v891_v2  }
  0x3f   :  { %928 = vst [vmem:[%s1378_s3 + $0xf8] sm:$0xff] %v896_v40  }

// kernel: res_block_forward.9
= control target key start
LH: loop header
LB: loop body
LE: loop exit
PB: predicated region body
PF: predicated region fallthrough
CT: control target
= control target key end

     0   :  { %s1511_s0 = inlined_call_operand.vmem [shape: f32[512,128], index: 0, kind: input, shape index: {}]   ;;  %s1512_s1 = inlined_call_operand.vmem [shape: f32[1,128], index: 1, kind: input, shape index: {}]   ;;  %s1513_s2 = inlined_call_operand.vmem [shape: f32[1,128], index: 2, kind: input, shape index: {}]   ;;  %s1514_s3 = inlined_call_operand.vmem [shape: f32[512,128], index: 3, kind: input, shape index: {}]   ;;  %s1515_s4 = inlined_call_operand.vmem [shape: f32[1,128], index: 4, kind: input, shape index: {}]   ;;  %s1516_s5 = inlined_call_operand.vmem [shape: f32[1,128], index: 5, kind: input, shape index: {}]   ;;  %s1517_s6 = inlined_call_operand.vmem [shape: f32[512,128], index: 6, kind: output, shape index: {}]  }
   0x1   :  { %v23_v0 = vld [vmem:[%s1511_s0] sm:$0xff]  ;;  %v24_v8 = vld [vmem:[%s1511_s0 + $0x8] sm:$0xff]  ;;  %v25_v10 = vld [vmem:[%s1511_s0 + $0x10] sm:$0xff] }
   0x2   :  { %v680_v1 = vld [vmem:[%s1512_s1] ss:$0 sm:$0xff]  ;;  %v230_v9 = vld [vmem:[%s1514_s3 + $0x8] sm:$0xff]  ;;  %v231_v15 = vld [vmem:[%s1514_s3 + $0x10] sm:$0xff] }
   0x3   :  { %v685_v2 = vld [vmem:[%s1513_s2] ss:$0 sm:$0xff]  ;;  %v94_v3 = vmul.f32 %v680_v1, %v23_v0  ;;  %v95_v12 = vmul.f32 %v680_v1, %v24_v8  ;;  %v96_v14 = vmul.f32 %v680_v1, %v25_v10  ;;  %v26_v16 = vld [vmem:[%s1511_s0 + $0x18] sm:$0xff]  ;;  %v28_v24 = vld [vmem:[%s1511_s0 + $0x28] sm:$0xff] }
   0x4   :  { %v229_v4 = vld [vmem:[%s1514_s3] sm:$0xff]  ;;  %v232_v17 = vld [vmem:[%s1514_s3 + $0x18] sm:$0xff]  ;;  %v97_v20 = vmul.f32 %v680_v1, %v26_v16  ;;  %v234_v29 = vld [vmem:[%s1514_s3 + $0x28] sm:$0xff]  ;;  %v99_v38 = vmul.f32 %v680_v1, %v28_v24 }
   0x5   :  { %v694_v5 = vld [vmem:[%s1515_s4] ss:$0 sm:$0xff]  ;;  %v165_v11 = vadd.f32 %v685_v2, %v94_v3  ;;  %v166_v25 = vadd.f32 %v685_v2, %v95_v12  ;;  %v167_v27 = vadd.f32 %v685_v2, %v96_v14  ;;  %v29_v34 = vld [vmem:[%s1511_s0 + $0x30] sm:$0xff]  ;;  %v30_v44 = vld [vmem:[%s1511_s0 + $0x38] sm:$0xff] }
   0x6   :  { %v699_v6 = vld [vmem:[%s1516_s5] ss:$0 sm:$0xff]  ;;  %v300_v7 = vmul.f32 %v694_v5, %v229_v4  ;;  %v301_v13 = vmul.f32 %v694_v5, %v230_v9  ;;  %v302_v19 = vmul.f32 %v694_v5, %v231_v15  ;;  %v303_v21 = vmul.f32 %v694_v5, %v232_v17  ;;  %v235_v39 = vld [vmem:[%s1514_s3 + $0x30] sm:$0xff]  ;;  %v236_v45 = vld [vmem:[%s1514_s3 + $0x38] sm:$0xff] }
   0x7   :  { %v27_v22 = vld [vmem:[%s1511_s0 + $0x20] sm:$0xff]  ;;  %v168_v32 = vadd.f32 %v685_v2, %v97_v20  ;;  %v305_v43 = vmul.f32 %v694_v5, %v234_v29  ;;  %v170_v48 = vadd.f32 %v685_v2, %v99_v38  ;;  %v100_v49 = vmul.f32 %v680_v1, %v29_v34  ;;  %v32_v56 = vld [vmem:[%s1511_s0 + $0x48] sm:$0xff]  ;;  %v33_v4 = vld [vmem:[%s1511_s0 + $0x50] sm:$0xff] }
   0x8   :  { %v371_v18 = vadd.f32 %v699_v6, %v300_v7  ;;  %v233_v23 = vld [vmem:[%s1514_s3 + $0x20] sm:$0xff]  ;;  %v372_v26 = vadd.f32 %v699_v6, %v301_v13  ;;  %v98_v28 = vmul.f32 %v680_v1, %v27_v22  ;;  %v373_v31 = vadd.f32 %v699_v6, %v302_v19  ;;  %v238_v3 = vld [vmem:[%s1514_s3 + $0x48] sm:$0xff]  ;;  %v34_v12 = vld [vmem:[%s1511_s0 + $0x58] sm:$0xff] }
   0x9   :  { %v374_v33 = vadd.f32 %v699_v6, %v303_v21  ;;  %v304_v37 = vmul.f32 %v694_v5, %v233_v23  ;;  %v31_v50 = vld [vmem:[%s1511_s0 + $0x40] sm:$0xff]  ;;  %v376_v54 = vadd.f32 %v699_v6, %v305_v43  ;;  %v306_v55 = vmul.f32 %v694_v5, %v235_v39  ;;  %v240_v17 = vld [vmem:[%s1514_s3 + $0x58] sm:$0xff]  ;;  %v37_v34 = vld [vmem:[%s1511_s0 + $0x70] sm:$0xff] }
   0xa   :  { %v435_v30 = vadd.f32 %v371_v18, %v165_v11  ;;  %v436_v35 = vadd.f32 %v372_v26, %v166_v25  ;;  %v169_v36 = vadd.f32 %v685_v2, %v98_v28  ;;  %v437_v41 = vadd.f32 %v373_v31, %v167_v27  ;;  %v237_v51 = vld [vmem:[%s1514_s3 + $0x40] sm:$0xff]  ;;  %v239_v11 = vld [vmem:[%s1514_s3 + $0x50] sm:$0xff]  ;;  %v36_v28 = vld [vmem:[%s1511_s0 + $0x68] sm:$0xff] }
   0xb   :  { %v438_v42 = vadd.f32 %v374_v33, %v168_v32  ;;  %v375_v47 = vadd.f32 %v699_v6, %v304_v37  ;;  %v171_v58 = vadd.f32 %v685_v2, %v100_v49  ;;  %v101_v59 = vmul.f32 %v680_v1, %v30_v44  ;;  %v35_v22 = vld [vmem:[%s1511_s0 + $0x60] sm:$0xff]  ;;  %v242_v33 = vld [vmem:[%s1514_s3 + $0x68] sm:$0xff]  ;;  %v243_v43 = vld [vmem:[%s1514_s3 + $0x70] sm:$0xff] }
   0xc   :  { %v499_v40 = vmax.f32 %v435_v30, 0.0  ;;  %v500_v46 = vmax.f32 %v436_v35, 0.0  ;;  %v501_v52 = vmax.f32 %v437_v41, 0.0  ;;  %v307_v60 = vmul.f32 %v694_v5, %v236_v45  ;;  %v241_v27 = vld [vmem:[%s1514_s3 + $0x60] sm:$0xff]  ;;  %v244_v49 = vld [vmem:[%s1514_s3 + $0x78] sm:$0xff] }
   0xd   :  { %v502_v53 = vmax.f32 %v438_v42, 0.0  ;;  %v439_v57 = vadd.f32 %v375_v47, %v169_v36  ;;  %v440_v61 = vadd.f32 %v376_v54, %v170_v48  ;;  %v377_v62 = vadd.f32 %v699_v6, %v306_v55  ;;  %v38_v48 = vld [vmem:[%s1511_s0 + $0x78] sm:$0xff]  ;;  %v39_v54 = vld [vmem:[%s1511_s0 + $0x80] sm:$0xff] }
   0xe   :  { %563 = vst [vmem:[%s1517_s6] sm:$0xff] %v499_v40  ;;  %564 = vst [vmem:[%s1517_s6 + $0x8] sm:$0xff] %v500_v46  ;;  %v102_v63 = vmul.f32 %v680_v1, %v31_v50  ;;  %v308_v0 = vmul.f32 %v694_v5, %v237_v51  ;;  %v172_v8 = vadd.f32 %v685_v2, %v101_v59  ;;  %v245_v55 = vld [vmem:[%s1514_s3 + $0x80] sm:$0xff] }
   0xf   :  { %565 = vst [vmem:[%s1517_s6 + $0x10] sm:$0xff] %v501_v52  ;;  %566 = vst [vmem:[%s1517_s6 + $0x18] sm:$0xff] %v502_v53  ;;  %v503_v7 = vmax.f32 %v439_v57, 0.0  ;;  %v378_v9 = vadd.f32 %v699_v6, %v307_v60  ;;  %v103_v10 = vmul.f32 %v680_v1, %v32_v56  ;;  %v504_v13 = vmax.f32 %v440_v61, 0.0  ;;  %v40_v60 = vld [vmem:[%s1511_s0 + $0x88] sm:$0xff] }
  0x10   :  { %v441_v14 = vadd.f32 %v377_v62, %v171_v58  ;;  %v173_v15 = vadd.f32 %v685_v2, %v102_v63  ;;  %v379_v16 = vadd.f32 %v699_v6, %v308_v0  ;;  %v309_v20 = vmul.f32 %v694_v5, %v238_v3 }
  0x11   :  { %567 = vst [vmem:[%s1517_s6 + $0x20] sm:$0xff] %v503_v7  ;;  %v442_v18 = vadd.f32 %v378_v9, %v172_v8  ;;  %v174_v19 = vadd.f32 %v685_v2, %v103_v10  ;;  %v104_v21 = vmul.f32 %v680_v1, %v33_v4  ;;  %568 = vst [vmem:[%s1517_s6 + $0x28] sm:$0xff] %v504_v13  ;;  %v246_v9 = vld [vmem:[%s1514_s3 + $0x88] sm:$0xff]  ;;  %v41_v10 = vld [vmem:[%s1511_s0 + $0x90] sm:$0xff] }
  0x12   :  { %v505_v23 = vmax.f32 %v441_v14, 0.0  ;;  %v443_v24 = vadd.f32 %v379_v16, %v173_v15  ;;  %v310_v25 = vmul.f32 %v694_v5, %v239_v11  ;;  %v105_v26 = vmul.f32 %v680_v1, %v34_v12  ;;  %v247_v15 = vld [vmem:[%s1514_s3 + $0x90] sm:$0xff]  ;;  %v42_v16 = vld [vmem:[%s1511_s0 + $0x98] sm:$0xff] }
  0x13   :  { %v506_v29 = vmax.f32 %v442_v18, 0.0  ;;  %v380_v30 = vadd.f32 %v699_v6, %v309_v20  ;;  %v175_v31 = vadd.f32 %v685_v2, %v104_v21  ;;  %v311_v32 = vmul.f32 %v694_v5, %v240_v17  ;;  %v248_v21 = vld [vmem:[%s1514_s3 + $0x98] sm:$0xff] }
  0x14   :  { %569 = vst [vmem:[%s1517_s6 + $0x30] sm:$0xff] %v505_v23  ;;  %v507_v35 = vmax.f32 %v443_v24, 0.0  ;;  %v381_v36 = vadd.f32 %v699_v6, %v310_v25  ;;  %v176_v37 = vadd.f32 %v685_v2, %v105_v26  ;;  %v106_v38 = vmul.f32 %v680_v1, %v35_v22  ;;  %v43_v26 = vld [vmem:[%s1511_s0 + $0xa0] sm:$0xff] }
  0x15   :  { %570 = vst [vmem:[%s1517_s6 + $0x38] sm:$0xff] %v506_v29  ;;  %v444_v39 = vadd.f32 %v380_v30, %v174_v19  ;;  %v382_v40 = vadd.f32 %v699_v6, %v311_v32  ;;  %v312_v41 = vmul.f32 %v694_v5, %v241_v27  ;;  %v107_v42 = vmul.f32 %v680_v1, %v36_v28  ;;  %v44_v32 = vld [vmem:[%s1511_s0 + $0xa8] sm:$0xff] }
  0x16   :  { %571 = vst [vmem:[%s1517_s6 + $0x40] sm:$0xff] %v507_v35  ;;  %v445_v44 = vadd.f32 %v381_v36, %v175_v31  ;;  %v177_v45 = vadd.f32 %v685_v2, %v106_v38  ;;  %v313_v46 = vmul.f32 %v694_v5, %v242_v33  ;;  %v108_v47 = vmul.f32 %v680_v1, %v37_v34  ;;  %v249_v31 = vld [vmem:[%s1514_s3 + $0xa0] sm:$0xff]  ;;  %v45_v38 = vld [vmem:[%s1511_s0 + $0xb0] sm:$0xff] }
  0x17   :  { %v508_v50 = vmax.f32 %v444_v39, 0.0  ;;  %v446_v51 = vadd.f32 %v382_v40, %v176_v37  ;;  %v383_v52 = vadd.f32 %v699_v6, %v312_v41  ;;  %v178_v53 = vadd.f32 %v685_v2, %v107_v42  ;;  %v250_v37 = vld [vmem:[%s1514_s3 + $0xa8] sm:$0xff] }
  0x18   :  { %v509_v56 = vmax.f32 %v445_v44, 0.0  ;;  %v384_v57 = vadd.f32 %v699_v6, %v313_v46  ;;  %v179_v58 = vadd.f32 %v685_v2, %v108_v47  ;;  %v314_v59 = vmul.f32 %v694_v5, %v243_v43  ;;  %v251_v47 = vld [vmem:[%s1514_s3 + $0xb0] sm:$0xff] }
  0x19   :  { %572 = vst [vmem:[%s1517_s6 + $0x48] sm:$0xff] %v508_v50  ;;  %v510_v61 = vmax.f32 %v446_v51, 0.0  ;;  %v447_v62 = vadd.f32 %v383_v52, %v177_v45  ;;  %v109_v63 = vmul.f32 %v680_v1, %v38_v48  ;;  %v315_v0 = vmul.f32 %v694_v5, %v244_v49  ;;  %v46_v52 = vld [vmem:[%s1511_s0 + $0xb8] sm:$0xff] }
  0x1a   :  { %573 = vst [vmem:[%s1517_s6 + $0x50] sm:$0xff] %v509_v56  ;;  %v448_v3 = vadd.f32 %v384_v57, %v178_v53  ;;  %v385_v4 = vadd.f32 %v699_v6, %v314_v59  ;;  %v110_v7 = vmul.f32 %v680_v1, %v39_v54  ;;  %v316_v8 = vmul.f32 %v694_v5, %v245_v55  ;;  %v252_v53 = vld [vmem:[%s1514_s3 + $0xb8] sm:$0xff]  ;;  %v253_v59 = vld [vmem:[%s1514_s3 + $0xc0] sm:$0xff] }
  0x1b   :  { %574 = vst [vmem:[%s1517_s6 + $0x58] sm:$0xff] %v510_v61  ;;  %v511_v11 = vmax.f32 %v447_v62, 0.0  ;;  %v180_v12 = vadd.f32 %v685_v2, %v109_v63  ;;  %v386_v13 = vadd.f32 %v699_v6, %v315_v0  ;;  %v111_v14 = vmul.f32 %v680_v1, %v40_v60  ;;  %v48_v0 = vld [vmem:[%s1511_s0 + $0xc8] sm:$0xff] }
  0x1c   :  { %v512_v17 = vmax.f32 %v448_v3, 0.0  ;;  %v449_v18 = vadd.f32 %v385_v4, %v179_v58  ;;  %v181_v19 = vadd.f32 %v685_v2, %v110_v7  ;;  %v387_v20 = vadd.f32 %v699_v6, %v316_v8  ;;  %v47_v58 = vld [vmem:[%s1511_s0 + $0xc0] sm:$0xff] }
  0x1d   :  { %575 = vst [vmem:[%s1517_s6 + $0x60] sm:$0xff] %v511_v11  ;;  %v450_v22 = vadd.f32 %v386_v13, %v180_v12  ;;  %v182_v23 = vadd.f32 %v685_v2, %v111_v14  ;;  %v317_v24 = vmul.f32 %v694_v5, %v246_v9  ;;  %v112_v25 = vmul.f32 %v680_v1, %v41_v10  ;;  %v254_v13 = vld [vmem:[%s1514_s3 + $0xc8] sm:$0xff]  ;;  %v49_v14 = vld [vmem:[%s1511_s0 + $0xd0] sm:$0xff] }
  0x1e   :  { %576 = vst [vmem:[%s1517_s6 + $0x68] sm:$0xff] %v512_v17  ;;  %v513_v27 = vmax.f32 %v449_v18, 0.0  ;;  %v451_v28 = vadd.f32 %v387_v20, %v181_v19  ;;  %v318_v29 = vmul.f32 %v694_v5, %v247_v15  ;;  %v113_v30 = vmul.f32 %v680_v1, %v42_v16  ;;  %v255_v19 = vld [vmem:[%s1514_s3 + $0xd0] sm:$0xff]  ;;  %v50_v20 = vld [vmem:[%s1511_s0 + $0xd8] sm:$0xff] }
  0x1f   :  { %v514_v33 = vmax.f32 %v450_v22, 0.0  ;;  %v388_v34 = vadd.f32 %v699_v6, %v317_v24  ;;  %v183_v35 = vadd.f32 %v685_v2, %v112_v25  ;;  %v319_v36 = vmul.f32 %v694_v5, %v248_v21  ;;  %v256_v25 = vld [vmem:[%s1514_s3 + $0xd8] sm:$0xff] }
  0x20   :  { %577 = vst [vmem:[%s1517_s6 + $0x70] sm:$0xff] %v513_v27  ;;  %v515_v39 = vmax.f32 %v451_v28, 0.0  ;;  %v389_v40 = vadd.f32 %v699_v6, %v318_v29  ;;  %v184_v41 = vadd.f32 %v685_v2, %v113_v30  ;;  %v114_v42 = vmul.f32 %v680_v1, %v43_v26  ;;  %v51_v30 = vld [vmem:[%s1511_s0 + $0xe0] sm:$0xff] }
  0x21   :  { %578 = vst [vmem:[%s1517_s6 + $0x78] sm:$0xff] %v514_v33  ;;  %v452_v43 = vadd.f32 %v388_v34, %v182_v23  ;;  %v390_v44 = vadd.f32 %v699_v6, %v319_v36  ;;  %v320_v45 = vmul.f32 %v694_v5, %v249_v31  ;;  %v115_v46 = vmul.f32 %v680_v1, %v44_v32  ;;  %v52_v36 = vld [vmem:[%s1511_s0 + $0xe8] sm:$0xff] }
  0x22   :  { %579 = vst [vmem:[%s1517_s6 + $0x80] sm:$0xff] %v515_v39  ;;  %v453_v48 = vadd.f32 %v389_v40, %v183_v35  ;;  %v185_v49 = vadd.f32 %v685_v2, %v114_v42  ;;  %v321_v50 = vmul.f32 %v694_v5, %v250_v37  ;;  %v116_v51 = vmul.f32 %v680_v1, %v45_v38  ;;  %v257_v35 = vld [vmem:[%s1514_s3 + $0xe0] sm:$0xff]  ;;  %v53_v42 = vld [vmem:[%s1511_s0 + $0xf0] sm:$0xff] }
  0x23   :  { %v516_v54 = vmax.f32 %v452_v43, 0.0  ;;  %v454_v55 = vadd.f32 %v390_v44, %v184_v41  ;;  %v391_v56 = vadd.f32 %v699_v6, %v320_v45  ;;  %v186_v57 = vadd.f32 %v685_v2, %v115_v46  ;;  %v258_v41 = vld [vmem:[%s1514_s3 + $0xe8] sm:$0xff] }
  0x24   :  { %v517_v60 = vmax.f32 %v453_v48, 0.0  ;;  %v392_v61 = vadd.f32 %v699_v6, %v321_v50  ;;  %v187_v62 = vadd.f32 %v685_v2, %v116_v51  ;;  %v322_v63 = vmul.f32 %v694_v5, %v251_v47  ;;  %v259_v51 = vld [vmem:[%s1514_s3 + $0xf0] sm:$0xff] }
  0x25   :  { %580 = vst [vmem:[%s1517_s6 + $0x88] sm:$0xff] %v516_v54  ;;  %v518_v3 = vmax.f32 %v454_v55, 0.0  ;;  %v455_v4 = vadd.f32 %v391_v56, %v185_v49  ;;  %v117_v7 = vmul.f32 %v680_v1, %v46_v52  ;;  %v323_v8 = vmul.f32 %v694_v5, %v252_v53  ;;  %v54_v56 = vld [vmem:[%s1511_s0 + $0xf8] sm:$0xff] }
  0x26   :  { %581 = vst [vmem:[%s1517_s6 + $0x90] sm:$0xff] %v517_v60  ;;  %v456_v9 = vadd.f32 %v392_v61, %v186_v57  ;;  %v393_v10 = vadd.f32 %v699_v6, %v322_v63  ;;  %v118_v11 = vmul.f32 %v680_v1, %v47_v58  ;;  %v324_v12 = vmul.f32 %v694_v5, %v253_v59  ;;  %v260_v57 = vld [vmem:[%s1514_s3 + $0xf8] sm:$0xff]  ;;  %v261_v63 = vld [vmem:[%s1514_s3 + $0x100] sm:$0xff] }
  0x27   :  { %582 = vst [vmem:[%s1517_s6 + $0x98] sm:$0xff] %v518_v3  ;;  %v519_v15 = vmax.f32 %v455_v4, 0.0  ;;  %v188_v16 = vadd.f32 %v685_v2, %v117_v7  ;;  %v394_v17 = vadd.f32 %v699_v6, %v323_v8  ;;  %v119_v18 = vmul.f32 %v680_v1, %v48_v0  ;;  %v56_v8 = vld [vmem:[%s1511_s0 + $0x108] sm:$0xff] }
  0x28   :  { %v520_v21 = vmax.f32 %v456_v9, 0.0  ;;  %v457_v22 = vadd.f32 %v393_v10, %v187_v62  ;;  %v189_v23 = vadd.f32 %v685_v2, %v118_v11  ;;  %v395_v24 = vadd.f32 %v699_v6, %v324_v12  ;;  %v55_v62 = vld [vmem:[%s1511_s0 + $0x100] sm:$0xff] }
  0x29   :  { %583 = vst [vmem:[%s1517_s6 + $0xa0] sm:$0xff] %v519_v15  ;;  %v458_v26 = vadd.f32 %v394_v17, %v188_v16  ;;  %v190_v27 = vadd.f32 %v685_v2, %v119_v18  ;;  %v325_v28 = vmul.f32 %v694_v5, %v254_v13  ;;  %v120_v29 = vmul.f32 %v680_v1, %v49_v14  ;;  %v262_v17 = vld [vmem:[%s1514_s3 + $0x108] sm:$0xff]  ;;  %v57_v18 = vld [vmem:[%s1511_s0 + $0x110] sm:$0xff] }
  0x2a   :  { %584 = vst [vmem:[%s1517_s6 + $0xa8] sm:$0xff] %v520_v21  ;;  %v521_v31 = vmax.f32 %v457_v22, 0.0  ;;  %v459_v32 = vadd.f32 %v395_v24, %v189_v23  ;;  %v326_v33 = vmul.f32 %v694_v5, %v255_v19  ;;  %v121_v34 = vmul.f32 %v680_v1, %v50_v20  ;;  %v263_v23 = vld [vmem:[%s1514_s3 + $0x110] sm:$0xff]  ;;  %v58_v24 = vld [vmem:[%s1511_s0 + $0x118] sm:$0xff] }
  0x2b   :  { %v522_v37 = vmax.f32 %v458_v26, 0.0  ;;  %v396_v38 = vadd.f32 %v699_v6, %v325_v28  ;;  %v191_v39 = vadd.f32 %v685_v2, %v120_v29  ;;  %v327_v40 = vmul.f32 %v694_v5, %v256_v25  ;;  %v264_v29 = vld [vmem:[%s1514_s3 + $0x118] sm:$0xff] }
  0x2c   :  { %585 = vst [vmem:[%s1517_s6 + $0xb0] sm:$0xff] %v521_v31  ;;  %v523_v43 = vmax.f32 %v459_v32, 0.0  ;;  %v397_v44 = vadd.f32 %v699_v6, %v326_v33  ;;  %v192_v45 = vadd.f32 %v685_v2, %v121_v34  ;;  %v122_v46 = vmul.f32 %v680_v1, %v51_v30  ;;  %v59_v34 = vld [vmem:[%s1511_s0 + $0x120] sm:$0xff] }
  0x2d   :  { %586 = vst [vmem:[%s1517_s6 + $0xb8] sm:$0xff] %v522_v37  ;;  %v460_v47 = vadd.f32 %v396_v38, %v190_v27  ;;  %v398_v48 = vadd.f32 %v699_v6, %v327_v40  ;;  %v328_v49 = vmul.f32 %v694_v5, %v257_v35  ;;  %v123_v50 = vmul.f32 %v680_v1, %v52_v36  ;;  %v60_v40 = vld [vmem:[%s1511_s0 + $0x128] sm:$0xff] }
  0x2e   :  { %587 = vst [vmem:[%s1517_s6 + $0xc0] sm:$0xff] %v523_v43  ;;  %v461_v52 = vadd.f32 %v397_v44, %v191_v39  ;;  %v193_v53 = vadd.f32 %v685_v2, %v122_v46  ;;  %v329_v54 = vmul.f32 %v694_v5, %v258_v41  ;;  %v124_v55 = vmul.f32 %v680_v1, %v53_v42  ;;  %v265_v39 = vld [vmem:[%s1514_s3 + $0x120] sm:$0xff]  ;;  %v61_v46 = vld [vmem:[%s1511_s0 + $0x130] sm:$0xff] }
  0x2f   :  { %v524_v58 = vmax.f32 %v460_v47, 0.0  ;;  %v462_v59 = vadd.f32 %v398_v48, %v192_v45  ;;  %v399_v60 = vadd.f32 %v699_v6, %v328_v49  ;;  %v194_v61 = vadd.f32 %v685_v2, %v123_v50  ;;  %v266_v45 = vld [vmem:[%s1514_s3 + $0x128] sm:$0xff] }
  0x30   :  { %v525_v0 = vmax.f32 %v461_v52, 0.0  ;;  %v400_v3 = vadd.f32 %v699_v6, %v329_v54  ;;  %v195_v4 = vadd.f32 %v685_v2, %v124_v55  ;;  %v330_v7 = vmul.f32 %v694_v5, %v259_v51  ;;  %v267_v55 = vld [vmem:[%s1514_s3 + $0x130] sm:$0xff] }
  0x31   :  { %588 = vst [vmem:[%s1517_s6 + $0xc8] sm:$0xff] %v524_v58  ;;  %v526_v9 = vmax.f32 %v462_v59, 0.0  ;;  %v463_v10 = vadd.f32 %v399_v60, %v193_v53  ;;  %v125_v11 = vmul.f32 %v680_v1, %v54_v56  ;;  %v331_v12 = vmul.f32 %v694_v5, %v260_v57  ;;  %v62_v60 = vld [vmem:[%s1511_s0 + $0x138] sm:$0xff] }
  0x32   :  { %589 = vst [vmem:[%s1517_s6 + $0xd0] sm:$0xff] %v525_v0  ;;  %v464_v13 = vadd.f32 %v400_v3, %v194_v61  ;;  %v401_v14 = vadd.f32 %v699_v6, %v330_v7  ;;  %v126_v15 = vmul.f32 %v680_v1, %v55_v62  ;;  %v332_v16 = vmul.f32 %v694_v5, %v261_v63  ;;  %v268_v61 = vld [vmem:[%s1514_s3 + $0x138] sm:$0xff]  ;;  %v269_v7 = vld [vmem:[%s1514_s3 + $0x140] sm:$0xff] }
  0x33   :  { %590 = vst [vmem:[%s1517_s6 + $0xd8] sm:$0xff] %v526_v9  ;;  %v527_v19 = vmax.f32 %v463_v10, 0.0  ;;  %v196_v20 = vadd.f32 %v685_v2, %v125_v11  ;;  %v402_v21 = vadd.f32 %v699_v6, %v331_v12  ;;  %v127_v22 = vmul.f32 %v680_v1, %v56_v8  ;;  %v64_v12 = vld [vmem:[%s1511_s0 + $0x148] sm:$0xff] }
  0x34   :  { %v528_v25 = vmax.f32 %v464_v13, 0.0  ;;  %v465_v26 = vadd.f32 %v401_v14, %v195_v4  ;;  %v197_v27 = vadd.f32 %v685_v2, %v126_v15  ;;  %v403_v28 = vadd.f32 %v699_v6, %v332_v16  ;;  %v63_v4 = vld [vmem:[%s1511_s0 + $0x140] sm:$0xff] }
  0x35   :  { %591 = vst [vmem:[%s1517_s6 + $0xe0] sm:$0xff] %v527_v19  ;;  %v466_v30 = vadd.f32 %v402_v21, %v196_v20  ;;  %v198_v31 = vadd.f32 %v685_v2, %v127_v22  ;;  %v333_v32 = vmul.f32 %v694_v5, %v262_v17  ;;  %v128_v33 = vmul.f32 %v680_v1, %v57_v18  ;;  %v270_v21 = vld [vmem:[%s1514_s3 + $0x148] sm:$0xff]  ;;  %v65_v22 = vld [vmem:[%s1511_s0 + $0x150] sm:$0xff] }
  0x36   :  { %592 = vst [vmem:[%s1517_s6 + $0xe8] sm:$0xff] %v528_v25  ;;  %v529_v35 = vmax.f32 %v465_v26, 0.0  ;;  %v467_v36 = vadd.f32 %v403_v28, %v197_v27  ;;  %v334_v37 = vmul.f32 %v694_v5, %v263_v23  ;;  %v129_v38 = vmul.f32 %v680_v1, %v58_v24  ;;  %v271_v27 = vld [vmem:[%s1514_s3 + $0x150] sm:$0xff]  ;;  %v66_v28 = vld [vmem:[%s1511_s0 + $0x158] sm:$0xff] }
  0x37   :  { %v530_v41 = vmax.f32 %v466_v30, 0.0  ;;  %v404_v42 = vadd.f32 %v699_v6, %v333_v32  ;;  %v199_v43 = vadd.f32 %v685_v2, %v128_v33  ;;  %v335_v44 = vmul.f32 %v694_v5, %v264_v29  ;;  %v272_v33 = vld [vmem:[%s1514_s3 + $0x158] sm:$0xff] }
  0x38   :  { %593 = vst [vmem:[%s1517_s6 + $0xf0] sm:$0xff] %v529_v35  ;;  %v531_v47 = vmax.f32 %v467_v36, 0.0  ;;  %v405_v48 = vadd.f32 %v699_v6, %v334_v37  ;;  %v200_v49 = vadd.f32 %v685_v2, %v129_v38  ;;  %v130_v50 = vmul.f32 %v680_v1, %v59_v34  ;;  %v67_v38 = vld [vmem:[%s1511_s0 + $0x160] sm:$0xff] }
  0x39   :  { %594 = vst [vmem:[%s1517_s6 + $0xf8] sm:$0xff] %v530_v41  ;;  %v468_v51 = vadd.f32 %v404_v42, %v198_v31  ;;  %v406_v52 = vadd.f32 %v699_v6, %v335_v44  ;;  %v336_v53 = vmul.f32 %v694_v5, %v265_v39  ;;  %v131_v54 = vmul.f32 %v680_v1, %v60_v40  ;;  %v68_v44 = vld [vmem:[%s1511_s0 + $0x168] sm:$0xff] }
  0x3a   :  { %595 = vst [vmem:[%s1517_s6 + $0x100] sm:$0xff] %v531_v47  ;;  %v469_v56 = vadd.f32 %v405_v48, %v199_v43  ;;  %v201_v57 = vadd.f32 %v685_v2, %v130_v50  ;;  %v337_v58 = vmul.f32 %v694_v5, %v266_v45  ;;  %v132_v59 = vmul.f32 %v680_v1, %v61_v46  ;;  %v273_v43 = vld [vmem:[%s1514_s3 + $0x160] sm:$0xff]  ;;  %v69_v50 = vld [vmem:[%s1511_s0 + $0x170] sm:$0xff] }
  0x3b   :  { %v532_v62 = vmax.f32 %v468_v51, 0.0  ;;  %v470_v63 = vadd.f32 %v406_v52, %v200_v49  ;;  %v407_v0 = vadd.f32 %v699_v6, %v336_v53  ;;  %v202_v3 = vadd.f32 %v685_v2, %v131_v54  ;;  %v274_v49 = vld [vmem:[%s1514_s3 + $0x168] sm:$0xff] }
  0x3c   :  { %v533_v8 = vmax.f32 %v469_v56, 0.0  ;;  %v408_v9 = vadd.f32 %v699_v6, %v337_v58  ;;  %v203_v10 = vadd.f32 %v685_v2, %v132_v59  ;;  %v338_v11 = vmul.f32 %v694_v5, %v267_v55  ;;  %v275_v59 = vld [vmem:[%s1514_s3 + $0x170] sm:$0xff] }
  0x3d   :  { %596 = vst [vmem:[%s1517_s6 + $0x108] sm:$0xff] %v532_v62  ;;  %v534_v13 = vmax.f32 %v470_v63, 0.0  ;;  %v471_v14 = vadd.f32 %v407_v0, %v201_v57  ;;  %v133_v15 = vmul.f32 %v680_v1, %v62_v60  ;;  %v339_v16 = vmul.f32 %v694_v5, %v268_v61  ;;  %v70_v0 = vld [vmem:[%s1511_s0 + $0x178] sm:$0xff] }
  0x3e   :  { %597 = vst [vmem:[%s1517_s6 + $0x110] sm:$0xff] %v533_v8  ;;  %v472_v17 = vadd.f32 %v408_v9, %v202_v3  ;;  %v409_v18 = vadd.f32 %v699_v6, %v338_v11  ;;  %v134_v19 = vmul.f32 %v680_v1, %v63_v4  ;;  %v340_v20 = vmul.f32 %v694_v5, %v269_v7  ;;  %v276_v3 = vld [vmem:[%s1514_s3 + $0x178] sm:$0xff]  ;;  %v277_v11 = vld [vmem:[%s1514_s3 + $0x180] sm:$0xff] }
  0x3f   :  { %598 = vst [vmem:[%s1517_s6 + $0x118] sm:$0xff] %v534_v13  ;;  %v535_v23 = vmax.f32 %v471_v14, 0.0  ;;  %v204_v24 = vadd.f32 %v685_v2, %v133_v15  ;;  %v410_v25 = vadd.f32 %v699_v6, %v339_v16  ;;  %v135_v26 = vmul.f32 %v680_v1, %v64_v12  ;;  %v72_v16 = vld [vmem:[%s1511_s0 + $0x188] sm:$0xff] }
  0x40   :  { %v536_v29 = vmax.f32 %v472_v17, 0.0  ;;  %v473_v30 = vadd.f32 %v409_v18, %v203_v10  ;;  %v205_v31 = vadd.f32 %v685_v2, %v134_v19  ;;  %v411_v32 = vadd.f32 %v699_v6, %v340_v20  ;;  %v71_v10 = vld [vmem:[%s1511_s0 + $0x180] sm:$0xff] }
  0x41   :  { %599 = vst [vmem:[%s1517_s6 + $0x120] sm:$0xff] %v535_v23  ;;  %v474_v34 = vadd.f32 %v410_v25, %v204_v24  ;;  %v206_v35 = vadd.f32 %v685_v2, %v135_v26  ;;  %v341_v36 = vmul.f32 %v694_v5, %v270_v21  ;;  %v136_v37 = vmul.f32 %v680_v1, %v65_v22  ;;  %v278_v25 = vld [vmem:[%s1514_s3 + $0x188] sm:$0xff]  ;;  %v73_v26 = vld [vmem:[%s1511_s0 + $0x190] sm:$0xff] }
  0x42   :  { %600 = vst [vmem:[%s1517_s6 + $0x128] sm:$0xff] %v536_v29  ;;  %v537_v39 = vmax.f32 %v473_v30, 0.0  ;;  %v475_v40 = vadd.f32 %v411_v32, %v205_v31  ;;  %v342_v41 = vmul.f32 %v694_v5, %v271_v27  ;;  %v137_v42 = vmul.f32 %v680_v1, %v66_v28  ;;  %v279_v31 = vld [vmem:[%s1514_s3 + $0x190] sm:$0xff]  ;;  %v74_v32 = vld [vmem:[%s1511_s0 + $0x198] sm:$0xff] }
  0x43   :  { %v538_v45 = vmax.f32 %v474_v34, 0.0  ;;  %v412_v46 = vadd.f32 %v699_v6, %v341_v36  ;;  %v207_v47 = vadd.f32 %v685_v2, %v136_v37  ;;  %v343_v48 = vmul.f32 %v694_v5, %v272_v33  ;;  %v280_v37 = vld [vmem:[%s1514_s3 + $0x198] sm:$0xff] }
  0x44   :  { %601 = vst [vmem:[%s1517_s6 + $0x130] sm:$0xff] %v537_v39  ;;  %v539_v51 = vmax.f32 %v475_v40, 0.0  ;;  %v413_v52 = vadd.f32 %v699_v6, %v342_v41  ;;  %v208_v53 = vadd.f32 %v685_v2, %v137_v42  ;;  %v138_v54 = vmul.f32 %v680_v1, %v67_v38  ;;  %v75_v42 = vld [vmem:[%s1511_s0 + $0x1a0] sm:$0xff] }
  0x45   :  { %602 = vst [vmem:[%s1517_s6 + $0x138] sm:$0xff] %v538_v45  ;;  %v476_v55 = vadd.f32 %v412_v46, %v206_v35  ;;  %v414_v56 = vadd.f32 %v699_v6, %v343_v48  ;;  %v344_v57 = vmul.f32 %v694_v5, %v273_v43  ;;  %v139_v58 = vmul.f32 %v680_v1, %v68_v44  ;;  %v76_v48 = vld [vmem:[%s1511_s0 + $0x1a8] sm:$0xff] }
  0x46   :  { %603 = vst [vmem:[%s1517_s6 + $0x140] sm:$0xff] %v539_v51  ;;  %v477_v60 = vadd.f32 %v413_v52, %v207_v47  ;;  %v209_v61 = vadd.f32 %v685_v2, %v138_v54  ;;  %v345_v62 = vmul.f32 %v694_v5, %v274_v49  ;;  %v140_v63 = vmul.f32 %v680_v1, %v69_v50  ;;  %v281_v47 = vld [vmem:[%s1514_s3 + $0x1a0] sm:$0xff]  ;;  %v77_v54 = vld [vmem:[%s1511_s0 + $0x1b0] sm:$0xff] }
  0x47   :  { %v540_v4 = vmax.f32 %v476_v55, 0.0  ;;  %v478_v7 = vadd.f32 %v414_v56, %v208_v53  ;;  %v415_v8 = vadd.f32 %v699_v6, %v344_v57  ;;  %v210_v9 = vadd.f32 %v685_v2, %v139_v58  ;;  %v282_v53 = vld [vmem:[%s1514_s3 + $0x1a8] sm:$0xff] }
  0x48   :  { %v541_v12 = vmax.f32 %v477_v60, 0.0  ;;  %v416_v13 = vadd.f32 %v699_v6, %v345_v62  ;;  %v211_v14 = vadd.f32 %v685_v2, %v140_v63  ;;  %v346_v15 = vmul.f32 %v694_v5, %v275_v59  ;;  %v283_v63 = vld [vmem:[%s1514_s3 + $0x1b0] sm:$0xff] }
  0x49   :  { %604 = vst [vmem:[%s1517_s6 + $0x148] sm:$0xff] %v540_v4  ;;  %v542_v17 = vmax.f32 %v478_v7, 0.0  ;;  %v479_v18 = vadd.f32 %v415_v8, %v209_v61  ;;  %v141_v19 = vmul.f32 %v680_v1, %v70_v0  ;;  %v347_v20 = vmul.f32 %v694_v5, %v276_v3  ;;  %v78_v8 = vld [vmem:[%s1511_s0 + $0x1b8] sm:$0xff] }
  0x4a   :  { %605 = vst [vmem:[%s1517_s6 + $0x150] sm:$0xff] %v541_v12  ;;  %v480_v21 = vadd.f32 %v416_v13, %v210_v9  ;;  %v417_v22 = vadd.f32 %v699_v6, %v346_v15  ;;  %v142_v23 = vmul.f32 %v680_v1, %v71_v10  ;;  %v348_v24 = vmul.f32 %v694_v5, %v277_v11  ;;  %v284_v9 = vld [vmem:[%s1514_s3 + $0x1b8] sm:$0xff]  ;;  %v285_v15 = vld [vmem:[%s1514_s3 + $0x1c0] sm:$0xff] }
  0x4b   :  { %606 = vst [vmem:[%s1517_s6 + $0x158] sm:$0xff] %v542_v17  ;;  %v543_v27 = vmax.f32 %v479_v18, 0.0  ;;  %v212_v28 = vadd.f32 %v685_v2, %v141_v19  ;;  %v418_v29 = vadd.f32 %v699_v6, %v347_v20  ;;  %v143_v30 = vmul.f32 %v680_v1, %v72_v16  ;;  %v80_v20 = vld [vmem:[%s1511_s0 + $0x1c8] sm:$0xff] }
  0x4c   :  { %v544_v33 = vmax.f32 %v480_v21, 0.0  ;;  %v481_v34 = vadd.f32 %v417_v22, %v211_v14  ;;  %v213_v35 = vadd.f32 %v685_v2, %v142_v23  ;;  %v419_v36 = vadd.f32 %v699_v6, %v348_v24  ;;  %v79_v14 = vld [vmem:[%s1511_s0 + $0x1c0] sm:$0xff] }
  0x4d   :  { %607 = vst [vmem:[%s1517_s6 + $0x160] sm:$0xff] %v543_v27  ;;  %v482_v38 = vadd.f32 %v418_v29, %v212_v28  ;;  %v214_v39 = vadd.f32 %v685_v2, %v143_v30  ;;  %v349_v40 = vmul.f32 %v694_v5, %v278_v25  ;;  %v144_v41 = vmul.f32 %v680_v1, %v73_v26  ;;  %v286_v29 = vld [vmem:[%s1514_s3 + $0x1c8] sm:$0xff]  ;;  %v81_v30 = vld [vmem:[%s1511_s0 + $0x1d0] sm:$0xff] }
  0x4e   :  { %608 = vst [vmem:[%s1517_s6 + $0x168] sm:$0xff] %v544_v33  ;;  %v545_v43 = vmax.f32 %v481_v34, 0.0  ;;  %v483_v44 = vadd.f32 %v419_v36, %v213_v35  ;;  %v350_v45 = vmul.f32 %v694_v5, %v279_v31  ;;  %v145_v46 = vmul.f32 %v680_v1, %v74_v32  ;;  %v82_v35 = vld [vmem:[%s1511_s0 + $0x1d8] sm:$0xff] }
  0x4f   :  { %v546_v49 = vmax.f32 %v482_v38, 0.0  ;;  %v420_v50 = vadd.f32 %v699_v6, %v349_v40  ;;  %v215_v51 = vadd.f32 %v685_v2, %v144_v41  ;;  %v351_v52 = vmul.f32 %v694_v5, %v280_v37  ;;  %v288_v40 = vld [vmem:[%s1514_s3 + $0x1d8] sm:$0xff]  ;;  %v635_v41 = vld [vmem:[%s1513_s2] ss:$0 sm:$0xff] }
  0x50   :  { %609 = vst [vmem:[%s1517_s6 + $0x170] sm:$0xff] %v545_v43  ;;  %v547_v55 = vmax.f32 %v483_v44, 0.0  ;;  %v421_v56 = vadd.f32 %v699_v6, %v350_v45  ;;  %v216_v57 = vadd.f32 %v685_v2, %v145_v46  ;;  %v146_v58 = vmul.f32 %v680_v1, %v75_v42  ;;  %v83_v45 = vld [vmem:[%s1511_s0 + $0x1e0] sm:$0xff] }
  0x51   :  { %610 = vst [vmem:[%s1517_s6 + $0x178] sm:$0xff] %v546_v49  ;;  %v484_v59 = vadd.f32 %v420_v50, %v214_v39  ;;  %v422_v60 = vadd.f32 %v699_v6, %v351_v52  ;;  %v352_v61 = vmul.f32 %v694_v5, %v281_v47  ;;  %v147_v62 = vmul.f32 %v680_v1, %v76_v48  ;;  %v289_v50 = vld [vmem:[%s1514_s3 + $0x1e0] sm:$0xff] }
  0x52   :  { %611 = vst [vmem:[%s1517_s6 + $0x180] sm:$0xff] %v547_v55  ;;  %v485_v0 = vadd.f32 %v421_v56, %v215_v51  ;;  %v217_v3 = vadd.f32 %v685_v2, %v146_v58  ;;  %v353_v4 = vmul.f32 %v694_v5, %v282_v53  ;;  %v148_v7 = vmul.f32 %v680_v1, %v77_v54  ;;  %v84_v51 = vld [vmem:[%s1511_s0 + $0x1e8] sm:$0xff]  ;;  %v638_v53 = vld [vmem:[%s1516_s5] ss:$0 sm:$0xff]  ;;  %v85_v58 = vld [vmem:[%s1511_s0 + $0x1f0] sm:$0xff] }
  0x53   :  { %v548_v10 = vmax.f32 %v484_v59, 0.0  ;;  %v486_v11 = vadd.f32 %v422_v60, %v216_v57  ;;  %v423_v12 = vadd.f32 %v699_v6, %v352_v61  ;;  %v218_v13 = vadd.f32 %v685_v2, %v147_v62  ;;  %v290_v57 = vld [vmem:[%s1514_s3 + $0x1e8] sm:$0xff] }
  0x54   :  { %v549_v16 = vmax.f32 %v485_v0, 0.0  ;;  %v424_v17 = vadd.f32 %v699_v6, %v353_v4  ;;  %v219_v18 = vadd.f32 %v685_v2, %v148_v7  ;;  %v354_v19 = vmul.f32 %v694_v5, %v283_v63  ;;  %v291_v7 = vld [vmem:[%s1514_s3 + $0x1f0] sm:$0xff] }
  0x55   :  { %612 = vst [vmem:[%s1517_s6 + $0x188] sm:$0xff] %v548_v10  ;;  %v550_v21 = vmax.f32 %v486_v11, 0.0  ;;  %v487_v22 = vadd.f32 %v423_v12, %v217_v3  ;;  %v149_v23 = vmul.f32 %v680_v1, %v78_v8  ;;  %v355_v24 = vmul.f32 %v694_v5, %v284_v9  ;;  %v86_v12 = vld [vmem:[%s1511_s0 + $0x1f8] sm:$0xff] }
  0x56   :  { %613 = vst [vmem:[%s1517_s6 + $0x190] sm:$0xff] %v549_v16  ;;  %v488_v25 = vadd.f32 %v424_v17, %v218_v13  ;;  %v425_v26 = vadd.f32 %v699_v6, %v354_v19  ;;  %v150_v27 = vmul.f32 %v680_v1, %v79_v14  ;;  %v356_v28 = vmul.f32 %v694_v5, %v285_v15  ;;  %v287_v5 = vld [vmem:[%s1514_s3 + $0x1d0] sm:$0xff]  ;;  %v292_v13 = vld [vmem:[%s1514_s3 + $0x1f8] sm:$0xff] }
  0x57   :  { %614 = vst [vmem:[%s1517_s6 + $0x198] sm:$0xff] %v550_v21  ;;  %v551_v31 = vmax.f32 %v487_v22, 0.0  ;;  %v220_v32 = vadd.f32 %v685_v2, %v149_v23  ;;  %v426_v33 = vadd.f32 %v699_v6, %v355_v24  ;;  %v151_v34 = vmul.f32 %v680_v1, %v80_v20 }
  0x58   :  { %v552_v36 = vmax.f32 %v488_v25, 0.0  ;;  %v489_v37 = vadd.f32 %v425_v26, %v219_v18  ;;  %v221_v38 = vadd.f32 %v685_v2, %v150_v27  ;;  %v427_v39 = vadd.f32 %v699_v6, %v356_v28  ;;  %v636_v2 = vld [vmem:[%s1515_s4] ss:$0 sm:$0xff] }
  0x59   :  { %615 = vst [vmem:[%s1517_s6 + $0x1a0] sm:$0xff] %v551_v31  ;;  %v490_v1 = vadd.f32 %v426_v33, %v220_v32  ;;  %v222_v42 = vadd.f32 %v635_v41, %v151_v34  ;;  %v357_v43 = vmul.f32 %v636_v2, %v286_v29  ;;  %v637_v6 = vld [vmem:[%s1512_s1] ss:$0 sm:$0xff]  ;;  %v358_v48 = vmul.f32 %v636_v2, %v287_v5 }
  0x5a   :  { %v152_v44 = vmul.f32 %v637_v6, %v81_v30  ;;  %616 = vst [vmem:[%s1517_s6 + $0x1a8] sm:$0xff] %v552_v36  ;;  %v553_v46 = vmax.f32 %v489_v37, 0.0  ;;  %v491_v47 = vadd.f32 %v427_v39, %v221_v38  ;;  %v153_v49 = vmul.f32 %v637_v6, %v82_v35 }
  0x5b   :  { %v554_v52 = vmax.f32 %v490_v1, 0.0  ;;  %v428_v54 = vadd.f32 %v638_v53, %v357_v43  ;;  %v359_v56 = vmul.f32 %v636_v2, %v288_v40  ;;  %v429_v60 = vadd.f32 %v638_v53, %v358_v48 }
  0x5c   :  { %v223_v55 = vadd.f32 %v635_v41, %v152_v44  ;;  %617 = vst [vmem:[%s1517_s6 + $0x1b0] sm:$0xff] %v553_v46  ;;  %v555_v59 = vmax.f32 %v491_v47, 0.0  ;;  %v224_v61 = vadd.f32 %v635_v41, %v153_v49  ;;  %v154_v62 = vmul.f32 %v637_v6, %v83_v45 }
  0x5d   :  { %618 = vst [vmem:[%s1517_s6 + $0x1b8] sm:$0xff] %v554_v52  ;;  %v492_v63 = vadd.f32 %v428_v54, %v222_v42  ;;  %v430_v0 = vadd.f32 %v638_v53, %v359_v56  ;;  %v360_v3 = vmul.f32 %v636_v2, %v289_v50  ;;  %v155_v4 = vmul.f32 %v637_v6, %v84_v51 }
  0x5e   :  { %619 = vst [vmem:[%s1517_s6 + $0x1c0] sm:$0xff] %v555_v59  ;;  %v493_v8 = vadd.f32 %v429_v60, %v223_v55  ;;  %v225_v9 = vadd.f32 %v635_v41, %v154_v62  ;;  %v361_v10 = vmul.f32 %v636_v2, %v290_v57  ;;  %v156_v11 = vmul.f32 %v637_v6, %v85_v58 }
  0x5f   :  { %v556_v14 = vmax.f32 %v492_v63, 0.0  ;;  %v494_v15 = vadd.f32 %v430_v0, %v224_v61  ;;  %v431_v16 = vadd.f32 %v638_v53, %v360_v3  ;;  %v226_v17 = vadd.f32 %v635_v41, %v155_v4 }
  0x60   :  { %v557_v18 = vmax.f32 %v493_v8, 0.0  ;;  %v432_v19 = vadd.f32 %v638_v53, %v361_v10  ;;  %v227_v20 = vadd.f32 %v635_v41, %v156_v11  ;;  %v362_v21 = vmul.f32 %v636_v2, %v291_v7 }
  0x61   :  { %620 = vst [vmem:[%s1517_s6 + $0x1c8] sm:$0xff] %v556_v14  ;;  %v558_v22 = vmax.f32 %v494_v15, 0.0  ;;  %v495_v23 = vadd.f32 %v431_v16, %v225_v9  ;;  %v157_v24 = vmul.f32 %v637_v6, %v86_v12  ;;  %v363_v25 = vmul.f32 %v636_v2, %v292_v13 }
  0x62   :  { %621 = vst [vmem:[%s1517_s6 + $0x1d0] sm:$0xff] %v557_v18  ;;  %v496_v26 = vadd.f32 %v432_v19, %v226_v17  ;;  %v433_v27 = vadd.f32 %v638_v53, %v362_v21 }
  0x63   :  { %622 = vst [vmem:[%s1517_s6 + $0x1d8] sm:$0xff] %v558_v22  ;;  %v559_v28 = vmax.f32 %v495_v23, 0.0  ;;  %v228_v29 = vadd.f32 %v635_v41, %v157_v24  ;;  %v434_v30 = vadd.f32 %v638_v53, %v363_v25 }
  0x64   :  { %v560_v31 = vmax.f32 %v496_v26, 0.0  ;;  %v497_v32 = vadd.f32 %v433_v27, %v227_v20 }
  0x65   :  { %623 = vst [vmem:[%s1517_s6 + $0x1e0] sm:$0xff] %v559_v28  ;;  %v498_v33 = vadd.f32 %v434_v30, %v228_v29 }
  0x66   :  { %624 = vst [vmem:[%s1517_s6 + $0x1e8] sm:$0xff] %v560_v31  ;;  %v561_v34 = vmax.f32 %v497_v32, 0.0 }
  0x67   :  { %v562_v5 = vmax.f32 %v498_v33, 0.0 }
  0x68   :  { %625 = vst [vmem:[%s1517_s6 + $0x1f0] sm:$0xff] %v561_v34 }
  0x69   :  { %626 = vst [vmem:[%s1517_s6 + $0x1f8] sm:$0xff] %v562_v5 }

// kernel: res_block_forward.5
= control target key start
LH: loop header
LB: loop body
LE: loop exit
PB: predicated region body
PF: predicated region fallthrough
CT: control target
= control target key end

     0   :  { %s7075_s15 = smov 0   ;;  %s7077_s16 = smov 0   ;;  %s8946_s0 = inlined_call_operand.vmem [shape: bf16[2,18,18,128], index: 0, kind: input, shape index: {}]   ;;  %s8947_s1 = inlined_call_operand.vmem [shape: bf16[9,128,128], index: 1, kind: input, shape index: {}]   ;;  %s8948_s2 = inlined_call_operand.vmem [shape: f32[2,256,128], index: 2, kind: output, shape index: {0}]   ;;  %s8949_s3 = inlined_call_operand.vmem [shape: f32[1,128], index: 3, kind: output, shape index: {1}]   ;;  %s8950_s4 = inlined_call_operand.vmem [shape: f32[1,128], index: 4, kind: output, shape index: {2}]  }
   0x1   :  { %s7079_s17 = smov 0  }
   0x2 LB: > { %s27_s18 = sadd.s32 1, %s7044_s16  ;;  %p5298_p0 = scmp.ge.s32.totalorder %s7048_s17, 1  ;;  %s7048_s17 = sphi %s7079_s17, %s15_s17   ;;  %s7044_s16 = sphi %s7077_s16, %s9018_s16   ;;  %s7040_s15 = sphi %s7075_s15, %s9017_s15  }
   0x3   : > { %p29_p1 = scmp.ge.s32.totalorder %s27_s18, 2  ;;  %p171_p2 = scmp.lt.s32.totalorder %s7048_s17, 3 }
   0x5   : > { %s9020_s18 = smov (%p29_p1, %s27_s18), 0  ;;  %p172_p3 = pnand %p5298_p0, %p171_p2 }
   0x7   : > { %175 = sbr.rel (%p172_p3) target bundleno = 616 (0x268), region = 28 }
   0xe   : > { %v6836_v0 = vld [vmem:[%s8947_s1 + $0x40] sm:$0xff]   ;;  %p201_p4 = scmp.lt.s32.totalorder %s7040_s15, 1  ;;  %v6838_v2 = vld [vmem:[%s8947_s1 + $0x48] sm:$0xff]   ;;  %v6840_v4 = vld [vmem:[%s8947_s1 + $0x50] sm:$0xff]   ;;  %vm285_vm0 = vsmask.f32 3328 }
   0xf   : > { %v6837_v1 = vld [vmem:[%s8947_s1 + $0x100] sm:$0xff]   ;;  %6107 = vmatprep.subr.bf16.mxu1 %v6836_v0  ;;  %v6839_v3 = vld [vmem:[%s8947_s1 + $0x108] sm:$0xff]   ;;  %v6841_v5 = vld [vmem:[%s8947_s1 + $0x110] sm:$0xff]   ;;  %vm286_vm1 = vsmask.f32 7440  ;;  %vm1315_vm3 = vcmask 1042432  }
  0x10   : > { %6299 = vmatprep.subr.bf16.mxu0 %v6837_v1  ;;  %6108 = vmatpush3.bf16.msra.mxu1 %v6836_v0  ;;  %s7115_s5 = scalar_select %p201_p4, %s7040_s15, 1  ;;  %v6842_v6 = vld [vmem:[%s8947_s1 + $0x58] sm:$0xff]   ;;  %v6844_v8 = vld [vmem:[%s8947_s1 + $0x60] sm:$0xff]   ;;  %v6846_v10 = vld [vmem:[%s8947_s1 + $0x68] sm:$0xff]   ;;  %vm1316_vm4 = vcmask 1046532  }
  0x11   : > { %6300 = vmatpush3.bf16.msra.mxu0 %v6837_v1  ;;  %6109 = vmatprep.subr.bf16.mxu1 %v6838_v2  ;;  %v6843_v7 = vld [vmem:[%s8947_s1 + $0x118] sm:$0xff]   ;;  %v6845_v9 = vld [vmem:[%s8947_s1 + $0x120] sm:$0xff]   ;;  %v6847_v11 = vld [vmem:[%s8947_s1 + $0x128] sm:$0xff]   ;;  %p5174_p5 = scmp.eq.s32.totalorder %s7040_s15, 0 }
  0x12   : > { %6301 = vmatprep.subr.bf16.mxu0 %v6839_v3  ;;  %s6811_s10 = smul.u32 216, %s7115_s5  ;;  %v6848_v25 = vld [vmem:[%s8947_s1 + $0x70] sm:$0xff]   ;;  %v6850_v36 = vld [vmem:[%s8947_s1 + $0x78] sm:$0xff]   ;;  %vm7165_vm2 = vmor %vm285_vm0, %vm286_vm1 }
  0x13   : > { %v6849_v30 = vld [vmem:[%s8947_s1 + $0x130] sm:$0xff]   ;;  %v6851_v51 = vld [vmem:[%s8947_s1 + $0x138] sm:$0xff]   ;;  %vm7411_vm5 = vmor %vm1315_vm3, %vm1316_vm4 }
  0x14   : > { %6110 = vmatpush3.bf16.msra.mxu1 %v6838_v2  ;;  %s7133_s21 = scalar_lea.vmem %s8946_s0, %s6811_s10 }
  0x15   : > { %6302 = vmatpush3.bf16.msra.mxu0 %v6839_v3  ;;  %6111 = vmatprep.subr.bf16.mxu1 %v6840_v4  ;;  %v221_v12 = vld [vmem:[%s7133_s21] sm:$0xf]  ;;  %v222_v13 = vld [vmem:[%s7133_s21 + $0x4] sm:$0xf]  ;;  %v269_v14 = vld [vmem:[%s7133_s21 + $0x8] sm:$0x1] }
  0x16   : > { %6303 = vmatprep.subr.bf16.mxu0 %v6841_v5  ;;  %v289_v15 = vshrl.u32 %v221_v12, 16  ;;  %v292_v16 = vshll.u32 %v221_v12, 16  ;;  %v298_v17 = vshll.u32 %v222_v13, 16  ;;  %v302_v18 = vshrl.u32 %v222_v13, 16  ;;  %v5494_v20 = vld [vmem:[%s7133_s21 + $0xc] sm:$0xf] }
  0x17   : > { %v308_v19 = vshll.u32 %v269_v14, 16  ;;  %v7146_v23 = vld [vmem:[%s7133_s21 + $0x10] sm:$0xf]  ;;  %v7149_v24 = vld [vmem:[%s7133_s21 + $0x14] sm:$0x1]  ;;  %v2191_v29 = vshrl.u32 %v5494_v20, 16 }
  0x18   : > { %6112 = vmatpush3.bf16.msra.mxu1 %v6840_v4  ;;  %v291_v21 = vrot.slane %v289_v15, 4  ;;  %v294_v22 = vrot.slane %v292_v16, 5  ;;  %v300_v26 = vrot.slane %v298_v17, 5  ;;  %v304_v27 = vrot.slane %v302_v18, 4  ;;  %v223_v35 = vld [vmem:[%s7133_s21 + $0xc] sm:$0xf] }
  0x19   : > { %6304 = vmatpush3.bf16.msra.mxu0 %v6841_v5  ;;  %6113 = vmatprep.subr.bf16.mxu1 %v6842_v6  ;;  %v310_v28 = vrot.slane %v308_v19, 5  ;;  %v2194_v32 = vshll.u32 %v5494_v20, 16  ;;  %v2200_v33 = vshll.u32 %v7146_v23, 16  ;;  %v2204_v34 = vshrl.u32 %v7146_v23, 16  ;;  %v224_v42 = vld [vmem:[%s7133_s21 + $0x10] sm:$0xf] }
  0x1a   : > { %6305 = vmatprep.subr.bf16.mxu0 %v6843_v7  ;;  %v295_v31 = vor.u32 %v294_v22, %v291_v21  ;;  %v305_v38 = vor.u32 %v304_v27, %v300_v26  ;;  %v2193_v39 = vrot.slane %v2191_v29, 4  ;;  %v2210_v40 = vshll.u32 %v7149_v24, 16  ;;  %v270_v55 = vld [vmem:[%s7133_s21 + $0x14] sm:$0x1]  ;;  %v5497_v57 = vld [vmem:[%s7133_s21 + $0x18] sm:$0xf] }
  0x1b   : > { %v2965_v41 = vrot.slane %v7149_v24, 5  ;;  %v2196_v44 = vrot.slane %v2194_v32, 5  ;;  %v2202_v45 = vrot.slane %v2200_v33, 5  ;;  %v2206_v46 = vrot.slane %v2204_v34, 4  ;;  %v7182_v62 = vld [vmem:[%s7133_s21 + $0x1c] sm:$0xf] }
  0x1c   : > { %6114 = vmatpush3.bf16.msra.mxu1 %v6842_v6  ;;  %v296_v43 = vrot.slane %v295_v31, 4  ;;  %v306_v47 = vrot.slane %v305_v38, 4  ;;  %v2212_v48 = vrot.slane %v2210_v40, 5  ;;  %v313_v49 = vshrl.u32 %v223_v35, 16  ;;  %v6852_v3 = vld [vmem:[%s8947_s1] sm:$0xff]  }
  0x1d   : > { %6306 = vmatpush3.bf16.msra.mxu0 %v6843_v7  ;;  %6115 = vmatprep.subr.bf16.mxu1 %v6844_v8  ;;  %v316_v50 = vshll.u32 %v223_v35, 16  ;;  %v2197_v53 = vor.u32 %v2196_v44, %v2193_v39  ;;  %v2207_v54 = vor.u32 %v2206_v46, %v2202_v45  ;;  %v322_v56 = vshll.u32 %v224_v42, 16  ;;  %v7190_v4 = vld [vmem:[%s8947_s1 + $0x140] sm:$0xff]   ;;  %v225_v21 = vld [vmem:[%s7133_s21 + $0x18] sm:$0xf]  ;;  %v6855_v46 = vld [vmem:[%s8947_s1 + $0x8] sm:$0xff]  }
  0x1e   : > { %6307 = vmatprep.subr.bf16.mxu0 %v6845_v9  ;;  %v301_v52 = vsel %vm7165_vm2, %v296_v43, %v300_v26  ;;  %v311_v58 = vsel %vm7165_vm2, %v306_v47, %v310_v28  ;;  %v315_v59 = vrot.slane %v313_v49, 4  ;;  %v326_v61 = vshrl.u32 %v224_v42, 16  ;;  %v226_v28 = vld [vmem:[%s7133_s21 + $0x1c] sm:$0xf]  ;;  %v271_v33 = vld [vmem:[%s7133_s21 + $0x20] sm:$0x1] }
  0x1f   : > { %v318_v60 = vrot.slane %v316_v50, 5  ;;  %v5318_v63 = vcombine.low %v301_v52, %v311_v58  ;;  %v2198_v0 = vrot.slane %v2197_v53, 4  ;;  %v2208_v1 = vrot.slane %v2207_v54, 4  ;;  %v5500_v39 = vld [vmem:[%s7133_s21 + $0x24] sm:$0xf] }
  0x20   : > { %6116 = vmatpush3.bf16.msra.mxu1 %v6844_v8  ;;  %v324_v2 = vrot.slane %v322_v56, 5  ;;  %v328_v6 = vrot.slane %v326_v61, 4  ;;  %v332_v7 = vshll.u32 %v270_v55, 16  ;;  %v7193_v8 = vld [vmem:[%s7133_s21 + $0x20] sm:$0x1]  ;;  %v2218_v12 = vshll.u32 %v5497_v57, 16 }
  0x21   : > { %6308 = vmatpush3.bf16.msra.mxu0 %v6845_v9  ;;  %6117 = vmatprep.subr.bf16.mxu1 %v6846_v10  ;;  %v319_v5 = vor.u32 %v318_v60, %v315_v59  ;;  %v2203_v9 = vsel %vm7165_vm2, %v2198_v0, %v2202_v45  ;;  %v2224_v19 = vshll.u32 %v7182_v62, 16  ;;  %v2228_v20 = vshrl.u32 %v7182_v62, 16  ;;  %v7218_v45 = vld [vmem:[%s7133_s21 + $0x28] sm:$0xf]  ;;  %v227_v52 = vld [vmem:[%s7133_s21 + $0x24] sm:$0xf] }
  0x22   : > { %6309 = vmatprep.subr.bf16.mxu0 %v6847_v11  ;;  %6123 = vmatprep.mubr.bf16.mxu1 %v5318_v63  ;;  %v329_v15 = vor.u32 %v328_v6, %v324_v2  ;;  %v334_v16 = vrot.slane %v332_v7, 5  ;;  %v2220_v18 = vrot.slane %v2218_v12, 5  ;;  %v2234_v26 = vshll.u32 %v7193_v8, 16  ;;  %v6854_v63 = vld [vmem:[%s8947_s1 + $0x148] sm:$0xff]  }
  0x23   : > { %v320_v14 = vrot.slane %v319_v5, 4  ;;  %v2969_v27 = vrot.slane %v7182_v62, 5  ;;  %v2230_v31 = vrot.slane %v2228_v20, 4  ;;  %v2972_v32 = vrot.slane %v7193_v8, 5  ;;  %v228_v5 = vld [vmem:[%s7133_s21 + $0x28] sm:$0xf] }
  0x24   : > { %6118 = vmatpush3.bf16.msra.mxu1 %v6846_v10  ;;  %v2213_v10 = vsel %vm7165_vm2, %v2208_v1, %v2212_v48  ;;  %v2236_v35 = vrot.slane %v2234_v26, 5  ;;  %v337_v38 = vshrl.u32 %v225_v21, 16  ;;  %v340_v44 = vshll.u32 %v225_v21, 16 }
  0x25   : > { %6310 = vmatpush3.bf16.msra.mxu0 %v6847_v11  ;;  %6119 = vmatprep.subr.bf16.mxu1 %v6848_v25  ;;  %v2215_v11 = vshrl.u32 %v5497_v57, 16  ;;  %v5558_v13 = vcombine.low %v2203_v9, %v2213_v10  ;;  %v325_v22 = vsel %vm7165_vm2, %v320_v14, %v324_v2  ;;  %v346_v48 = vshll.u32 %v226_v28, 16 }
  0x26   : > { %6311 = vmatprep.subr.bf16.mxu0 %v6849_v30  ;;  %v339_v47 = vrot.slane %v337_v38, 4  ;;  %v350_v49 = vshrl.u32 %v226_v28, 16  ;;  %v356_v50 = vshll.u32 %v271_v33, 16  ;;  %v342_v55 = vrot.slane %v340_v44, 5  ;;  %v7249_v33 = vld [vmem:[%s7133_s21 + $0x34] sm:$0xf] }
  0x27   : > { %v2217_v17 = vrot.slane %v2215_v11, 4  ;;  %6315 = vmatprep.mubr.bf16.mxu0 %v5558_v13  ;;  %v2239_v56 = vshrl.u32 %v5500_v39, 16  ;;  %v348_v57 = vrot.slane %v346_v48, 5  ;;  %v2242_v60 = vshll.u32 %v5500_v39, 16  ;;  %v272_v11 = vld [vmem:[%s7133_s21 + $0x2c] sm:$0x1] }
  0x28   : > { %6120 = vmatpush3.bf16.msra.mxu1 %v6848_v25  ;;  %v330_v25 = vrot.slane %v329_v15, 4  ;;  %v352_v58 = vrot.slane %v350_v49, 4  ;;  %v358_v59 = vrot.slane %v356_v50, 5  ;;  %v343_v0 = vor.u32 %v342_v55, %v339_v47  ;;  %v6857_v48 = vld [vmem:[%s8947_s1 + $0x158] sm:$0xff]  }
  0x29   : > { %6312 = vmatpush3.bf16.msra.mxu0 %v6849_v30  ;;  %6121 = vmatprep.subr.bf16.mxu1 %v6850_v36  ;;  %v2221_v29 = vor.u32 %v2220_v18, %v2217_v17  ;;  %v2226_v30 = vrot.slane %v2224_v19, 5  ;;  %v2241_v1 = vrot.slane %v2239_v56, 4  ;;  %v2248_v2 = vshll.u32 %v7218_v45, 16 }
  0x2a   : > { %6313 = vmatprep.subr.bf16.mxu0 %v6851_v51  ;;  %v335_v34 = vsel %vm7165_vm2, %v330_v25, %v334_v16  ;;  %v353_v7 = vor.u32 %v352_v58, %v348_v57  ;;  %v2244_v9 = vrot.slane %v2242_v60, 5  ;;  %v2252_v10 = vshrl.u32 %v7218_v45, 16  ;;  %v5503_v16 = vld [vmem:[%s7133_s21 + $0x30] sm:$0xf]  ;;  %v6864_v60 = vld [vmem:[%s8947_s1 + $0x20] sm:$0xff]  }
  0x2b   : > { %v5319_v40 = vcombine.low %v325_v22, %v335_v34  ;;  %v2222_v42 = vrot.slane %v2221_v29, 4  ;;  %v2231_v43 = vor.u32 %v2230_v31, %v2226_v30  ;;  %v344_v12 = vrot.slane %v343_v0, 4  ;;  %v6861_v34 = vld [vmem:[%s8947_s1 + $0x18] sm:$0xff]  }
  0x2c   : > { %6122 = vmatpush3.bf16.msra.mxu1 %v6850_v36  ;;  %v7214_v36 = vrot.slane %v2969_v27, 4  ;;  %v2250_v13 = vrot.slane %v2248_v2, 5  ;;  %v361_v15 = vshrl.u32 %v227_v52, 16  ;;  %v354_v17 = vrot.slane %v353_v7, 4  ;;  %v273_v2 = vld [vmem:[%s7133_s21 + $0x38] sm:$0x1] }
  0x2d   : > { %6314 = vmatpush3.bf16.msra.mxu0 %v6851_v51  ;;  %6155 = vmatprep.subr.bf16.mxu1 %v6852_v3  ;;  %v7224_v51 = vld [vmem:[%s7133_s21 + $0x2c] sm:$0x1]  ;;  %v2227_v53 = vsel %vm7165_vm2, %v2222_v42, %v2226_v30  ;;  %v2232_v54 = vrot.slane %v2231_v43, 4  ;;  %v2245_v18 = vor.u32 %v2244_v9, %v2241_v1  ;;  %v2254_v19 = vrot.slane %v2252_v10, 4  ;;  %v5506_v9 = vld [vmem:[%s7133_s21 + $0x3c] sm:$0xf] }
  0x2e   : > { %6347 = vmatprep.subr.bf16.mxu0 %v7190_v4  ;;  %v2258_v14 = vshll.u32 %v7224_v51, 16  ;;  %v364_v20 = vshll.u32 %v227_v52, 16  ;;  %v349_v21 = vsel %vm7165_vm2, %v344_v12, %v348_v57  ;;  %v363_v25 = vrot.slane %v361_v15, 4 }
  0x2f   : > { %6124 = vmatmul.mubr.bf16.vlgmr.msra.gmra.mrb[0].mxu1 %v5319_v40  ;;  %v2237_v61 = vsel %vm7165_vm2, %v2232_v54, %v2236_v35  ;;  %v370_v26 = vshll.u32 %v228_v5, 16  ;;  %v359_v28 = vsel %vm7165_vm2, %v354_v17, %v358_v59  ;;  %v2246_v29 = vrot.slane %v2245_v18, 4  ;;  %v229_v54 = vld [vmem:[%s7133_s21 + $0x30] sm:$0xf]  ;;  %v230_v59 = vld [vmem:[%s7133_s21 + $0x34] sm:$0xf] }
  0x30   : > { %6156 = vmatpush3.bf16.msra.mxu1 %v6852_v3  ;;  %v6858_v3 = vld [vmem:[%s8947_s1 + $0x10] sm:$0xff]   ;;  %v5559_v6 = vcombine.low %v2227_v53, %v2237_v61  ;;  %v2260_v22 = vrot.slane %v2258_v14, 5  ;;  %v2255_v30 = vor.u32 %v2254_v19, %v2250_v13  ;;  %v366_v31 = vrot.slane %v364_v20, 5  ;;  %v6866_v14 = vld [vmem:[%s8947_s1 + $0x28] sm:$0xff]   ;;  %v7283_v19 = vld [vmem:[%s7133_s21 + $0x40] sm:$0xf] }
  0x31   : > { %6157 = vmatprep.subr.bf16.mxu1 %v6855_v46  ;;  %v5320_v35 = vcombine.low %v349_v21, %v359_v28  ;;  %v372_v38 = vrot.slane %v370_v26, 5  ;;  %v374_v39 = vshrl.u32 %v228_v5, 16  ;;  %v380_v40 = vshll.u32 %v272_v11, 16  ;;  %v6859_v20 = vld [vmem:[%s8947_s1 + $0x160] sm:$0xff]  }
  0x32   : > { %6316 = vmatmul.mubr.bf16.vlgmr.msra.gmra.mrb[0].mxu0 %v5559_v6  ;;  %v2251_v42 = vsel %vm7165_vm2, %v2246_v29, %v2250_v13  ;;  %v2256_v43 = vrot.slane %v2255_v30, 4  ;;  %v367_v44 = vor.u32 %v366_v31, %v363_v25  ;;  %v2263_v47 = vshrl.u32 %v5503_v16, 16  ;;  %v7291_v28 = vld [vmem:[%s7133_s21 + $0x44] sm:$0x1] }
  0x33   : > { %6348 = vmatpush3.bf16.msra.mxu0 %v7190_v4  ;;  %v6856_v4 = vld [vmem:[%s8947_s1 + $0x150] sm:$0xff]   ;;  %6127 = vmatprep.mubr.bf16.mxu1 %v5320_v35  ;;  %v376_v49 = vrot.slane %v374_v39, 4  ;;  %v382_v50 = vrot.slane %v380_v40, 5  ;;  %v2266_v52 = vshll.u32 %v5503_v16, 16  ;;  %v2272_v53 = vshll.u32 %v7249_v33, 16 }
  0x34   : > { %6158 = vmatpush3.bf16.msra.mxu1 %v6855_v46  ;;  %6349 = vmatprep.subr.bf16.mxu0 %v6854_v63  ;;  %v7260_v46 = vld [vmem:[%s7133_s21 + $0x38] sm:$0x1]  ;;  %v2261_v55 = vsel %vm7165_vm2, %v2256_v43, %v2260_v22  ;;  %v368_v56 = vrot.slane %v367_v44, 4  ;;  %v2265_v57 = vrot.slane %v2263_v47, 4  ;;  %v2276_v58 = vshrl.u32 %v7249_v33, 16  ;;  %v6868_v35 = vld [vmem:[%s8947_s1 + $0x30] sm:$0xff]  }
  0x35   : > { %6159 = vmatprep.subr.bf16.mxu1 %v6858_v3  ;;  %v5560_v61 = vcombine.low %v2251_v42, %v2261_v55  ;;  %v2268_v0 = vrot.slane %v2266_v52, 5  ;;  %v2274_v1 = vrot.slane %v2272_v53, 5  ;;  %v2282_v6 = vshll.u32 %v7260_v46, 16  ;;  %v232_v55 = vld [vmem:[%s7133_s21 + $0x40] sm:$0xf] }
  0x36   : > { %v373_v5 = vsel %vm7165_vm2, %v368_v56, %v372_v38  ;;  %v385_v7 = vshrl.u32 %v229_v54, 16  ;;  %v388_v12 = vshll.u32 %v229_v54, 16  ;;  %v394_v13 = vshll.u32 %v230_v59, 16 }
  0x37   : > { %6350 = vmatpush3.bf16.msra.mxu0 %v6854_v63  ;;  %v377_v63 = vor.u32 %v376_v49, %v372_v38  ;;  %6319 = vmatprep.mubr.bf16.mxu0 %v5560_v61  ;;  %v2269_v11 = vor.u32 %v2268_v0, %v2265_v57  ;;  %v2284_v16 = vrot.slane %v2282_v6, 5  ;;  %v398_v18 = vshrl.u32 %v230_v59, 16 }
  0x38   : > { %6160 = vmatpush3.bf16.msra.mxu1 %v6858_v3  ;;  %6351 = vmatprep.subr.bf16.mxu0 %v6856_v4  ;;  %v2278_v3 = vrot.slane %v2276_v58, 4  ;;  %v387_v17 = vrot.slane %v385_v7, 4  ;;  %v390_v25 = vrot.slane %v388_v12, 5  ;;  %v396_v26 = vrot.slane %v394_v13, 5 }
  0x39   : > { %6161 = vmatprep.subr.bf16.mxu1 %v6861_v34  ;;  %v378_v10 = vrot.slane %v377_v63, 4  ;;  %v2270_v22 = vrot.slane %v2269_v11, 4  ;;  %v400_v31 = vrot.slane %v398_v18, 4  ;;  %v2287_v40 = vshrl.u32 %v5506_v9, 16  ;;  %v274_v63 = vld [vmem:[%s7133_s21 + $0x44] sm:$0x1] }
  0x3a   : > { %v2279_v15 = vor.u32 %v2278_v3, %v2274_v1  ;;  %v391_v39 = vor.u32 %v390_v25, %v387_v17  ;;  %v2290_v42 = vshll.u32 %v5506_v9, 16  ;;  %v2296_v49 = vshll.u32 %v7283_v19, 16  ;;  %v5509_v9 = vld [vmem:[%s7133_s21 + $0x48] sm:$0xf] }
  0x3b   : > { %6352 = vmatpush3.bf16.msra.mxu0 %v6856_v4  ;;  %v383_v21 = vsel %vm7165_vm2, %v378_v10, %v382_v50  ;;  %v404_v4 = vshll.u32 %v273_v2, 16  ;;  %v2275_v38 = vsel %vm7165_vm2, %v2270_v22, %v2274_v1  ;;  %v401_v44 = vor.u32 %v400_v31, %v396_v26  ;;  %v6870_v2 = vld [vmem:[%s8947_s1 + $0x38] sm:$0xff]   ;;  %v7324_v22 = vld [vmem:[%s7133_s21 + $0x50] sm:$0x1] }
  0x3c   : > { %6162 = vmatpush3.bf16.msra.mxu1 %v6861_v34  ;;  %6353 = vmatprep.subr.bf16.mxu0 %v6857_v48  ;;  %v5321_v29 = vcombine.low %v373_v5, %v383_v21  ;;  %v2280_v30 = vrot.slane %v2279_v15, 4  ;;  %v231_v34 = vld [vmem:[%s7133_s21 + $0x3c] sm:$0xf]  ;;  %v392_v52 = vrot.slane %v391_v39, 4  ;;  %v2289_v53 = vrot.slane %v2287_v40, 4  ;;  %v6862_v15 = vld [vmem:[%s8947_s1 + $0x170] sm:$0xff]  }
  0x3d   : > { %6163 = vmatprep.subr.bf16.mxu1 %v6864_v60  ;;  %v406_v47 = vrot.slane %v404_v4, 5  ;;  %v2292_v54 = vrot.slane %v2290_v42, 5  ;;  %v402_v56 = vrot.slane %v401_v44, 4  ;;  %v2298_v57 = vrot.slane %v2296_v49, 5  ;;  %v6863_v31 = vld [vmem:[%s8947_s1 + $0x178] sm:$0xff]   ;;  %v7335_v4 = vld [vmem:[%s8947_s1 + $0x80] sm:$0xff]  }
  0x3e   : > { %6128 = vmatmul.mubr.bf16.gmra.mrb[4].mxu1 %v5321_v29  ;;  %v2285_v43 = vsel %vm7165_vm2, %v2280_v30, %v2284_v16  ;;  %v2300_v58 = vshrl.u32 %v7283_v19, 16  ;;  %v2306_v59 = vshll.u32 %v7291_v28, 16  ;;  %v409_v0 = vshrl.u32 %v231_v34, 16  ;;  %v233_v30 = vld [vmem:[%s7133_s21 + $0x48] sm:$0xf] }
  0x3f   : > { %6354 = vmatpush3.bf16.msra.mxu0 %v6857_v48  ;;  %v5561_v50 = vcombine.low %v2275_v38, %v2285_v43  ;;  %v6860_v48 = vld [vmem:[%s8947_s1 + $0x168] sm:$0xff]   ;;  %v2293_v61 = vor.u32 %v2292_v54, %v2289_v53  ;;  %v412_v1 = vshll.u32 %v231_v34, 16  ;;  %v407_v5 = vsel %vm7165_vm2, %v402_v56, %v406_v47  ;;  %v275_v54 = vld [vmem:[%s7133_s21 + $0x50] sm:$0x1] }
  0x40   : > { %6164 = vmatpush3.bf16.msra.mxu1 %v6864_v60  ;;  %6355 = vmatprep.subr.bf16.mxu0 %v6859_v20  ;;  %v397_v60 = vsel %vm7165_vm2, %v392_v52, %v396_v26  ;;  %v2302_v3 = vrot.slane %v2300_v58, 4  ;;  %v2308_v6 = vrot.slane %v2306_v59, 5  ;;  %v418_v7 = vshll.u32 %v232_v55, 16  ;;  %v234_v53 = vld [vmem:[%s7133_s21 + $0x4c] sm:$0xf] }
  0x41   : > { %6165 = vmatprep.subr.bf16.mxu1 %v6866_v14  ;;  %6320 = vmatmul.mubr.bf16.gmra.mrb[4].mxu0 %v5561_v50  ;;  %v5322_v10 = vcombine.low %v397_v60, %v407_v5  ;;  %v2294_v11 = vrot.slane %v2293_v61, 4  ;;  %v411_v12 = vrot.slane %v409_v0, 4  ;;  %v414_v13 = vrot.slane %v412_v1, 5  ;;  %v5512_v58 = vld [vmem:[%s7133_s21 + $0x54] sm:$0xf] }
  0x42   : > { %v2303_v16 = vor.u32 %v2302_v3, %v2298_v57  ;;  %v420_v17 = vrot.slane %v418_v7, 5  ;;  %v422_v18 = vshrl.u32 %v232_v55, 16  ;;  %v428_v21 = vshll.u32 %v274_v63, 16  ;;  %v7349_v0 = vld [vmem:[%s7133_s21 + $0x58] sm:$0xf] }
  0x43   : > { %6356 = vmatpush3.bf16.msra.mxu0 %v6859_v20  ;;  %6131 = vmatprep.mubr.bf16.mxu1 %v5322_v10  ;;  %v2299_v20 = vsel %vm7165_vm2, %v2294_v11, %v2298_v57  ;;  %v415_v25 = vor.u32 %v414_v13, %v411_v12  ;;  %v2311_v26 = vshrl.u32 %v5509_v9, 16  ;;  %v2314_v29 = vshll.u32 %v5509_v9, 16 }
  0x44   : > { %6166 = vmatpush3.bf16.msra.mxu1 %v6866_v14  ;;  %v7318_v14 = vld [vmem:[%s7133_s21 + $0x4c] sm:$0xf]  ;;  %6357 = vmatprep.subr.bf16.mxu0 %v6860_v48  ;;  %v2304_v34 = vrot.slane %v2303_v16, 4  ;;  %v430_v38 = vrot.slane %v428_v21, 5  ;;  %v2330_v52 = vshll.u32 %v7324_v22, 16  ;;  %v433_v61 = vshrl.u32 %v233_v30, 16 }
  0x45   : > { %6167 = vmatprep.subr.bf16.mxu1 %v6868_v35  ;;  %v2320_v39 = vshll.u32 %v7318_v14, 16  ;;  %v416_v40 = vrot.slane %v415_v25, 4  ;;  %v2313_v42 = vrot.slane %v2311_v26, 4  ;;  %v2316_v43 = vrot.slane %v2314_v29, 5 }
  0x46   : > { %v2324_v44 = vshrl.u32 %v7318_v14, 16  ;;  %v2309_v47 = vsel %vm7165_vm2, %v2304_v34, %v2308_v6  ;;  %v2332_v60 = vrot.slane %v2330_v52, 5  ;;  %v436_v63 = vshll.u32 %v233_v30, 16  ;;  %v7354_v6 = vld [vmem:[%s8947_s1 + $0x180] sm:$0xff]  }
  0x47   : > { %6358 = vmatpush3.bf16.msra.mxu0 %v6860_v48  ;;  %v2322_v50 = vrot.slane %v2320_v39, 5  ;;  %v5562_v55 = vcombine.low %v2299_v20, %v2309_v47  ;;  %v421_v48 = vsel %vm7165_vm2, %v416_v40, %v420_v17  ;;  %v2317_v56 = vor.u32 %v2316_v43, %v2313_v42  ;;  %v7361_v20 = vld [vmem:[%s7133_s21 + $0x5c] sm:$0x1]  ;;  %v236_v43 = vld [vmem:[%s7133_s21 + $0x58] sm:$0xf] }
  0x48   : > { %6168 = vmatpush3.bf16.msra.mxu1 %v6868_v35  ;;  %v424_v35 = vrot.slane %v422_v18, 4  ;;  %6359 = vmatprep.subr.bf16.mxu0 %v6862_v15  ;;  %v2326_v57 = vrot.slane %v2324_v44, 4  ;;  %v446_v3 = vshrl.u32 %v234_v53, 16  ;;  %v435_v9 = vrot.slane %v433_v61, 4  ;;  %v5515_v52 = vld [vmem:[%s7133_s21 + $0x60] sm:$0xf] }
  0x49   : > { %6169 = vmatprep.subr.bf16.mxu1 %v6870_v2  ;;  %6323 = vmatprep.mubr.bf16.mxu0 %v5562_v55  ;;  %v2318_v1 = vrot.slane %v2317_v56, 4  ;;  %v438_v10 = vrot.slane %v436_v63, 5  ;;  %v452_v11 = vshll.u32 %v275_v54, 16  ;;  %v2335_v25 = vshrl.u32 %v5512_v58, 16 }
  0x4a   : > { %v425_v49 = vor.u32 %v424_v35, %v420_v17  ;;  %v2327_v5 = vor.u32 %v2326_v57, %v2322_v50  ;;  %v448_v18 = vrot.slane %v446_v3, 4  ;;  %v2338_v29 = vshll.u32 %v5512_v58, 16  ;;  %v235_v35 = vld [vmem:[%s7133_s21 + $0x54] sm:$0xf] }
  0x4b   : > { %6360 = vmatpush3.bf16.msra.mxu0 %v6862_v15  ;;  %v2323_v13 = vsel %vm7165_vm2, %v2318_v1, %v2322_v50  ;;  %v439_v17 = vor.u32 %v438_v10, %v435_v9  ;;  %v454_v21 = vrot.slane %v452_v11, 5  ;;  %v2344_v30 = vshll.u32 %v7349_v0, 16  ;;  %v276_v50 = vld [vmem:[%s7133_s21 + $0x5c] sm:$0x1] }
  0x4c   : > { %6170 = vmatpush3.bf16.msra.mxu1 %v6870_v2  ;;  %v426_v59 = vrot.slane %v425_v49, 4  ;;  %v442_v2 = vshll.u32 %v234_v53, 16  ;;  %6361 = vmatprep.subr.bf16.mxu0 %v6863_v31  ;;  %v2328_v15 = vrot.slane %v2327_v5, 4  ;;  %v2348_v34 = vshrl.u32 %v7349_v0, 16 }
  0x4d   : > { %6203 = vmatprep.subr.bf16.mxu1 %v7335_v4  ;;  %v440_v39 = vrot.slane %v439_v17, 4  ;;  %v2337_v42 = vrot.slane %v2335_v25, 4  ;;  %v2346_v44 = vrot.slane %v2344_v30, 5  ;;  %v2354_v49 = vshll.u32 %v7361_v20, 16  ;;  %v7385_v17 = vld [vmem:[%s7133_s21 + $0x68] sm:$0x1] }
  0x4e   : > { %v431_v7 = vsel %vm7165_vm2, %v426_v59, %v430_v38  ;;  %v444_v16 = vrot.slane %v442_v2, 5  ;;  %v2333_v26 = vsel %vm7165_vm2, %v2328_v15, %v2332_v60  ;;  %v2350_v47 = vrot.slane %v2348_v34, 4  ;;  %v7376_v60 = vld [vmem:[%s7133_s21 + $0x64] sm:$0xf]  ;;  %v7389_v25 = vld [vmem:[%s7133_s21 + $0x60] sm:$0xf] }
  0x4f   : > { %v5323_v12 = vcombine.low %v421_v48, %v431_v7  ;;  %6362 = vmatpush3.bf16.msra.mxu0 %v6863_v31  ;;  %v5563_v38 = vcombine.low %v2323_v13, %v2333_v26  ;;  %v2340_v31 = vrot.slane %v2338_v29, 5  ;;  %v457_v55 = vshrl.u32 %v235_v35, 16 }
  0x50   : > { %6395 = vmatprep.subr.bf16.mxu0 %v7354_v6  ;;  %v449_v40 = vor.u32 %v448_v18, %v444_v16  ;;  %v445_v53 = vsel %vm7165_vm2, %v440_v39, %v444_v16  ;;  %v460_v48 = vshll.u32 %v235_v35, 16  ;;  %v2351_v57 = vor.u32 %v2350_v47, %v2346_v44  ;;  %v7392_v35 = vld [vmem:[%s7133_s21 + $0x64] sm:$0xf] }
  0x51   : > { %6132 = vmatmul.mubr.bf16.gmra.mrb[8].mxu1 %v5323_v12  ;;  %6324 = vmatmul.mubr.bf16.gmra.mrb[8].mxu0 %v5563_v38  ;;  %v2341_v56 = vor.u32 %v2340_v31, %v2337_v42  ;;  %v2356_v58 = vrot.slane %v2354_v49, 5  ;;  %v466_v59 = vshll.u32 %v236_v43, 16  ;;  %v459_v63 = vrot.slane %v457_v55, 4 }
  0x52   : > { %v450_v54 = vrot.slane %v449_v40, 4  ;;  %v462_v1 = vrot.slane %v460_v48, 5  ;;  %v470_v5 = vshrl.u32 %v236_v43, 16  ;;  %v2352_v7 = vrot.slane %v2351_v57, 4  ;;  %v277_v43 = vld [vmem:[%s7133_s21 + $0x68] sm:$0x1] }
  0x53   : > { %v2342_v3 = vrot.slane %v2341_v56, 4  ;;  %v468_v9 = vrot.slane %v466_v59, 5  ;;  %v476_v12 = vshll.u32 %v276_v50, 16  ;;  %v2359_v13 = vshrl.u32 %v5515_v52, 16  ;;  %v5582_v50 = vld [vmem:[%s7133_s21 + $0xc] sm:$0xe] }
  0x54   : > { %v455_v61 = vsel %vm7165_vm2, %v450_v54, %v454_v21  ;;  %v463_v10 = vor.u32 %v462_v1, %v459_v63  ;;  %v472_v11 = vrot.slane %v470_v5, 4  ;;  %v2357_v16 = vsel %vm7165_vm2, %v2352_v7, %v2356_v58  ;;  %v7407_v5 = vld [vmem:[%s7133_s21 + $0x6c] sm:$0xf] }
  0x55   : > { %v5324_v2 = vcombine.low %v445_v53, %v455_v61  ;;  %v2347_v15 = vsel %vm7165_vm2, %v2342_v3, %v2346_v44  ;;  %v2362_v18 = vshll.u32 %v5515_v52, 16  ;;  %v2368_v21 = vshll.u32 %v7376_v60, 16 }
  0x56   : > { %v5564_v26 = vcombine.low %v2347_v15, %v2357_v16  ;;  %v464_v29 = vrot.slane %v463_v10, 4  ;;  %v473_v30 = vor.u32 %v472_v11, %v468_v9  ;;  %v478_v34 = vrot.slane %v476_v12, 5 }
  0x57   : > { %6135 = vmatprep.mubr.bf16.mxu1 %v5324_v2  ;;  %v2361_v38 = vrot.slane %v2359_v13, 4  ;;  %v2364_v39 = vrot.slane %v2362_v18, 5  ;;  %v2370_v40 = vrot.slane %v2368_v21, 5  ;;  %v2372_v42 = vshrl.u32 %v7376_v60, 16  ;;  %v7419_v21 = vld [vmem:[%s7133_s21 + $0x70] sm:$0xf] }
  0x58   : > { %6327 = vmatprep.mubr.bf16.mxu0 %v5564_v26  ;;  %v469_v31 = vsel %vm7165_vm2, %v464_v29, %v468_v9  ;;  %v474_v44 = vrot.slane %v473_v30, 4  ;;  %v2378_v47 = vshll.u32 %v7385_v17, 16  ;;  %v481_v49 = vshrl.u32 %v7389_v25, 16  ;;  %v6954_v9 = vld [vmem:[%s7133_s21 + $0xb4] sm:$0xff]  }
  0x59   : > { %v2365_v52 = vor.u32 %v2364_v39, %v2361_v38  ;;  %v2374_v53 = vrot.slane %v2372_v42, 4  ;;  %v484_v54 = vshll.u32 %v7389_v25, 16  ;;  %v490_v55 = vshll.u32 %v7392_v35, 16 }
  0x5a   : > { %v479_v48 = vsel %vm7165_vm2, %v474_v44, %v478_v34  ;;  %v2380_v56 = vrot.slane %v2378_v47, 5  ;;  %v483_v57 = vrot.slane %v481_v49, 4  ;;  %v494_v58 = vshrl.u32 %v7392_v35, 16  ;;  %v7430_v47 = vld [vmem:[%s7133_s21 + $0x78] sm:$0xf] }
  0x5b   : > { %v5325_v59 = vcombine.low %v469_v31, %v479_v48  ;;  %v2366_v61 = vrot.slane %v2365_v52, 4  ;;  %v2375_v63 = vor.u32 %v2374_v53, %v2370_v40  ;;  %v486_v1 = vrot.slane %v484_v54, 5  ;;  %v7441_v54 = vld [vmem:[%s7133_s21 + $0x7c] sm:$0xf] }
  0x5c   : > { %v492_v2 = vrot.slane %v490_v55, 5  ;;  %v496_v3 = vrot.slane %v494_v58, 4  ;;  %v500_v7 = vshll.u32 %v277_v43, 16  ;;  %v5598_v10 = vrot.slane %v5582_v50, 9  ;;  %v279_v58 = vld [vmem:[%s7133_s21 + $0x80] sm:$0x1] }
  0x5d   : > { %6136 = vmatmul.mubr.bf16.gmra.mrb[12].mxu1 %v5325_v59  ;;  %v2371_v11 = vsel %vm7165_vm2, %v2366_v61, %v2370_v40  ;;  %v2376_v12 = vrot.slane %v2375_v63, 4  ;;  %v487_v13 = vor.u32 %v486_v1, %v483_v57  ;;  %v2962_v15 = vrot.slane %v7146_v23, 5  ;;  %v278_v40 = vld [vmem:[%s7133_s21 + $0x74] sm:$0x1]  ;;  %v5583_v23 = vld [vmem:[%s7133_s21 + $0x18] sm:$0xe] }
  0x5e   : > { %v497_v16 = vor.u32 %v496_v3, %v492_v2  ;;  %v502_v18 = vrot.slane %v500_v7, 5  ;;  %v505_v26 = vshrl.u32 %v7407_v5, 16  ;;  %v508_v29 = vshll.u32 %v7407_v5, 16 }
  0x5f   : > { %v2381_v30 = vsel %vm7165_vm2, %v2376_v12, %v2380_v56  ;;  %v488_v34 = vrot.slane %v487_v13, 4  ;;  %v2963_v38 = vsel %vm7411_vm5, %v5598_v10, %v2962_v15  ;;  %v2964_v39 = vrot.slane %v2962_v15, 4  ;;  %v5584_v13 = vld [vmem:[%s7133_s21 + $0x24] sm:$0xe] }
  0x60   : > { %v5565_v42 = vcombine.low %v2371_v11, %v2381_v30  ;;  %v498_v43 = vrot.slane %v497_v16, 4  ;;  %v507_v31 = vrot.slane %v505_v26, 4  ;;  %v510_v44 = vrot.slane %v508_v29, 5  ;;  %v7463_v16 = vld [vmem:[%s7133_s21 + $0x84] sm:$0xf]  ;;  %v6867_v29 = vld [vmem:[%s8947_s1 + $0x188] sm:$0xff]  }
  0x61   : > { %v493_v49 = vsel %vm7165_vm2, %v488_v34, %v492_v2  ;;  %v2966_v50 = vsel %vm7411_vm5, %v2964_v39, %v2965_v41  ;;  %v514_v52 = vshll.u32 %v7419_v21, 16  ;;  %v518_v53 = vshrl.u32 %v7419_v21, 16 }
  0x62   : > { %6328 = vmatmul.mubr.bf16.gmra.mrb[12].mxu0 %v5565_v42  ;;  %v503_v55 = vsel %vm7165_vm2, %v498_v43, %v502_v18  ;;  %v5630_v48 = vcombine.low %v2963_v38, %v2966_v50  ;;  %v511_v56 = vor.u32 %v510_v44, %v507_v31  ;;  %v524_v57 = vshll.u32 %v278_v40, 16  ;;  %v7471_v40 = vld [vmem:[%s7133_s21 + $0x88] sm:$0xf]  ;;  %v280_v31 = vld [vmem:[%s7133_s21 + $0x8c] sm:$0x1] }
  0x63   : > { %v5326_v59 = vcombine.low %v493_v49, %v503_v55  ;;  %v516_v24 = vrot.slane %v514_v52, 5  ;;  %v520_v61 = vrot.slane %v518_v53, 4  ;;  %v5599_v63 = vrot.slane %v5583_v23, 9 }
  0x64   : > { %6363 = vmatprep.mubr.bf16.mxu0 %v5630_v48  ;;  %v512_v41 = vrot.slane %v511_v56, 4  ;;  %v526_v1 = vrot.slane %v524_v57, 5  ;;  %v2973_v2 = vsel %vm7411_vm5, %v7214_v36, %v2972_v32  ;;  %v529_v3 = vshrl.u32 %v7430_v47, 16 }
  0x65   : > { %6139 = vmatprep.mubr.bf16.mxu1 %v5326_v59  ;;  %v521_v7 = vor.u32 %v520_v61, %v516_v24  ;;  %v2970_v10 = vsel %vm7411_vm5, %v5599_v63, %v2969_v27  ;;  %v532_v11 = vshll.u32 %v7430_v47, 16  ;;  %v538_v12 = vshll.u32 %v7441_v54, 16 }
  0x66   : > { %v517_v8 = vsel %vm7165_vm2, %v512_v41, %v516_v24  ;;  %v5631_v15 = vcombine.low %v2970_v10, %v2973_v2  ;;  %v531_v32 = vrot.slane %v529_v3, 4  ;;  %v542_v36 = vshrl.u32 %v7441_v54, 16  ;;  %v7492_v2 = vld [vmem:[%s7133_s21 + $0x90] sm:$0xf]  ;;  %v7495_v3 = vld [vmem:[%s7133_s21 + $0x94] sm:$0xf] }
  0x67   : > { %v522_v62 = vrot.slane %v521_v7, 4  ;;  %v534_v18 = vrot.slane %v532_v11, 5  ;;  %v540_v26 = vrot.slane %v538_v12, 5  ;;  %v548_v27 = vshll.u32 %v279_v58, 16 }
  0x68   : > { %v544_v30 = vrot.slane %v542_v36, 4  ;;  %v5600_v34 = vrot.slane %v5584_v13, 9  ;;  %v2976_v38 = vrot.slane %v7218_v45, 5  ;;  %v2979_v39 = vrot.slane %v7224_v51, 5  ;;  %v5585_v45 = vld [vmem:[%s7133_s21 + $0x30] sm:$0xe] }
  0x69   : > { %v527_v23 = vsel %vm7165_vm2, %v522_v62, %v526_v1  ;;  %v535_v42 = vor.u32 %v534_v18, %v531_v32  ;;  %v550_v43 = vrot.slane %v548_v27, 5  ;;  %v553_v44 = vshrl.u32 %v7463_v16, 16  ;;  %v281_v62 = vld [vmem:[%s7133_s21 + $0x98] sm:$0x1] }
  0x6a   : > { %v5327_v49 = vcombine.low %v517_v8, %v527_v23  ;;  %6364 = vmatmul.mubr.bf16.vlgmr.msra.gmra.mrb[0].mxu0 %v5631_v15  ;;  %v545_v50 = vor.u32 %v544_v30, %v540_v26  ;;  %v2977_v52 = vsel %vm7411_vm5, %v5600_v34, %v2976_v38  ;;  %v2978_v53 = vrot.slane %v2976_v38, 4  ;;  %v6871_v30 = vld [vmem:[%s8947_s1 + $0x198] sm:$0xff]  }
  0x6b   : > { %6396 = vmatpush3.bf16.msra.mxu0 %v7354_v6  ;;  %v536_v51 = vrot.slane %v535_v42, 4  ;;  %v555_v55 = vrot.slane %v553_v44, 4  ;;  %v556_v48 = vshll.u32 %v7463_v16, 16  ;;  %v562_v56 = vshll.u32 %v7471_v40, 16  ;;  %v6869_v6 = vld [vmem:[%s8947_s1 + $0x190] sm:$0xff]  }
  0x6c   : > { %6140 = vmatmul.mubr.bf16.gmra.mrb[16].mxu1 %v5327_v49  ;;  %v546_v57 = vrot.slane %v545_v50, 4  ;;  %v2980_v58 = vsel %vm7411_vm5, %v2978_v53, %v2979_v39  ;;  %v566_v59 = vshrl.u32 %v7471_v40, 16  ;;  %v572_v24 = vshll.u32 %v280_v31, 16  ;;  %6397 = vmatprep.subr.bf16.mxu0 %v6867_v29  ;;  %v5586_v38 = vld [vmem:[%s7133_s21 + $0x3c] sm:$0xe] }
  0x6d   : > { %v541_v61 = vsel %vm7165_vm2, %v536_v51, %v540_v26  ;;  %v5632_v63 = vcombine.low %v2977_v52, %v2980_v58  ;;  %v558_v41 = vrot.slane %v556_v48, 5  ;;  %v564_v1 = vrot.slane %v562_v56, 5  ;;  %v7513_v31 = vld [vmem:[%s7133_s21 + $0x9c] sm:$0xf]  ;;  %v7522_v48 = vld [vmem:[%s7133_s21 + $0xa0] sm:$0xf] }
  0x6e   : > { %v551_v7 = vsel %vm7165_vm2, %v546_v57, %v550_v43  ;;  %v568_v10 = vrot.slane %v566_v59, 4  ;;  %v574_v11 = vrot.slane %v572_v24, 5  ;;  %v5601_v12 = vrot.slane %v5585_v45, 9  ;;  %v6875_v56 = vld [vmem:[%s8947_s1 + $0x1a0] sm:$0xff]  }
  0x6f   : > { %v5328_v13 = vcombine.low %v541_v61, %v551_v7  ;;  %6367 = vmatprep.mubr.bf16.mxu0 %v5632_v63  ;;  %v559_v8 = vor.u32 %v558_v41, %v555_v55  ;;  %v2983_v15 = vrot.slane %v7249_v33, 5  ;;  %v2986_v32 = vrot.slane %v7260_v46, 5  ;;  %6398 = vmatpush3.bf16.msra.mxu0 %v6867_v29  ;;  %v282_v61 = vld [vmem:[%s7133_s21 + $0xa4] sm:$0x1] }
  0x70   : > { %v569_v36 = vor.u32 %v568_v10, %v564_v1  ;;  %v577_v18 = vshrl.u32 %v7492_v2, 16  ;;  %v580_v26 = vshll.u32 %v7492_v2, 16  ;;  %v586_v27 = vshll.u32 %v7495_v3, 16  ;;  %6399 = vmatprep.subr.bf16.mxu0 %v6869_v6 }
  0x71   : > { %6143 = vmatprep.mubr.bf16.mxu1 %v5328_v13  ;;  %v560_v34 = vrot.slane %v559_v8, 4  ;;  %v2984_v33 = vsel %vm7411_vm5, %v5601_v12, %v2983_v15  ;;  %v2985_v46 = vrot.slane %v2983_v15, 4  ;;  %v590_v29 = vshrl.u32 %v7495_v3, 16  ;;  %v5587_v15 = vld [vmem:[%s7133_s21 + $0x48] sm:$0xe] }
  0x72   : > { %v570_v39 = vrot.slane %v569_v36, 4  ;;  %v579_v23 = vrot.slane %v577_v18, 4  ;;  %v582_v42 = vrot.slane %v580_v26, 5  ;;  %v588_v43 = vrot.slane %v586_v27, 5  ;;  %v7547_v27 = vld [vmem:[%s7133_s21 + $0xa8] sm:$0xf] }
  0x73   : > { %v565_v44 = vsel %vm7165_vm2, %v560_v34, %v564_v1  ;;  %v2987_v49 = vsel %vm7411_vm5, %v2985_v46, %v2986_v32  ;;  %v592_v50 = vrot.slane %v590_v29, 4  ;;  %v596_v52 = vshll.u32 %v281_v62, 16  ;;  %6400 = vmatpush3.bf16.msra.mxu0 %v6869_v6  ;;  %v6879_v32 = vld [vmem:[%s8947_s1 + $0x1a8] sm:$0xff]  }
  0x74   : > { %v575_v53 = vsel %vm7165_vm2, %v570_v39, %v574_v11  ;;  %v5633_v45 = vcombine.low %v2984_v33, %v2987_v49  ;;  %v583_v51 = vor.u32 %v582_v42, %v579_v23  ;;  %v5602_v55 = vrot.slane %v5586_v38, 9  ;;  %6401 = vmatprep.subr.bf16.mxu0 %v6871_v30  ;;  %v7550_v29 = vld [vmem:[%s7133_s21 + $0xac] sm:$0xf] }
  0x75   : > { %v5329_v57 = vcombine.low %v565_v44, %v575_v53  ;;  %v593_v58 = vor.u32 %v592_v50, %v588_v43  ;;  %v598_v59 = vrot.slane %v596_v52, 5  ;;  %v2990_v24 = vrot.slane %v7283_v19, 5  ;;  %v5588_v53 = vld [vmem:[%s7133_s21 + $0x54] sm:$0xe] }
  0x76   : > { %6368 = vmatmul.mubr.bf16.gmra.mrb[4].mxu0 %v5633_v45  ;;  %v584_v6 = vrot.slane %v583_v51, 4  ;;  %v2993_v63 = vrot.slane %v7291_v28, 5  ;;  %v601_v41 = vshrl.u32 %v7513_v31, 16  ;;  %v604_v1 = vshll.u32 %v7513_v31, 16  ;;  %v6883_v45 = vld [vmem:[%s8947_s1 + $0x1b0] sm:$0xff]  }
  0x77   : > { %6144 = vmatmul.mubr.bf16.gmra.mrb[20].mxu1 %v5329_v57  ;;  %v594_v7 = vrot.slane %v593_v58, 4  ;;  %v2991_v10 = vsel %vm7411_vm5, %v5602_v55, %v2990_v24  ;;  %v2992_v11 = vrot.slane %v2990_v24, 4  ;;  %v610_v12 = vshll.u32 %v7522_v48, 16  ;;  %6402 = vmatpush3.bf16.msra.mxu0 %v6871_v30 }
  0x78   : > { %v589_v19 = vsel %vm7165_vm2, %v584_v6, %v588_v43  ;;  %v603_v13 = vrot.slane %v601_v41, 4  ;;  %v606_v28 = vrot.slane %v604_v1, 5  ;;  %v614_v8 = vshrl.u32 %v7522_v48, 16  ;;  %6403 = vmatprep.subr.bf16.mxu0 %v6875_v56  ;;  %v283_v43 = vld [vmem:[%s7133_s21 + $0xb0] sm:$0x1] }
  0x79   : > { %v599_v36 = vsel %vm7165_vm2, %v594_v7, %v598_v59  ;;  %v2994_v62 = vsel %vm7411_vm5, %v2992_v11, %v2993_v63  ;;  %v612_v18 = vrot.slane %v610_v12, 5  ;;  %v620_v26 = vshll.u32 %v282_v61, 16  ;;  %v7570_v41 = vld [vmem:[%s7133_s21 + $0xb4] sm:$0xf]  ;;  %v7575_v12 = vld [vmem:[%s7133_s21 + $0xb8] sm:$0xf] }
  0x7a   : > { %v5330_v30 = vcombine.low %v589_v19, %v599_v36  ;;  %v5634_v34 = vcombine.low %v2991_v10, %v2994_v62  ;;  %v607_v33 = vor.u32 %v606_v28, %v603_v13  ;;  %v616_v46 = vrot.slane %v614_v8, 4  ;;  %v284_v19 = vld [vmem:[%s7133_s21 + $0xbc] sm:$0x1] }
  0x7b   : > { %v622_v38 = vrot.slane %v620_v26, 5  ;;  %v5603_v39 = vrot.slane %v5587_v15, 9  ;;  %v2997_v23 = vrot.slane %v7318_v14, 5  ;;  %v3000_v42 = vrot.slane %v7324_v22, 5  ;;  %6404 = vmatpush3.bf16.msra.mxu0 %v6875_v56  ;;  %v6887_v13 = vld [vmem:[%s8947_s1 + $0x1b8] sm:$0xff]  }
  0x7c   : > { %6147 = vmatprep.mubr.bf16.mxu1 %v5330_v30  ;;  %6371 = vmatprep.mubr.bf16.mxu0 %v5634_v34  ;;  %v608_v44 = vrot.slane %v607_v33, 4  ;;  %v617_v49 = vor.u32 %v616_v46, %v612_v18  ;;  %v625_v50 = vshrl.u32 %v7547_v27, 16  ;;  %v628_v52 = vshll.u32 %v7547_v27, 16  ;;  %v5589_v30 = vld [vmem:[%s7133_s21 + $0x60] sm:$0xe] }
  0x7d   : > { %v2998_v14 = vsel %vm7411_vm5, %v5603_v39, %v2997_v23  ;;  %v2999_v22 = vrot.slane %v2997_v23, 4  ;;  %v634_v51 = vshll.u32 %v7550_v29, 16  ;;  %v638_v55 = vshrl.u32 %v7550_v29, 16  ;;  %6405 = vmatprep.subr.bf16.mxu0 %v6879_v32  ;;  %v5519_v39 = vld [vmem:[%s7133_s21 + $0x70] sm:$0xf] }
  0x7e   : > { %v613_v56 = vsel %vm7165_vm2, %v608_v44, %v612_v18  ;;  %v618_v57 = vrot.slane %v617_v49, 4  ;;  %v627_v58 = vrot.slane %v625_v50, 4  ;;  %v630_v59 = vrot.slane %v628_v52, 5  ;;  %v7597_v44 = vld [vmem:[%s8947_s1 + $0x1c0] sm:$0xff]  }
  0x7f   : > { %v3001_v24 = vsel %vm7411_vm5, %v2999_v22, %v3000_v42  ;;  %v636_v61 = vrot.slane %v634_v51, 5  ;;  %v640_v6 = vrot.slane %v638_v55, 4  ;;  %v644_v63 = vshll.u32 %v283_v43, 16  ;;  %6406 = vmatpush3.bf16.msra.mxu0 %v6879_v32  ;;  %v5590_v43 = vld [vmem:[%s7133_s21 + $0x6c] sm:$0xe] }
  0x80   : > { %v623_v1 = vsel %vm7165_vm2, %v618_v57, %v622_v38  ;;  %v5635_v7 = vcombine.low %v2998_v14, %v3001_v24  ;;  %v631_v10 = vor.u32 %v630_v59, %v627_v58  ;;  %v5604_v11 = vrot.slane %v5588_v53, 9  ;;  %6407 = vmatprep.subr.bf16.mxu0 %v6883_v45  ;;  %v5520_v55 = vld [vmem:[%s7133_s21 + $0x74] sm:$0x1]  ;;  %v5591_v24 = vld [vmem:[%s7133_s21 + $0x78] sm:$0xe] }
  0x81   : > { %v5331_v28 = vcombine.low %v613_v56, %v623_v1  ;;  %v641_v8 = vor.u32 %v640_v6, %v636_v61  ;;  %v646_v15 = vrot.slane %v644_v63, 5  ;;  %v3004_v32 = vrot.slane %v7349_v0, 5 }
  0x82   : > { %6372 = vmatmul.mubr.bf16.gmra.mrb[8].mxu0 %v5635_v7  ;;  %v632_v36 = vrot.slane %v631_v10, 4  ;;  %v3007_v62 = vrot.slane %v7361_v20, 5  ;;  %v649_v18 = vshrl.u32 %v7570_v41, 16  ;;  %v652_v26 = vshll.u32 %v7570_v41, 16 }
  0x83   : > { %6148 = vmatmul.mubr.bf16.gmra.mrb[24].mxu1 %v5331_v28  ;;  %v642_v34 = vrot.slane %v641_v8, 4  ;;  %v3005_v33 = vsel %vm7411_vm5, %v5604_v11, %v3004_v32  ;;  %v3006_v46 = vrot.slane %v3004_v32, 4  ;;  %v658_v38 = vshll.u32 %v7575_v12, 16  ;;  %6408 = vmatpush3.bf16.msra.mxu0 %v6883_v45  ;;  %v7610_v11 = vld [vmem:[%s7133_s21 + $0x7c] sm:$0xf] }
  0x84   : > { %v637_v0 = vsel %vm7165_vm2, %v632_v36, %v636_v61  ;;  %v651_v20 = vrot.slane %v649_v18, 4  ;;  %v654_v23 = vrot.slane %v652_v26, 5  ;;  %v662_v42 = vshrl.u32 %v7575_v12, 16  ;;  %6409 = vmatprep.subr.bf16.mxu0 %v6887_v13  ;;  %v6956_v36 = vld [vmem:[%s7133_s21] sm:$0xf] }
  0x85   : > { %v647_v49 = vsel %vm7165_vm2, %v642_v34, %v646_v15  ;;  %v3008_v50 = vsel %vm7411_vm5, %v3006_v46, %v3007_v62  ;;  %v660_v52 = vrot.slane %v658_v38, 5  ;;  %v668_v53 = vshll.u32 %v284_v19, 16  ;;  %v5525_v15 = vld [vmem:[%s7133_s21 + $0x88] sm:$0xf]  ;;  %v7625_v62 = vld [vmem:[%s7133_s21 + $0x4] sm:$0xf] }
  0x86   : > { %v5332_v45 = vcombine.low %v637_v0, %v647_v49  ;;  %v5636_v14 = vcombine.low %v3005_v33, %v3008_v50  ;;  %v655_v22 = vor.u32 %v654_v23, %v651_v20  ;;  %v664_v51 = vrot.slane %v662_v42, 4  ;;  %v5526_v26 = vld [vmem:[%s7133_s21 + $0x8c] sm:$0x1]  ;;  %v5529_v23 = vld [vmem:[%s7133_s21 + $0x98] sm:$0x1] }
  0x87   : > { %v670_v56 = vrot.slane %v668_v53, 5  ;;  %v5605_v57 = vrot.slane %v5589_v30, 9  ;;  %v3011_v58 = vrot.slane %v7376_v60, 5  ;;  %v3014_v59 = vrot.slane %v7385_v17, 5  ;;  %6410 = vmatpush3.bf16.msra.mxu0 %v6887_v13  ;;  %v7613_v17 = vld [vmem:[%s7133_s21 + $0x80] sm:$0x1] }
  0x88   : > { %6151 = vmatprep.mubr.bf16.mxu1 %v5332_v45  ;;  %6375 = vmatprep.mubr.bf16.mxu0 %v5636_v14  ;;  %v656_v61 = vrot.slane %v655_v22, 4  ;;  %v665_v6 = vor.u32 %v664_v51, %v660_v52  ;;  %v5606_v63 = vrot.slane %v5590_v43, 9  ;;  %v3018_v1 = vrot.slane %v5519_v39, 5  ;;  %v5592_v30 = vld [vmem:[%s7133_s21 + $0x84] sm:$0xe] }
  0x89   : > { %v3012_v7 = vsel %vm7411_vm5, %v5605_v57, %v3011_v58  ;;  %v3013_v10 = vrot.slane %v3011_v58, 4  ;;  %v3021_v60 = vrot.slane %v5520_v55, 5  ;;  %6443 = vmatprep.subr.bf16.mxu0 %v7597_v44  ;;  %v5342_v18 = vcombine.low %v6956_v36, %v7625_v62  ;;  %v5528_v39 = vld [vmem:[%s7133_s21 + $0x94] sm:$0xf]  ;;  %v5593_v42 = vld [vmem:[%s7133_s21 + $0x90] sm:$0xe] }
  0x8a   : > { %v661_v19 = vsel %vm7165_vm2, %v656_v61, %v660_v52  ;;  %v666_v13 = vrot.slane %v665_v6, 4  ;;  %v3019_v28 = vsel %vm7411_vm5, %v5606_v63, %v3018_v1  ;;  %v3020_v8 = vrot.slane %v3018_v1, 4  ;;  %v5594_v50 = vld [vmem:[%s7133_s21 + $0x9c] sm:$0xe]  ;;  %v5531_v14 = vld [vmem:[%s7133_s21 + $0xa0] sm:$0xf] }
  0x8b   : > { %v3015_v32 = vsel %vm7411_vm5, %v3013_v10, %v3014_v59  ;;  %v5607_v38 = vrot.slane %v5591_v24, 9  ;;  %v3025_v43 = vrot.slane %v7610_v11, 5  ;;  %v3028_v49 = vrot.slane %v7613_v17, 5  ;;  %v5532_v22 = vld [vmem:[%s7133_s21 + $0xa4] sm:$0x1] }
  0x8c   : > { %v671_v34 = vsel %vm7165_vm2, %v666_v13, %v670_v56  ;;  %v5637_v33 = vcombine.low %v3012_v7, %v3015_v32  ;;  %v3022_v46 = vsel %vm7411_vm5, %v3020_v8, %v3021_v60  ;;  %v5608_v52 = vrot.slane %v5592_v30, 9  ;;  %v5534_v59 = vld [vmem:[%s7133_s21 + $0xac] sm:$0xf]  ;;  %v7649_v61 = vld [vmem:[%s7133_s21 + $0x10] sm:$0xf] }
  0x8d   : > { %v5333_v0 = vcombine.low %v661_v19, %v671_v34  ;;  %v5638_v20 = vcombine.low %v3019_v28, %v3022_v46  ;;  %v3032_v53 = vrot.slane %v5525_v15, 5  ;;  %v3035_v45 = vrot.slane %v5526_v26, 5  ;;  %v6958_v24 = vld [vmem:[%s7133_s21 + $0xc] sm:$0xf]  ;;  %v6960_v8 = vld [vmem:[%s7133_s21 + $0x18] sm:$0xf] }
  0x8e   : > { %6376 = vmatmul.mubr.bf16.gmra.mrb[12].mxu0 %v5637_v33  ;;  %v3026_v51 = vsel %vm7411_vm5, %v5607_v38, %v3025_v43  ;;  %v3027_v55 = vrot.slane %v3025_v43, 4  ;;  %v3039_v58 = vrot.slane %v5528_v39, 5  ;;  %v5343_v6 = vcombine.low %v6958_v24, %v7649_v61  ;;  %v6878_v19 = vld [vmem:[%s8947_s1 + $0x88] sm:$0xff]   ;;  %v7661_v15 = vld [vmem:[%s7133_s21 + $0x1c] sm:$0xf] }
  0x8f   : > { %6152 = vmatmul.mubr.bf16.gmra.mrb[28].mxu1 %v5333_v0  ;;  %6379 = vmatprep.mubr.bf16.mxu0 %v5638_v20  ;;  %v3033_v56 = vsel %vm7411_vm5, %v5608_v52, %v3032_v53  ;;  %v3034_v57 = vrot.slane %v3032_v53, 4  ;;  %v5609_v1 = vrot.slane %v5593_v42, 9  ;;  %v3042_v7 = vrot.slane %v5529_v23, 5  ;;  %v5535_v30 = vld [vmem:[%s7133_s21 + $0xb0] sm:$0x1] }
  0x90   : > { %6171 = vmatprep.mubr.bf16.mxu1 %v5342_v18  ;;  %v3029_v63 = vsel %vm7411_vm5, %v3027_v55, %v3028_v49  ;;  %v3041_v13 = vrot.slane %v3039_v58, 4  ;;  %v5610_v28 = vrot.slane %v5594_v50, 9  ;;  %v5344_v32 = vcombine.low %v6960_v8, %v7661_v15  ;;  %v5595_v34 = vld [vmem:[%s7133_s21 + $0xa8] sm:$0xe]  ;;  %v5537_v33 = vld [vmem:[%s7133_s21 + $0xb8] sm:$0xf] }
  0x91   : > { %v5639_v10 = vcombine.low %v3026_v51, %v3029_v63  ;;  %v3036_v60 = vsel %vm7411_vm5, %v3034_v57, %v3035_v45  ;;  %v3046_v18 = vrot.slane %v5531_v14, 5  ;;  %v3049_v26 = vrot.slane %v5532_v22, 5  ;;  %v5538_v20 = vld [vmem:[%s7133_s21 + $0xbc] sm:$0x1]  ;;  %v5596_v23 = vld [vmem:[%s7133_s21 + $0xb4] sm:$0xe] }
  0x92   : > { %v5640_v36 = vcombine.low %v3033_v56, %v3036_v60  ;;  %v3053_v38 = vrot.slane %v5534_v59, 5  ;;  %v3040_v39 = vsel %vm7411_vm5, %v5609_v1, %v3039_v58  ;;  %v3043_v0 = vsel %vm7411_vm5, %v3041_v13, %v3042_v7  ;;  %v6882_v50 = vld [vmem:[%s8947_s1 + $0x90] sm:$0xff]   ;;  %v5540_v53 = vld [vmem:[%s7133_s21 + $0xc4] sm:$0xf]  ;;  %v7684_v51 = vld [vmem:[%s7133_s21 + $0x28] sm:$0xf] }
  0x93   : > { %v3048_v46 = vrot.slane %v3046_v18, 4  ;;  %v3047_v42 = vsel %vm7411_vm5, %v5610_v28, %v3046_v18  ;;  %v3060_v49 = vrot.slane %v5537_v33, 5  ;;  %v5611_v52 = vrot.slane %v5595_v34, 9  ;;  %v6962_v22 = vld [vmem:[%s7133_s21 + $0x24] sm:$0xf]  ;;  %v6886_v1 = vld [vmem:[%s8947_s1 + $0x98] sm:$0xff]  }
  0x94   : > { %v5641_v45 = vcombine.low %v3040_v39, %v3043_v0  ;;  %v3055_v14 = vrot.slane %v3053_v38, 4  ;;  %v5345_v55 = vcombine.low %v6962_v22, %v7684_v51  ;;  %v6964_v57 = vld [vmem:[%s7133_s21 + $0x30] sm:$0xf]  ;;  %v7689_v58 = vld [vmem:[%s7133_s21 + $0x34] sm:$0xf]  ;;  %v5612_v24 = vrot.slane %v5596_v23, 9 }
  0x95   : > { %v3050_v43 = vsel %vm7411_vm5, %v3048_v46, %v3049_v26  ;;  %v5346_v59 = vcombine.low %v6964_v57, %v7689_v58  ;;  %v3063_v63 = vrot.slane %v5538_v20, 5  ;;  %v5597_v7 = vld [vmem:[%s7133_s21 + $0xc0] sm:$0xe]  ;;  %v3054_v60 = vsel %vm7411_vm5, %v5611_v52, %v3053_v38  ;;  %v5541_v8 = vld [vmem:[%s7133_s21 + $0xc8] sm:$0x1]  ;;  %v6889_v22 = vld [vmem:[%s7133_s21 + $0x18] sm:$0xff]  }
  0x96   : > { %6380 = vmatmul.mubr.bf16.gmra.mrb[16].mxu0 %v5639_v10  ;;  %v5642_v56 = vcombine.low %v3047_v42, %v3050_v43  ;;  %v3067_v10 = vrot.slane %v5540_v53, 5  ;;  %v3061_v13 = vsel %vm7411_vm5, %v5612_v24, %v3060_v49  ;;  %v5613_v18 = vrot.slane %v5597_v7, 9  ;;  %v6966_v26 = vld [vmem:[%s7133_s21 + $0x3c] sm:$0xf]  ;;  %v6968_v39 = vld [vmem:[%s7133_s21 + $0x48] sm:$0xf] }
  0x97   : > { %6172 = vmatmul.mubr.bf16.vlgmr.msra.gmra.mrb[0].mxu1 %v5343_v6  ;;  %6383 = vmatprep.mubr.bf16.mxu0 %v5640_v36  ;;  %v3062_v6 = vrot.slane %v3060_v49, 4  ;;  %v3070_v38 = vrot.slane %v5541_v8, 5  ;;  %v7715_v0 = vld [vmem:[%s7133_s21 + $0x4c] sm:$0xf]  ;;  %v6903_v49 = vld [vmem:[%s8947_s1 + $0xb0] sm:$0xff]   ;;  %v2420_v52 = vshrl.u32 %v7610_v11, 16 }
  0x98   : > { %6204 = vmatpush3.bf16.msra.mxu1 %v7335_v4  ;;  %6175 = vmatprep.mubr.bf16.mxu1 %v5344_v32  ;;  %v3056_v4 = vrot.slane %v5535_v30, 5  ;;  %v6891_v32 = vld [vmem:[%s8947_s1 + $0xa0] sm:$0xff]   ;;  %v3069_v46 = vrot.slane %v3067_v10, 4  ;;  %v5348_v20 = vcombine.low %v6968_v39, %v7715_v0  ;;  %v6897_v23 = vld [vmem:[%s8947_s1 + $0xa8] sm:$0xff]   ;;  %v3068_v42 = vsel %vm7411_vm5, %v5613_v18, %v3067_v10  ;;  %v6895_v18 = vld [vmem:[%s7133_s21 + $0x30] sm:$0xff]  }
  0x99   : > { %6205 = vmatprep.subr.bf16.mxu1 %v6878_v19  ;;  %v3064_v28 = vsel %vm7411_vm5, %v3062_v6, %v3063_v63  ;;  %v7710_v30 = vld [vmem:[%s7133_s21 + $0x40] sm:$0xf]  ;;  %v7743_v57 = vrot.slane %v2420_v52, 4  ;;  %v6892_v6 = vld [vmem:[%s7133_s21 + $0x24] sm:$0xff]   ;;  %v1327_v7 = vrot.slane %v7649_v61, 5  ;;  %v2426_v8 = vshll.u32 %v7613_v17, 16 }
  0x9a   : > { %v5347_v34 = vcombine.low %v6966_v26, %v7710_v30  ;;  %v5644_v33 = vcombine.low %v3061_v13, %v3064_v28  ;;  %v3071_v43 = vsel %vm7411_vm5, %v3069_v46, %v3070_v38  ;;  %v1267_v63 = vld [vmem:[%s7133_s21] sm:$0xe]  ;;  %v1268_v10 = vld [vmem:[%s7133_s21 + $0xc] sm:$0xe]  ;;  %v1334_v13 = vrot.slane %v7661_v15, 5 }
  0x9b   : > { %v5645_v53 = vcombine.low %v3068_v42, %v3071_v43  ;;  %v1270_v61 = vld [vmem:[%s7133_s21 + $0x24] sm:$0xe]  ;;  %v5353_v15 = vcombine.low %v7463_v16, %v7471_v40  ;;  %v5354_v26 = vcombine.low %v7492_v2, %v7495_v3  ;;  %v5366_v17 = vrot.slane %v1267_v63, 9  ;;  %v6974_v38 = vld [vmem:[%s7133_s21 + $0x20] sm:$0x1]  ;;  %v6904_v2 = vld [vmem:[%s7133_s21 + $0x54] sm:$0xff]  }
  0x9c   : > { %6206 = vmatpush3.bf16.msra.mxu1 %v6878_v19  ;;  %v3057_v19 = vsel %vm7411_vm5, %v3055_v14, %v3056_v4  ;;  %v7732_v14 = vld [vmem:[%s7133_s21 + $0x58] sm:$0xf]  ;;  %v1336_v46 = vrot.slane %v1334_v13, 4  ;;  %v1337_v39 = vrot.slane %v6974_v38, 5  ;;  %v6975_v43 = vld [vmem:[%s7133_s21 + $0x2c] sm:$0x1] }
  0x9d   : > { %6207 = vmatprep.subr.bf16.mxu1 %v6882_v50  ;;  %v5643_v36 = vcombine.low %v3054_v60, %v3057_v19  ;;  %v7758_v60 = vld [vmem:[%s8947_s1 + $0xc0] sm:$0xff]   ;;  %v1269_v19 = vld [vmem:[%s7133_s21 + $0x18] sm:$0xe]  ;;  %v6978_v38 = vld [vmem:[%s7133_s21 + $0x50] sm:$0x1]  ;;  %v1369_v16 = vrot.slane %v7732_v14, 5 }
  0x9e   : > { %6384 = vmatmul.mubr.bf16.gmra.mrb[20].mxu0 %v5641_v45  ;;  %v6970_v45 = vld [vmem:[%s7133_s21 + $0x54] sm:$0xf]  ;;  %v7881_v40 = vld [vmem:[%s7133_s21 + $0x64] sm:$0xf] }
  0x9f   : > { %6176 = vmatmul.mubr.bf16.gmra.mrb[4].mxu1 %v5345_v55  ;;  %6387 = vmatprep.mubr.bf16.mxu0 %v5642_v56  ;;  %v5349_v4 = vcombine.low %v6970_v45, %v7732_v14  ;;  %v5350_v55 = vcombine.low %v7389_v25, %v7392_v35  ;;  %v6909_v56 = vld [vmem:[%s8947_s1 + $0xb8] sm:$0xff]   ;;  %v6973_v25 = vld [vmem:[%s7133_s21 + $0x14] sm:$0x1]  ;;  %v6907_v3 = vld [vmem:[%s7133_s21 + $0x60] sm:$0xff]  }
  0xa0   : > { %6179 = vmatprep.mubr.bf16.mxu1 %v5346_v59  ;;  %6208 = vmatpush3.bf16.msra.mxu1 %v6882_v50  ;;  %v2416_v50 = vshll.u32 %v7610_v11, 16  ;;  %v7746_v59 = vld [vmem:[%s7133_s21 + $0x8] sm:$0x1]  ;;  %v1330_v35 = vrot.slane %v6973_v25, 5 }
  0xa1   : > { %6209 = vmatprep.subr.bf16.mxu1 %v6886_v1  ;;  %v1323_v24 = vrot.slane %v7746_v59, 5 }
  0xa2   : > { %v7741_v11 = vrot.slane %v2416_v50, 5 }
  0xa4   : > { %6210 = vmatpush3.bf16.msra.mxu1 %v6886_v1  ;;  %v1320_v1 = vrot.slane %v7625_v62, 5  ;;  %v5351_v62 = vcombine.low %v7407_v5, %v7419_v21  ;;  %v5367_v21 = vrot.slane %v1268_v10, 9  ;;  %v5726_v10 = vld [vmem:[%s7133_s21 + $0x18] sm:$0xf] }
  0xa5   : > { %6211 = vmatprep.subr.bf16.mxu1 %v6891_v32 }
  0xa6   : > { %6388 = vmatmul.mubr.bf16.gmra.mrb[24].mxu0 %v5643_v36  ;;  %v5352_v36 = vcombine.low %v7430_v47, %v7441_v54  ;;  %v1322_v5 = vrot.slane %v1320_v1, 4  ;;  %v6899_v47 = vld [vmem:[%s8947_s1 + $0x1c8] sm:$0xff]   ;;  %v5368_v54 = vrot.slane %v1269_v19, 9  ;;  %v7801_v59 = vsel %vm7411_vm5, %v5366_v17, %v1320_v1  ;;  %v5727_v19 = vld [vmem:[%s7133_s21 + $0x1c] sm:$0xf] }
  0xa7   : > { %6180 = vmatmul.mubr.bf16.gmra.mrb[8].mxu1 %v5347_v34  ;;  %6391 = vmatprep.mubr.bf16.mxu0 %v5644_v33  ;;  %v1348_v34 = vrot.slane %v7689_v58, 5  ;;  %v1329_v33 = vrot.slane %v1327_v7, 4  ;;  %v5369_v58 = vrot.slane %v1270_v61, 9  ;;  %v1362_v1 = vrot.slane %v7715_v0, 5  ;;  %v6901_v0 = vld [vmem:[%s7133_s21 + $0x48] sm:$0xff]  }
  0xa8   : > { %6183 = vmatprep.mubr.bf16.mxu1 %v5348_v20  ;;  %6212 = vmatpush3.bf16.msra.mxu1 %v6891_v32  ;;  %v1341_v32 = vrot.slane %v7684_v51, 5  ;;  %v1271_v51 = vld [vmem:[%s7133_s21 + $0x30] sm:$0xe]  ;;  %v5355_v20 = vcombine.low %v7513_v31, %v7522_v48  ;;  %v7809_v25 = vsel %vm7411_vm5, %v1322_v5, %v1323_v24  ;;  %v7817_v63 = vsel %vm7411_vm5, %v5368_v54, %v1334_v13  ;;  %v1273_v13 = vld [vmem:[%s7133_s21 + $0x48] sm:$0xe] }
  0xa9   : > { %6213 = vmatprep.subr.bf16.mxu1 %v6897_v23  ;;  %v5370_v50 = vrot.slane %v1271_v51, 9  ;;  %v1350_v52 = vrot.slane %v1348_v34, 4  ;;  %v3833_v5 = vshrl.u32 %v5726_v10, 16  ;;  %v3846_v51 = vshrl.u32 %v5727_v19, 16  ;;  %v6910_v48 = vld [vmem:[%s7133_s21 + $0x6c] sm:$0xff]  }
  0xaa   : > { %v1343_v42 = vrot.slane %v1341_v32, 4  ;;  %v7829_v24 = vsel %vm7411_vm5, %v5369_v58, %v1341_v32  ;;  %v6977_v32 = vld [vmem:[%s7133_s21 + $0x44] sm:$0x1]  ;;  %v5372_v54 = vrot.slane %v1273_v13, 9  ;;  %v5730_v13 = vld [vmem:[%s7133_s21 + $0x28] sm:$0xf] }
  0xab   : > { %v7839_v61 = vsel %vm7411_vm5, %v5370_v50, %v1348_v34  ;;  %v1358_v17 = vrot.slane %v6977_v32, 5  ;;  %v5728_v50 = vld [vmem:[%s7133_s21 + $0x20] sm:$0x1]  ;;  %v1275_v32 = vld [vmem:[%s7133_s21 + $0x60] sm:$0xe] }
  0xac   : > { %6214 = vmatpush3.bf16.msra.mxu1 %v6897_v23  ;;  %v5356_v23 = vcombine.low %v7547_v27, %v7550_v29 }
  0xad   : > { %6215 = vmatprep.subr.bf16.mxu1 %v6903_v49 }
  0xae   : > { %6392 = vmatmul.mubr.bf16.gmra.mrb[28].mxu0 %v5645_v53  ;;  %v6976_v53 = vld [vmem:[%s7133_s21 + $0x38] sm:$0x1] }
  0xaf   : > { %6184 = vmatmul.mubr.bf16.gmra.mrb[12].mxu1 %v5349_v4  ;;  %6411 = vmatprep.mubr.bf16.mxu0 %v6889_v22  ;;  %v1351_v45 = vrot.slane %v6976_v53, 5  ;;  %v1272_v4 = vld [vmem:[%s7133_s21 + $0x3c] sm:$0xe]  ;;  %v1355_v22 = vrot.slane %v7710_v30, 5  ;;  %v7805_v30 = vsel %vm7411_vm5, %v5367_v21, %v1327_v7  ;;  %v3836_v21 = vshll.u32 %v5726_v10, 16  ;;  %v6915_v53 = vld [vmem:[%s8947_s1 + $0x1e0] sm:$0xff]  }
  0xb0   : > { %6187 = vmatprep.mubr.bf16.mxu1 %v5350_v55  ;;  %6216 = vmatpush3.bf16.msra.mxu1 %v6903_v49  ;;  %v1344_v49 = vrot.slane %v6975_v43, 5  ;;  %v7792_v55 = vrot.slane %v2426_v8, 5  ;;  %v6898_v7 = vld [vmem:[%s7133_s21 + $0x3c] sm:$0xff]   ;;  %v7825_v8 = vsel %vm7411_vm5, %v1336_v46, %v1337_v39  ;;  %v1364_v46 = vrot.slane %v1362_v1, 4  ;;  %v5732_v43 = vld [vmem:[%s7133_s21 + $0x30] sm:$0xf] }
  0xb1   : > { %6217 = vmatprep.subr.bf16.mxu1 %v6909_v56  ;;  %v1365_v39 = vrot.slane %v6978_v38, 5  ;;  %v3835_v10 = vrot.slane %v3833_v5, 4 }
  0xb2   : > { %8969 = vst [vmem:[#allocation2_spill] sm:$0xff] %v7792_v55 }
  0xb4   : > { %6218 = vmatpush3.bf16.msra.mxu1 %v6909_v56  ;;  %v6905_v56 = vld [vmem:[%s8947_s1 + $0x1d0] sm:$0xff]  }
  0xb5   : > { %6251 = vmatprep.subr.bf16.mxu1 %v7758_v60 }
  0xb6   : > { %6412 = vmatmul.mubr.bf16.vlgmr.msra.gmra.mrb[0].mxu0 %v6892_v6  ;;  %v7813_v6 = vsel %vm7411_vm5, %v1329_v33, %v1330_v35  ;;  %v7833_v35 = vsel %vm7411_vm5, %v1343_v42, %v1344_v49  ;;  %v3842_v33 = vshll.u32 %v5727_v19, 16  ;;  %v3838_v19 = vrot.slane %v3836_v21, 5  ;;  %v1276_v21 = vld [vmem:[%s7133_s21 + $0x6c] sm:$0xe] }
  0xb7   : > { %6188 = vmatmul.mubr.bf16.gmra.mrb[16].mxu1 %v5351_v62  ;;  %6444 = vmatpush3.bf16.msra.mxu0 %v7597_v44  ;;  %v5371_v62 = vrot.slane %v1272_v4, 9  ;;  %v5375_v58 = vrot.slane %v1276_v21, 9 }
  0xb8   : > { %6191 = vmatprep.mubr.bf16.mxu1 %v5352_v36  ;;  %6415 = vmatprep.mubr.bf16.mxu0 %v6895_v18  ;;  %v7843_v36 = vsel %vm7411_vm5, %v1350_v52, %v1351_v45  ;;  %v1357_v18 = vrot.slane %v1355_v22, 4  ;;  %v5729_v52 = vld [vmem:[%s7133_s21 + $0x24] sm:$0xf]  ;;  %v3870_v45 = vshrl.u32 %v5730_v13, 16 }
  0xb9   : > { %6445 = vmatprep.subr.bf16.mxu0 %v6899_v47  ;;  %v7860_v49 = vsel %vm7411_vm5, %v5371_v62, %v1355_v22  ;;  %v7877_v22 = vld [vmem:[%s7133_s21 + $0x54] sm:$0xe]  ;;  %v3848_v62 = vrot.slane %v3846_v51, 4  ;;  %v3857_v38 = vshrl.u32 %v5729_v52, 16  ;;  %v3860_v28 = vshll.u32 %v5729_v52, 16 }
  0xba   : > { %v7874_v4 = vsel %vm7411_vm5, %v1357_v18, %v1358_v17  ;;  %v3852_v17 = vshll.u32 %v5728_v50, 16  ;;  %v5373_v5 = vrot.slane %v7877_v22, 9  ;;  %v6919_v50 = vld [vmem:[%s8947_s1 + $0x1e8] sm:$0xff]   ;;  %v1371_v52 = vrot.slane %v1369_v16, 4 }
  0xbb   : > { %6446 = vmatpush3.bf16.msra.mxu0 %v6899_v47  ;;  %v6911_v47 = vld [vmem:[%s8947_s1 + $0x1d8] sm:$0xff]   ;;  %v3839_v22 = vor.u32 %v3838_v19, %v3835_v10  ;;  %v3859_v34 = vrot.slane %v3857_v38, 4  ;;  %v3862_v44 = vrot.slane %v3860_v28, 5  ;;  %v6983_v10 = vld [vmem:[%s7133_s21 + $0x74] sm:$0x1]  ;;  %v3872_v28 = vrot.slane %v3870_v45, 4 }
  0xbc   : > { %6447 = vmatprep.subr.bf16.mxu0 %v6905_v56  ;;  %v7915_v42 = vrot.slane %v3852_v17, 5  ;;  %v1386_v19 = vrot.slane %v6983_v10, 5  ;;  %v3881_v38 = vshrl.u32 %v5732_v43, 16  ;;  %v7940_v27 = vsel %vm7411_vm5, %v5373_v5, %v1369_v16 }
  0xbd   : > { %v3840_v21 = vrot.slane %v3839_v22, 4 }
  0xbe   : > { %6416 = vmatmul.mubr.bf16.gmra.mrb[4].mxu0 %v6898_v7  ;;  %v7887_v7 = vrot.slane %v3842_v33, 5  ;;  %v6981_v33 = vld [vmem:[%s7133_s21 + $0x70] sm:$0xf] }
  0xbf   : > { %6192 = vmatmul.mubr.bf16.gmra.mrb[20].mxu1 %v5353_v15  ;;  %6419 = vmatprep.mubr.bf16.mxu0 %v6901_v0  ;;  %v1376_v15 = vrot.slane %v7881_v40, 5  ;;  %v6980_v0 = vld [vmem:[%s7133_s21 + $0x5c] sm:$0x1]  ;;  %v1383_v51 = vrot.slane %v6981_v33, 5 }
  0xc0   : > { %6195 = vmatprep.mubr.bf16.mxu1 %v5354_v26  ;;  %6448 = vmatpush3.bf16.msra.mxu0 %v6905_v56  ;;  %v1372_v18 = vrot.slane %v6980_v0, 5  ;;  %v7896_v26 = vsel %vm7411_vm5, %v5372_v54, %v1362_v1  ;;  %v7900_v56 = vsel %vm7411_vm5, %v1364_v46, %v1365_v39  ;;  %v6982_v1 = vld [vmem:[%s7133_s21 + $0x68] sm:$0x1]  ;;  %v3866_v0 = vshll.u32 %v5730_v13, 16  ;;  %v6927_v40 = vld [vmem:[%s8947_s1 + $0x1f8] sm:$0xff]  }
  0xc1   : > { %6449 = vmatprep.subr.bf16.mxu0 %v6911_v47  ;;  %v1379_v54 = vrot.slane %v6982_v1, 5  ;;  %v5374_v46 = vrot.slane %v1275_v32, 9  ;;  %v1378_v39 = vrot.slane %v1376_v15, 4  ;;  %v3849_v33 = vor.u32 %v3848_v62, %v7887_v7  ;;  %v5733_v1 = vld [vmem:[%s7133_s21 + $0x34] sm:$0xf] }
  0xc2   : > { %v1385_v32 = vrot.slane %v1383_v51, 4  ;;  %v5731_v62 = vld [vmem:[%s7133_s21 + $0x2c] sm:$0x1]  ;;  %v7927_v17 = vrot.slane %v3866_v0, 5  ;;  %v3890_v13 = vshll.u32 %v5733_v1, 16  ;;  %v3894_v31 = vshrl.u32 %v5733_v1, 16 }
  0xc3   : > { %v3850_v10 = vrot.slane %v3849_v33, 4  ;;  %v7944_v29 = vsel %vm7411_vm5, %v1371_v52, %v1372_v18  ;;  %v7951_v45 = vsel %vm7411_vm5, %v5374_v46, %v1376_v15  ;;  %v7955_v14 = vsel %vm7411_vm5, %v1378_v39, %v1379_v54  ;;  %v1277_v18 = vld [vmem:[%s7133_s21 + $0x78] sm:$0xe] }
  0xc4   : > { %6450 = vmatpush3.bf16.msra.mxu0 %v6911_v47  ;;  %v7959_v16 = vsel %vm7411_vm5, %v5375_v58, %v1383_v51  ;;  %v7969_v15 = vsel %vm7411_vm5, %v1385_v32, %v1386_v19  ;;  %v3873_v5 = vor.u32 %v3872_v28, %v7927_v17  ;;  %v3883_v52 = vrot.slane %v3881_v38, 4  ;;  %v5735_v58 = vld [vmem:[%s7133_s21 + $0x3c] sm:$0xf]  ;;  %v5736_v51 = vld [vmem:[%s7133_s21 + $0x40] sm:$0xf] }
  0xc5   : > { %6451 = vmatprep.subr.bf16.mxu0 %v6915_v53  ;;  %v3845_v0 = vsel %vm7165_vm2, %v3840_v21, %v7887_v7  ;;  %v3855_v46 = vsel %vm7165_vm2, %v3850_v10, %v7915_v42  ;;  %v7980_v39 = vrot.slane %v3890_v13, 5  ;;  %v3896_v22 = vrot.slane %v3894_v31, 4  ;;  %v6985_v19 = vld [vmem:[%s7133_s21 + $0x80] sm:$0x1]  ;;  %v8139_v47 = vld [vmem:[%s7133_s21 + $0x68] sm:$0x1] }
  0xc6   : > { %6420 = vmatmul.mubr.bf16.gmra.mrb[8].mxu0 %v6904_v2  ;;  %v3884_v2 = vshll.u32 %v5732_v43, 16  ;;  %v3876_v43 = vshll.u32 %v5731_v62, 16  ;;  %v5376_v32 = vrot.slane %v1277_v18, 9  ;;  %v1278_v62 = vld [vmem:[%s7133_s21 + $0x84] sm:$0xe]  ;;  %v3905_v28 = vshrl.u32 %v5735_v58, 16 }
  0xc7   : > { %6196 = vmatmul.mubr.bf16.gmra.mrb[24].mxu1 %v5355_v20  ;;  %6423 = vmatprep.mubr.bf16.mxu0 %v6907_v3  ;;  %v6923_v20 = vld [vmem:[%s8947_s1 + $0x1f0] sm:$0xff]   ;;  %v6984_v3 = vld [vmem:[%s7133_s21 + $0x7c] sm:$0xf]  ;;  %v3908_v7 = vshll.u32 %v5735_v58, 16  ;;  %v3914_v38 = vshll.u32 %v5736_v51, 16  ;;  %v8970_v42 = vcombine.low %v7570_v41, %v7575_v12  ;;  %v7991_v13 = vrot.slane %v3873_v5, 4 }
  0xc8   : > { %6199 = vmatprep.mubr.bf16.mxu1 %v5356_v23  ;;  %6452 = vmatpush3.bf16.msra.mxu0 %v6915_v53  ;;  %v3863_v23 = vor.u32 %v3862_v44, %v3859_v34  ;;  %v6912_v53 = vld [vmem:[%s7133_s21 + $0x78] sm:$0xff]   ;;  %v1390_v44 = vrot.slane %v6984_v3, 5  ;;  %v3886_v54 = vrot.slane %v3884_v2, 5  ;;  %v7984_v1 = vrot.slane %v3876_v43, 5  ;;  %v7996_v21 = vld [vmem:[%s8947_s1 + $0x200] sm:$0xff]   ;;  %8978 = vst [vmem:[#allocation5_spill] sm:$0xff] %v8139_v47 }
  0xc9   : > { %6453 = vmatprep.subr.bf16.mxu0 %v6919_v50  ;;  %v5734_v34 = vld [vmem:[%s7133_s21 + $0x38] sm:$0x1]  ;;  %v3918_v2 = vshrl.u32 %v5736_v51, 16  ;;  %v6914_v43 = vld [vmem:[%s7133_s21 + $0x84] sm:$0xff]   ;;  %v3897_v12 = vor.u32 %v3896_v22, %v7980_v39  ;;  %v3910_v58 = vrot.slane %v3908_v7, 5  ;;  %v8018_v51 = vrot.slane %v3914_v38, 5 }
  0xca   : > { %v7982_v33 = vrot.slane %v3863_v23, 4  ;;  %v1392_v10 = vrot.slane %v1390_v44, 4  ;;  %v3887_v31 = vor.u32 %v3886_v54, %v3883_v52  ;;  %v8971_v23 = vcombine.low %v7801_v59, %v7809_v25  ;;  %v6986_v18 = vld [vmem:[%s7133_s21 + $0x88] sm:$0xf]  ;;  %v5737_v5 = vld [vmem:[%s7133_s21 + $0x44] sm:$0x1] }
  0xcb   : > { %v1397_v3 = vrot.slane %v6986_v18, 5  ;;  %v8009_v59 = vcombine.low %v3845_v0, %v3855_v46  ;;  %v5738_v52 = vld [vmem:[%s7133_s21 + $0x48] sm:$0xf]  ;;  %v3907_v54 = vrot.slane %v3905_v28, 4  ;;  %v3920_v22 = vrot.slane %v3918_v2, 4 }
  0xcc   : > { %6454 = vmatpush3.bf16.msra.mxu0 %v6919_v50  ;;  %v1393_v50 = vrot.slane %v6985_v19, 5  ;;  %v6916_v19 = vld [vmem:[%s7133_s21 + $0x90] sm:$0xff]   ;;  %v3869_v0 = vsel %vm7165_vm2, %v7982_v33, %v7927_v17  ;;  %v3888_v46 = vrot.slane %v3887_v31, 4  ;;  %v3879_v28 = vsel %vm7165_vm2, %v7991_v13, %v7984_v1  ;;  %v8040_v33 = vld [vmem:[%s7133_s21 + $0x58] sm:$0xf]  ;;  %v6917_v31 = vld [vmem:[%s8947_s1 + $0xc8] sm:$0xff]  }
  0xcd   : > { %6455 = vmatprep.subr.bf16.mxu0 %v6923_v20  ;;  %v3898_v38 = vrot.slane %v3897_v12, 4  ;;  %v1399_v2 = vrot.slane %v1397_v3, 4  ;;  %v5741_v17 = vld [vmem:[%s7133_s21 + $0x54] sm:$0xf]  ;;  %v3924_v1 = vshll.u32 %v5737_v5, 16  ;;  %v3929_v13 = vshrl.u32 %v5738_v52, 16 }
  0xce   : > { %6424 = vmatmul.mubr.bf16.gmra.mrb[12].mxu0 %v6910_v48  ;;  %v3900_v48 = vshll.u32 %v5734_v34, 16  ;;  %v8036_v7 = vsel %vm7411_vm5, %v1392_v10, %v1393_v50  ;;  %v3932_v50 = vshll.u32 %v5738_v52, 16  ;;  %v3911_v10 = vor.u32 %v3910_v58, %v3907_v54  ;;  %v6918_v54 = vld [vmem:[%s7133_s21 + $0x9c] sm:$0xff]   ;;  %v6992_v41 = vld [vmem:[%s7133_s21 + $0xac] sm:$0xf] }
  0xcf   : > { %6200 = vmatmul.mubr.bf16.gmra.mrb[28].mxu1 %v8970_v42  ;;  %6427 = vmatprep.mubr.bf16.mxu0 %v6912_v53  ;;  %v5377_v53 = vrot.slane %v1278_v62, 9  ;;  %v6987_v42 = vld [vmem:[%s7133_s21 + $0x8c] sm:$0x1]  ;;  %v3962_v5 = vshll.u32 %v8040_v33, 16  ;;  %v8973_v52 = vcombine.low %v7817_v63, %v7825_v8  ;;  %v8076_v63 = vld [vmem:[%s7133_s21 + $0x50] sm:$0x1] }
  0xd0   : > { %6219 = vmatprep.mubr.bf16.mxu1 %v8971_v23  ;;  %6456 = vmatpush3.bf16.msra.mxu0 %v6923_v20  ;;  %v8015_v20 = vsel %vm7411_vm5, %v5376_v32, %v1390_v44  ;;  %v3902_v62 = vrot.slane %v3900_v48, 5  ;;  %v1400_v23 = vrot.slane %v6987_v42, 5  ;;  %v1279_v44 = vld [vmem:[%s7133_s21 + $0x90] sm:$0xe]  ;;  %v8028_v32 = vld [vmem:[%s7133_s21 + $0x4c] sm:$0xf]  ;;  %v3921_v48 = vor.u32 %v3920_v22, %v8018_v51 }
  0xd1   : > { %6457 = vmatprep.subr.bf16.mxu0 %v6927_v40  ;;  %v3938_v12 = vshll.u32 %v8028_v32, 16  ;;  %v3942_v18 = vshrl.u32 %v8028_v32, 16  ;;  %v8972_v42 = vcombine.low %v7805_v30, %v7813_v6  ;;  %v6921_v30 = vld [vmem:[%s8947_s1 + $0xd0] sm:$0xff]   ;;  %v3893_v6 = vsel %vm7165_vm2, %v3888_v46, %v7980_v39  ;;  %v6920_v8 = vld [vmem:[%s7133_s21 + $0xa8] sm:$0xff]   ;;  %v8083_v39 = vld [vmem:[%s7133_s21 + $0x5c] sm:$0x1] }
  0xd2   : > { %v3903_v58 = vsel %vm7165_vm2, %v3898_v38, %v3902_v62  ;;  %v5378_v22 = vrot.slane %v1279_v44, 9  ;;  %v3934_v25 = vrot.slane %v3932_v50, 5  ;;  %8974 = vst [vmem:[#allocation3_spill] sm:$0xff] %v8083_v39  ;;  %v3912_v46 = vrot.slane %v3911_v10, 4 }
  0xd3   : > { %v3922_v62 = vrot.slane %v3921_v48, 4  ;;  %v8085_v38 = vrot.slane %v3938_v12, 5  ;;  %v8087_v34 = vrot.slane %v3962_v5, 5  ;;  %v8092_v50 = vcombine.low %v3869_v0, %v3879_v28  ;;  %v5744_v28 = vld [vmem:[%s7133_s21 + $0x60] sm:$0xf] }
  0xd4   : > { %6458 = vmatpush3.bf16.msra.mxu0 %v6927_v40  ;;  %v8048_v40 = vsel %vm7411_vm5, %v5377_v53, %v1397_v3  ;;  %v3953_v53 = vshrl.u32 %v5741_v17, 16  ;;  %v3956_v3 = vshll.u32 %v5741_v17, 16  ;;  %v6988_v17 = vld [vmem:[%s7133_s21 + $0x94] sm:$0xf]  ;;  %v8096_v48 = vcombine.low %v3893_v6, %v3903_v58 }
  0xd5   : > { %6491 = vmatprep.subr.bf16.mxu0 %v7996_v21  ;;  %v3948_v0 = vshll.u32 %v8076_v63, 16  ;;  %v3917_v6 = vsel %vm7165_vm2, %v3912_v46, %v8018_v51  ;;  %v8977_v46 = vcombine.low %v7839_v61, %v7843_v36 }
  0xd6   : > { %6428 = vmatmul.mubr.bf16.gmra.mrb[16].mxu0 %v6914_v43  ;;  %v3966_v43 = vshrl.u32 %v8040_v33, 16  ;;  %v3955_v44 = vrot.slane %v3953_v53, 4  ;;  %v6989_v53 = vld [vmem:[%s7133_s21 + $0x98] sm:$0x1] }
  0xd7   : > { %6220 = vmatmul.mubr.bf16.vlgmr.msra.gmra.mrb[0].mxu1 %v8972_v42  ;;  %6431 = vmatprep.mubr.bf16.mxu0 %v6916_v19  ;;  %v8079_v19 = vrot.slane %v3924_v1, 5  ;;  %v1404_v42 = vrot.slane %v6988_v17, 5  ;;  %v6990_v17 = vld [vmem:[%s7133_s21 + $0xa0] sm:$0xf]  ;;  %v3950_v36 = vrot.slane %v3948_v0, 5 }
  0xd8   : > { %6252 = vmatpush3.bf16.msra.mxu1 %v7758_v60  ;;  %6223 = vmatprep.mubr.bf16.mxu1 %v8973_v52  ;;  %v8073_v60 = vsel %vm7411_vm5, %v1399_v2, %v1400_v23  ;;  %v3931_v52 = vrot.slane %v3929_v13, 4  ;;  %v3944_v23 = vrot.slane %v3942_v18, 4  ;;  %v3958_v2 = vrot.slane %v3956_v3, 5  ;;  %v6925_v13 = vld [vmem:[%s8947_s1 + $0xd8] sm:$0xff]  }
  0xd9   : > { %6253 = vmatprep.subr.bf16.mxu1 %v6917_v31  ;;  %v3968_v1 = vrot.slane %v3966_v43, 4  ;;  %v1280_v18 = vld [vmem:[%s7133_s21 + $0x9c] sm:$0xe]  ;;  %v1407_v3 = vrot.slane %v6989_v53, 5  ;;  %v8109_v43 = vld [vmem:[%s7133_s21 + $0x64] sm:$0xf] }
  0xda   : > { %v3935_v5 = vor.u32 %v3934_v25, %v3931_v52  ;;  %8975 = vst [vmem:[#allocation4_spill] sm:$0xff] %v8109_v43  ;;  %v3945_v58 = vor.u32 %v3944_v23, %v8085_v38  ;;  %v1411_v12 = vrot.slane %v6990_v17, 5  ;;  %v8976_v25 = vcombine.low %v7829_v24, %v7833_v35  ;;  %v6922_v23 = vld [vmem:[%s7133_s21 + $0xb4] sm:$0xff]   ;;  %v6928_v24 = vld [vmem:[%s8947_s1 + $0xe0] sm:$0xff]   ;;  %v5747_v17 = vld [vmem:[%s7133_s21 + $0x6c] sm:$0xf] }
  0xdb   : > { %v1406_v52 = vrot.slane %v1404_v42, 4  ;;  %v3959_v53 = vor.u32 %v3958_v2, %v3955_v44  ;;  %v3969_v51 = vor.u32 %v3968_v1, %v8087_v34  ;;  %v3977_v35 = vshrl.u32 %v5744_v28, 16  ;;  %v6991_v2 = vld [vmem:[%s7133_s21 + $0xa4] sm:$0x1] }
  0xdc   : > { %6254 = vmatpush3.bf16.msra.mxu1 %v6917_v31  ;;  %v8103_v31 = vsel %vm7411_vm5, %v5378_v22, %v1404_v42  ;;  %v3972_v22 = vshll.u32 %v8083_v39, 16  ;;  %v3990_v42 = vshrl.u32 %v8109_v43, 16  ;;  %v3936_v61 = vrot.slane %v3935_v5, 4  ;;  %v8278_v39 = vld [vmem:[%s7133_s21 + $0x98] sm:$0x1] }
  0xdd   : > { %6255 = vmatprep.subr.bf16.mxu1 %v6921_v30  ;;  %v5379_v44 = vrot.slane %v1280_v18, 9  ;;  %v1414_v1 = vrot.slane %v6991_v2, 5  ;;  %v3960_v5 = vrot.slane %v3959_v53, 4  ;;  %v3970_v18 = vrot.slane %v3969_v51, 4  ;;  %8991 = vst [vmem:[#allocation14_spill] sm:$0xff] %v8278_v39 }
  0xde   : > { %6432 = vmatmul.mubr.bf16.gmra.mrb[20].mxu0 %v6918_v54  ;;  %v3927_v54 = vsel %vm7165_vm2, %v3922_v62, %v8079_v19  ;;  %v3986_v19 = vshll.u32 %v8109_v43, 16  ;;  %v6924_v62 = vld [vmem:[%s7133_s21 + $0xc0] sm:$0xff]   ;;  %v3974_v10 = vrot.slane %v3972_v22, 5  ;;  %v8145_v43 = vsel %vm7411_vm5, %v1406_v52, %v1407_v3 }
  0xdf   : > { %6224 = vmatmul.mubr.bf16.gmra.mrb[4].mxu1 %v8976_v25  ;;  %6435 = vmatprep.mubr.bf16.mxu0 %v6920_v8  ;;  %v3980_v8 = vshll.u32 %v5744_v28, 16  ;;  %v3946_v25 = vrot.slane %v3945_v58, 4  ;;  %v1418_v28 = vrot.slane %v6992_v41, 5  ;;  %v8141_v55 = vcombine.low %v3917_v6, %v3927_v54  ;;  %v6930_v41 = vld [vmem:[%s8947_s1 + $0xe8] sm:$0xff]  }
  0xe0   : > { %6227 = vmatprep.mubr.bf16.mxu1 %v8977_v46  ;;  %6256 = vmatpush3.bf16.msra.mxu1 %v6921_v30  ;;  %v1281_v30 = vld [vmem:[%s7133_s21 + $0xa8] sm:$0xe]  ;;  %v1413_v46 = vrot.slane %v1411_v12, 4  ;;  %v3979_v0 = vrot.slane %v3977_v35, 4  ;;  %v8147_v58 = vrot.slane %v3986_v19, 5  ;;  %v3992_v22 = vrot.slane %v3990_v42, 4 }
  0xe1   : > { %6257 = vmatprep.subr.bf16.mxu1 %v6925_v13  ;;  %v3982_v2 = vrot.slane %v3980_v8, 5  ;;  %v3941_v3 = vsel %vm7165_vm2, %v3936_v61, %v8085_v38  ;;  %v8157_v6 = vsel %vm7411_vm5, %v5379_v44, %v1411_v12  ;;  %v4001_v54 = vshrl.u32 %v5747_v17, 16  ;;  %v6993_v38 = vld [vmem:[%s7133_s21 + $0xb0] sm:$0x1]  ;;  %v1282_v19 = vld [vmem:[%s7133_s21 + $0xb4] sm:$0xe] }
  0xe2   : > { %v4004_v52 = vshll.u32 %v5747_v17, 16  ;;  %v3951_v53 = vsel %vm7165_vm2, %v3946_v25, %v3950_v36  ;;  %v8166_v51 = vsel %vm7411_vm5, %v1413_v46, %v1414_v1  ;;  %v5380_v35 = vrot.slane %v1281_v30, 9  ;;  %v8188_v30 = vld [vmem:[%s7133_s21 + $0x74] sm:$0x1]  ;;  %v6994_v25 = vld [vmem:[%s7133_s21 + $0xb8] sm:$0xf] }
  0xe3   : > { %v1421_v8 = vrot.slane %v6993_v38, 5  ;;  %v8980_v12 = vcombine.low %v7860_v49, %v7874_v4  ;;  %v3965_v42 = vsel %vm7165_vm2, %v3960_v5, %v8087_v34  ;;  %v3975_v61 = vsel %vm7165_vm2, %v3970_v18, %v3974_v10  ;;  %v6926_v4 = vld [vmem:[%s7133_s21 + $0xcc] sm:$0xff]   ;;  %8982 = vst [vmem:[#allocation7_spill] sm:$0xff] %v8188_v30  ;;  %v5753_v38 = vld [vmem:[%s7133_s21 + $0x84] sm:$0xf] }
  0xe4   : > { %6258 = vmatpush3.bf16.msra.mxu1 %v6925_v13  ;;  %v8160_v13 = vld [vmem:[%s7133_s21 + $0x70] sm:$0xf]  ;;  %v1420_v36 = vrot.slane %v1418_v28, 4  ;;  %v3996_v44 = vshll.u32 %v8139_v47, 16  ;;  %v8981_v49 = vcombine.low %v7896_v26, %v7900_v56  ;;  %v3993_v1 = vor.u32 %v3992_v22, %v8147_v58  ;;  %v8205_v22 = vld [vmem:[%s7133_s21 + $0x7c] sm:$0xf] }
  0xe5   : > { %6259 = vmatprep.subr.bf16.mxu1 %v6928_v24  ;;  %8979 = vst [vmem:[#allocation6_spill] sm:$0xff] %v8160_v13  ;;  %v4010_v34 = vshll.u32 %v8160_v13, 16  ;;  %v4014_v10 = vshrl.u32 %v8160_v13, 16  ;;  %v5381_v17 = vrot.slane %v1282_v19, 9  ;;  %v1425_v46 = vrot.slane %v6994_v25, 5  ;;  %8983 = vst [vmem:[#allocation8_spill] sm:$0xff] %v8205_v22 }
  0xe6   : > { %6436 = vmatmul.mubr.bf16.gmra.mrb[24].mxu0 %v6922_v23  ;;  %v6932_v23 = vld [vmem:[%s8947_s1 + $0xf0] sm:$0xff]   ;;  %v4003_v26 = vrot.slane %v4001_v54, 4  ;;  %v4006_v56 = vrot.slane %v4004_v52, 5  ;;  %v8196_v18 = vcombine.low %v3941_v3, %v3951_v53  ;;  %v8208_v19 = vcombine.low %v3965_v42, %v3975_v61  ;;  %v6995_v3 = vld [vmem:[%s7133_s21 + $0xbc] sm:$0x1] }
  0xe7   : > { %6228 = vmatmul.mubr.bf16.gmra.mrb[8].mxu1 %v8980_v12  ;;  %6439 = vmatprep.mubr.bf16.mxu0 %v6924_v62  ;;  %v3983_v62 = vor.u32 %v3982_v2, %v3979_v0  ;;  %v8202_v2 = vsel %vm7411_vm5, %v5380_v35, %v1418_v28  ;;  %v8212_v54 = vsel %vm7411_vm5, %v1420_v36, %v1421_v8  ;;  %v8214_v52 = vrot.slane %v3996_v44, 5  ;;  %v6934_v12 = vld [vmem:[%s8947_s1 + $0xf8] sm:$0xff]   ;;  %v8221_v28 = vld [vmem:[%s7133_s21 + $0x88] sm:$0xf] }
  0xe8   : > { %6231 = vmatprep.mubr.bf16.mxu1 %v8981_v49  ;;  %6260 = vmatpush3.bf16.msra.mxu1 %v6928_v24  ;;  %v5750_v24 = vld [vmem:[%s7133_s21 + $0x78] sm:$0xf]  ;;  %v1428_v53 = vrot.slane %v6995_v3, 5  ;;  %8984 = vst [vmem:[#allocation9_spill] sm:$0xff] %v8221_v28  ;;  %v8225_v42 = vrot.slane %v3993_v1, 4  ;;  %v8227_v61 = vrot.slane %v4010_v34, 5  ;;  %v8231_v36 = vsel %vm7411_vm5, %v5381_v17, %v1425_v46 }
  0xe9   : > { %6261 = vmatprep.subr.bf16.mxu1 %v6930_v41  ;;  %v8223_v35 = vrot.slane %v3983_v62, 4  ;;  %v4016_v8 = vrot.slane %v4014_v10, 4  ;;  %v1427_v44 = vrot.slane %v1425_v46, 4  ;;  %v4007_v49 = vor.u32 %v4006_v56, %v4003_v26  ;;  %v5756_v3 = vld [vmem:[%s7133_s21 + $0x90] sm:$0xf] }
  0xea   : > { %v4020_v25 = vshll.u32 %v8188_v30, 16  ;;  %v4028_v0 = vshll.u32 %v5750_v24, 16  ;;  %v4034_v62 = vshll.u32 %v8205_v22, 16  ;;  %v4038_v1 = vshrl.u32 %v8205_v22, 16  ;;  %v8238_v34 = vld [vmem:[%s7133_s21 + $0x94] sm:$0xf] }
  0xeb   : > { %8985 = vst [vmem:[#allocation10_spill] sm:$0xff] %v8238_v34  ;;  %v8986_v10 = vcombine.low %v7940_v27, %v7944_v29  ;;  %v4049_v17 = vshrl.u32 %v5753_v38, 16  ;;  %v4052_v46 = vshll.u32 %v5753_v38, 16  ;;  %v4062_v26 = vshrl.u32 %v8221_v28, 16  ;;  %v5759_v38 = vld [vmem:[%s7133_s21 + $0x9c] sm:$0xf] }
  0xec   : > { %6262 = vmatpush3.bf16.msra.mxu1 %v6930_v41  ;;  %v4025_v41 = vshrl.u32 %v5750_v24, 16  ;;  %v8987_v56 = vcombine.low %v7951_v45, %v7955_v14  ;;  %v4017_v29 = vor.u32 %v4016_v8, %v8227_v61  ;;  %v4076_v24 = vshll.u32 %v5756_v3, 16  ;;  %v8260_v45 = vld [vmem:[%s7133_s21 + $0x80] sm:$0x1] }
  0xed   : > { %6263 = vmatprep.subr.bf16.mxu1 %v6932_v23  ;;  %v8257_v5 = vrot.slane %v4020_v25, 5  ;;  %8988 = vst [vmem:[#allocation11_spill] sm:$0xff] %v8260_v45  ;;  %v4082_v14 = vshll.u32 %v8238_v34, 16  ;;  %v4030_v27 = vrot.slane %v4028_v0, 5  ;;  %v4040_v8 = vrot.slane %v4038_v1, 4 }
  0xee   : > { %6440 = vmatmul.mubr.bf16.gmra.mrb[28].mxu0 %v6926_v4  ;;  %v4058_v4 = vshll.u32 %v8221_v28, 16  ;;  %v8264_v28 = vrot.slane %v4034_v62, 5  ;;  %v8270_v22 = vld [vmem:[%s7133_s21 + $0xa0] sm:$0xf]  ;;  %v4051_v25 = vrot.slane %v4049_v17, 4  ;;  %v4054_v30 = vrot.slane %v4052_v46, 5 }
  0xef   : > { %6232 = vmatmul.mubr.bf16.gmra.mrb[12].mxu1 %v8986_v10  ;;  %6459 = vmatprep.mubr.bf16.mxu0 %v8009_v59  ;;  %v4073_v59 = vshrl.u32 %v5756_v3, 16  ;;  %v8255_v10 = vrot.slane %v4007_v49, 4  ;;  %v8267_v3 = vld [vmem:[%s7133_s21 + $0x8c] sm:$0x1]  ;;  %8990 = vst [vmem:[#allocation13_spill] sm:$0xff] %v8270_v22  ;;  %v4064_v47 = vrot.slane %v4062_v26, 4  ;;  %v8287_v62 = vsel %vm7411_vm5, %v1427_v44, %v1428_v53 }
  0xf0   : > { %6235 = vmatprep.mubr.bf16.mxu1 %v8987_v56  ;;  %6264 = vmatpush3.bf16.msra.mxu1 %v6932_v23  ;;  %v4086_v23 = vshrl.u32 %v8238_v34, 16  ;;  %v4027_v56 = vrot.slane %v4025_v41, 4  ;;  %8989 = vst [vmem:[#allocation12_spill] sm:$0xff] %v8267_v3  ;;  %v6931_v49 = vld [vmem:[%s8947_s1 + $0x208] sm:$0xff]   ;;  %v8275_v13 = vrot.slane %v4058_v4, 5  ;;  %v4078_v34 = vrot.slane %v4076_v24, 5 }
  0xf1   : > { %6265 = vmatprep.subr.bf16.mxu1 %v6934_v12  ;;  %v5762_v41 = vld [vmem:[%s7133_s21 + $0xa8] sm:$0xf]  ;;  %v4075_v1 = vrot.slane %v4073_v59, 4  ;;  %v8292_v17 = vld [vmem:[%s8947_s1 + $0x100] sm:$0xff]   ;;  %v8295_v46 = vrot.slane %v4082_v14, 5  ;;  %v4097_v26 = vshrl.u32 %v5759_v38, 16  ;;  %v8993_v24 = vcombine.low %v7959_v16, %v7969_v15 }
  0xf2   : > { %8992 = vst [vmem:[#allocation15_spill] sm:$0xff] %v8292_v17  ;;  %v4088_v4 = vrot.slane %v4086_v23, 4  ;;  %v4100_v0 = vshll.u32 %v5759_v38, 16  ;;  %v8298_v53 = vrot.slane %v4017_v29, 4  ;;  %v4106_v44 = vshll.u32 %v8270_v22, 16  ;;  %v6933_v16 = vld [vmem:[%s8947_s1 + $0x210] sm:$0xff]  }
  0xf3   : > { %v4110_v59 = vshrl.u32 %v8270_v22, 16  ;;  %v4031_v14 = vor.u32 %v4030_v27, %v4027_v56  ;;  %v4041_v38 = vor.u32 %v4040_v8, %v8264_v28  ;;  %v4055_v23 = vor.u32 %v4054_v30, %v4051_v25  ;;  %v8310_v29 = vld [vmem:[%s7133_s21 + $0xac] sm:$0xf]  ;;  %v8323_v25 = vld [vmem:[%s7133_s21 + $0xa4] sm:$0x1] }
  0xf4   : > { %6266 = vmatpush3.bf16.msra.mxu1 %v6934_v12  ;;  %v4044_v12 = vshll.u32 %v8260_v45, 16  ;;  %8994 = vst [vmem:[#allocation16_spill] sm:$0xff] %v8310_v29  ;;  %v4065_v15 = vor.u32 %v4064_v47, %v8275_v13  ;;  %v4121_v27 = vshrl.u32 %v5762_v41, 16  ;;  %v4124_v30 = vshll.u32 %v5762_v41, 16 }
  0xf5   : > { %6539 = vmatprep.subr.bf16.mxu1 %v8292_v17  ;;  %v8995_v17 = vcombine.low %v8015_v20, %v8036_v7  ;;  %v4079_v56 = vor.u32 %v4078_v34, %v4075_v1  ;;  %v4089_v8 = vor.u32 %v4088_v4, %v8295_v46  ;;  %v4099_v20 = vrot.slane %v4097_v26, 4 }
  0xf6   : > { %6460 = vmatmul.mubr.bf16.vlgmr.msra.gmra.mrb[0].mxu0 %v8092_v50  ;;  %v4068_v50 = vshll.u32 %v8267_v3, 16  ;;  %v4102_v7 = vrot.slane %v4100_v0, 5  ;;  %v4134_v22 = vshrl.u32 %v8310_v29, 16  ;;  %v4032_v47 = vrot.slane %v4031_v14, 4  ;;  %v6935_v0 = vld [vmem:[%s8947_s1 + $0x218] sm:$0xff]  }
  0xf7   : > { %6236 = vmatmul.mubr.bf16.gmra.mrb[16].mxu1 %v8993_v24  ;;  %6492 = vmatpush3.bf16.msra.mxu0 %v7996_v21  ;;  %v4092_v21 = vshll.u32 %v8278_v39, 16  ;;  %v4130_v24 = vshll.u32 %v8310_v29, 16  ;;  %v4042_v39 = vrot.slane %v4041_v38, 4  ;;  %v4046_v3 = vrot.slane %v4044_v12, 5 }
  0xf8   : > { %6239 = vmatprep.mubr.bf16.mxu1 %v8995_v17  ;;  %6463 = vmatprep.mubr.bf16.mxu0 %v8096_v48  ;;  %v8325_v17 = vrot.slane %v4106_v44, 5  ;;  %v4112_v48 = vrot.slane %v4110_v59, 4  ;;  %v4070_v41 = vrot.slane %v4068_v50, 5  ;;  %v4056_v34 = vrot.slane %v4055_v23, 4 }
  0xf9   : > { %6493 = vmatprep.subr.bf16.mxu0 %v6931_v49  ;;  %v4066_v1 = vrot.slane %v4065_v15, 4  ;;  %v4123_v4 = vrot.slane %v4121_v27, 4  ;;  %v4126_v45 = vrot.slane %v4124_v30, 5  ;;  %v4080_v26 = vrot.slane %v4079_v56, 4  ;;  %v8391_v27 = vld [vmem:[%s7133_s21 + $0xbc] sm:$0x1] }
  0xfa   : > { %v4094_v44 = vrot.slane %v4092_v21, 5  ;;  %v4103_v59 = vor.u32 %v4102_v7, %v4099_v20  ;;  %v4116_v29 = vshll.u32 %v8323_v25, 16  ;;  %v4113_v12 = vor.u32 %v4112_v48, %v8325_v17  ;;  %v8358_v21 = vld [vmem:[%s7133_s21 + $0xb0] sm:$0x1] }
  0xfb   : > { %6494 = vmatpush3.bf16.msra.mxu0 %v6931_v49  ;;  %v4090_v49 = vrot.slane %v4089_v8, 4  ;;  %v8335_v14 = vrot.slane %v4130_v24, 5  ;;  %v4136_v38 = vrot.slane %v4134_v22, 4  ;;  %v8996_v23 = vor.u32 %v7743_v57, %v7741_v11 }
  0xfc   : > { %6495 = vmatprep.subr.bf16.mxu0 %v6933_v16  ;;  %v8997_v15 = vcombine.low %v8048_v40, %v8073_v60  ;;  %v4023_v22 = vsel %vm7165_vm2, %v8298_v53, %v8257_v5  ;;  %v4037_v57 = vsel %vm7165_vm2, %v4032_v47, %v8264_v28  ;;  %v8998_v40 = vcombine.low %v8103_v31, %v8145_v43  ;;  %v6938_v31 = vld [vmem:[%s8947_s1 + $0x220] sm:$0xff]  }
  0xfd   : > { %v8340_v50 = vrot.slane %v8996_v23, 4  ;;  %v4047_v60 = vsel %vm7165_vm2, %v4042_v39, %v4046_v3  ;;  %v4127_v5 = vor.u32 %v4126_v45, %v4123_v4  ;;  %v4071_v28 = vsel %vm7165_vm2, %v4066_v1, %v4070_v41  ;;  %v5818_v41 = vld [vmem:[%s7133_s21 + $0x48] sm:$0xe] }
  0xfe   : > { %6464 = vmatmul.mubr.bf16.gmra.mrb[4].mxu0 %v8141_v55  ;;  %v4013_v55 = vsel %vm7165_vm2, %v8255_v10, %v8227_v61  ;;  %v5765_v61 = vld [vmem:[%s7133_s21 + $0xb4] sm:$0xf]  ;;  %v8370_v10 = vld [vmem:[%s7133_s21 + $0xb8] sm:$0xf]  ;;  %v4085_v39 = vsel %vm7165_vm2, %v4080_v26, %v8295_v46  ;;  %v8380_v43 = vrot.slane %v4103_v59, 4  ;;  %v8382_v3 = vrot.slane %v4116_v29, 5 }
  0xff   : > { %6240 = vmatmul.mubr.bf16.gmra.mrb[20].mxu1 %v8997_v15  ;;  %6467 = vmatprep.mubr.bf16.mxu0 %v8196_v18  ;;  %v4061_v18 = vsel %vm7165_vm2, %v4056_v34, %v8275_v13  ;;  %v4095_v13 = vsel %vm7165_vm2, %v4090_v49, %v4094_v44  ;;  %v8386_v45 = vrot.slane %v4113_v12, 4  ;;  %v4137_v53 = vor.u32 %v4136_v38, %v8335_v14  ;;  %v5819_v26 = vld [vmem:[%s7133_s21 + $0x54] sm:$0xe] }
 0x100   : > { %6243 = vmatprep.mubr.bf16.mxu1 %v8998_v40  ;;  %6496 = vmatpush3.bf16.msra.mxu0 %v6933_v16  ;;  %v4140_v16 = vshll.u32 %v8358_v21, 16  ;;  %v8999_v46 = vsel %vm7165_vm2, %v8225_v42, %v8214_v52  ;;  %v9000_v29 = vsel %vm7165_vm2, %v8223_v35, %v8147_v58  ;;  %v4145_v56 = vshrl.u32 %v5765_v61, 16 }
 0x101   : > { %6497 = vmatprep.subr.bf16.mxu0 %v6935_v0  ;;  %v5796_v30 = vcombine.low %v9000_v29, %v8999_v46  ;;  %v4148_v8 = vshll.u32 %v5765_v61, 16  ;;  %v4154_v20 = vshll.u32 %v8370_v10, 16  ;;  %v5412_v7 = vcombine.low %v8202_v2, %v8212_v54  ;;  %v6941_v2 = vld [vmem:[%s8947_s1 + $0x228] sm:$0xff]   ;;  %v5768_v54 = vld [vmem:[%s7133_s21 + $0xc0] sm:$0xf]  ;;  %v9004_v29 = vld [vmem:[#allocation5_spill] sm:$0xff] }
 0x102   : > { %v5413_v48 = vcombine.low %v8231_v36, %v8287_v62  ;;  %v5797_v24 = vcombine.low %v4013_v55, %v4023_v22  ;;  %v8408_v52 = vrot.slane %v4127_v5, 4  ;;  %v5798_v42 = vcombine.low %v4037_v57, %v4047_v60 }
 0x103   : > { %v8410_v58 = vcombine.low %v4061_v18, %v4071_v28  ;;  %v8412_v35 = vcombine.low %v4085_v39, %v4095_v13  ;;  %v4109_v47 = vsel %vm7165_vm2, %v8380_v43, %v8325_v17  ;;  %v4119_v34 = vsel %vm7165_vm2, %v8386_v45, %v8382_v3  ;;  %v5821_v28 = vld [vmem:[%s7133_s21 + $0x6c] sm:$0xe] }
 0x104   : > { %6498 = vmatpush3.bf16.msra.mxu0 %v6935_v0  ;;  %v8428_v1 = vrot.slane %v4137_v53, 4  ;;  %v8430_v4 = vrot.slane %v4140_v16, 5  ;;  %v4158_v0 = vshrl.u32 %v8370_v10, 16  ;;  %v9001_v44 = vcombine.low %v8157_v6, %v8166_v51  ;;  %v6944_v6 = vld [vmem:[%s8947_s1 + $0x230] sm:$0xff]   ;;  %v8452_v51 = vld [vmem:[%s7133_s21 + $0xc4] sm:$0xf] }
 0x105   : > { %6499 = vmatprep.subr.bf16.mxu0 %v6938_v31  ;;  %v8437_v59 = vrot.slane %v4145_v56, 4  ;;  %v8441_v49 = vrot.slane %v4154_v20, 5  ;;  %v4164_v12 = vshll.u32 %v8391_v27, 16  ;;  %v4133_v38 = vsel %vm7165_vm2, %v8408_v52, %v8335_v14  ;;  %v5820_v14 = vld [vmem:[%s7133_s21 + $0x60] sm:$0xe]  ;;  %v9002_v39 = vld [vmem:[#allocation3_spill] sm:$0xff] }
 0x106   : > { %6468 = vmatmul.mubr.bf16.gmra.mrb[8].mxu0 %v8208_v19  ;;  %v8439_v19 = vrot.slane %v4148_v8, 5  ;;  %v4169_v23 = vshrl.u32 %v5768_v54, 16  ;;  %v5834_v15 = vrot.slane %v5818_v41, 9  ;;  %v4632_v55 = vrot.slane %v8028_v32, 5  ;;  %v6936_v13 = vld [vmem:[%s7133_s21 + $0xc] sm:$0xff]   ;;  %v6947_v56 = vld [vmem:[%s8947_s1 + $0x238] sm:$0xff]  }
 0x107   : > { %6244 = vmatmul.mubr.bf16.gmra.mrb[24].mxu1 %v9001_v44  ;;  %6471 = vmatprep.mubr.bf16.mxu0 %v5796_v30  ;;  %v4172_v22 = vshll.u32 %v5768_v54, 16  ;;  %v4635_v57 = vrot.slane %v8076_v63, 5  ;;  %v5835_v40 = vrot.slane %v5819_v26, 9  ;;  %v4639_v60 = vrot.slane %v8040_v33, 5  ;;  %v9003_v16 = vld [vmem:[#allocation4_spill] sm:$0xff]  ;;  %v9005_v52 = vld [vmem:[#allocation6_spill] sm:$0xff] }
 0x108   : > { %6247 = vmatprep.mubr.bf16.mxu1 %v5412_v7  ;;  %6500 = vmatpush3.bf16.msra.mxu0 %v6938_v31  ;;  %v4143_v18 = vsel %vm7165_vm2, %v8428_v1, %v8430_v4  ;;  %v8462_v5 = vrot.slane %v4158_v0, 4  ;;  %v8466_v61 = vsel %vm7411_vm5, %v5834_v15, %v4632_v55  ;;  %v4634_v32 = vrot.slane %v4632_v55, 4  ;;  %v9006_v4 = vld [vmem:[#allocation7_spill] sm:$0xff] }
 0x109   : > { %6501 = vmatprep.subr.bf16.mxu0 %v6941_v2  ;;  %v4178_v31 = vshll.u32 %v8452_v51, 16  ;;  %v8472_v63 = vsel %vm7411_vm5, %v5835_v40, %v4639_v60  ;;  %v4641_v33 = vrot.slane %v4639_v60, 4  ;;  %v4642_v3 = vrot.slane %v9002_v39, 5  ;;  %v8503_v26 = vld [vmem:[%s7133_s21 + $0xc8] sm:$0x1]  ;;  %v6937_v40 = vld [vmem:[%s7133_s21 + $0x18] sm:$0xff]  }
 0x10a   : > { %v8478_v45 = vsel %vm7411_vm5, %v4634_v32, %v4635_v57  ;;  %v5836_v53 = vrot.slane %v5820_v14, 9  ;;  %v4646_v46 = vrot.slane %v9003_v16, 5  ;;  %v4649_v30 = vrot.slane %v9004_v29, 5  ;;  %v6939_v39 = vld [vmem:[%s7133_s21 + $0x24] sm:$0xff]  }
 0x10b   : > { %v5866_v8 = vcombine.low %v8466_v61, %v8478_v45  ;;  %v8489_v20 = vsel %vm7411_vm5, %v4641_v33, %v4642_v3  ;;  %v5837_v7 = vrot.slane %v5821_v28, 9  ;;  %v4656_v0 = vrot.slane %v9006_v4, 5  ;;  %v9008_v28 = vld [vmem:[#allocation11_spill] sm:$0xff]  ;;  %v5527_v61 = vld [vmem:[%s7133_s21 + $0x90] sm:$0xf] }
 0x10c   : > { %6502 = vmatpush3.bf16.msra.mxu0 %v6941_v2  ;;  %v4653_v2 = vrot.slane %v9005_v52, 5  ;;  %v5867_v54 = vcombine.low %v8472_v63, %v8489_v20  ;;  %v8496_v41 = vsel %vm7411_vm5, %v5836_v53, %v4646_v46  ;;  %v4648_v1 = vrot.slane %v4646_v46, 4  ;;  %v9009_v53 = vld [vmem:[#allocation2_spill] sm:$0xff]  ;;  %v6953_v45 = vld [vmem:[%s7133_s21 + $0xa8] sm:$0xff]  }
 0x10d   : > { %6503 = vmatprep.subr.bf16.mxu0 %v6944_v6  ;;  %v8505_v44 = vrot.slane %v4169_v23, 4  ;;  %v8518_v36 = vcombine.low %v4109_v47, %v4119_v34  ;;  %v4151_v62 = vor.u32 %v8439_v19, %v8437_v59  ;;  %v5822_v23 = vld [vmem:[%s7133_s21 + $0x78] sm:$0xe]  ;;  %v8530_v57 = vrot.slane %v4164_v12, 5  ;;  %v5771_v12 = vld [vmem:[%s7133_s21 + $0xcc] sm:$0xf] }
 0x10e   : > { %6472 = vmatmul.mubr.bf16.gmra.mrb[12].mxu0 %v5797_v24  ;;  %v8507_v24 = vrot.slane %v4172_v22, 5  ;;  %v8511_v15 = vsel %vm7411_vm5, %v5837_v7, %v4653_v2  ;;  %v4655_v55 = vrot.slane %v4653_v2, 4  ;;  %v8528_v22 = vcombine.low %v4133_v38, %v4143_v18  ;;  %v5521_v47 = vld [vmem:[%s7133_s21 + $0x78] sm:$0xf]  ;;  %v9007_v18 = vld [vmem:[#allocation8_spill] sm:$0xff] }
 0x10f   : > { %6248 = vmatmul.mubr.bf16.gmra.mrb[28].mxu1 %v5413_v48  ;;  %6475 = vmatprep.mubr.bf16.mxu0 %v5798_v42  ;;  %v4182_v48 = vshrl.u32 %v8452_v51, 16  ;;  %v8525_v42 = vsel %vm7411_vm5, %v4648_v1, %v4649_v30  ;;  %v4161_v34 = vor.u32 %v8462_v5, %v8441_v49  ;;  %v8541_v59 = vrot.slane %v4178_v31, 5  ;;  %v8555_v31 = vld [vmem:[%s7133_s21 + $0xd0] sm:$0xf]  ;;  %v9010_v1 = vld [vmem:[#allocation9_spill] sm:$0xff] }
 0x110   : > { %6267 = vmatprep.mubr.bf16.mxu1 %v6936_v13  ;;  %6504 = vmatpush3.bf16.msra.mxu0 %v6944_v6  ;;  %v5868_v17 = vcombine.low %v8496_v41, %v8525_v42  ;;  %v8536_v43 = vsel %vm7411_vm5, %v4655_v55, %v4656_v0  ;;  %v4188_v19 = vshll.u32 %v8503_v26, 16  ;;  %v5823_v6 = vld [vmem:[%s7133_s21 + $0x84] sm:$0xe]  ;;  %v4175_v60 = vor.u32 %v8507_v24, %v8505_v44  ;;  %v9011_v24 = vld [vmem:[#allocation12_spill] sm:$0xff]  ;;  %v7017_v63 = vld [vmem:[%s7133_s21 + $0x8c] sm:$0x1] }
 0x111   : > { %6505 = vmatprep.subr.bf16.mxu0 %v6947_v56  ;;  %v5869_v38 = vcombine.low %v8511_v15, %v8536_v43  ;;  %v5838_v14 = vrot.slane %v5822_v23, 9  ;;  %v4660_v32 = vrot.slane %v9007_v18, 5  ;;  %v4663_v33 = vrot.slane %v9008_v28, 5 }
 0x112   : > { %v4184_v5 = vrot.slane %v4182_v48, 4  ;;  %v2407_v3 = vshrl.u32 %v5521_v47, 16  ;;  %v2410_v13 = vshll.u32 %v5521_v47, 16  ;;  %v2429_v16 = vsel %vm7165_vm2, %v8340_v50, %v9009_v53 }
 0x113   : > { %v4193_v46 = vshrl.u32 %v5771_v12, 16  ;;  %v8563_v29 = vsel %vm7411_vm5, %v5838_v14, %v4660_v32  ;;  %v4662_v30 = vrot.slane %v4660_v32, 4  ;;  %v5839_v7 = vrot.slane %v5823_v6, 9  ;;  %v6997_v6 = vld [vmem:[%s8947_s1 + $0x108] sm:$0xff]  }
 0x114   : > { %6506 = vmatpush3.bf16.msra.mxu0 %v6947_v56  ;;  %v4196_v52 = vshll.u32 %v5771_v12, 16  ;;  %v2409_v2 = vrot.slane %v2407_v3, 4  ;;  %v2412_v56 = vrot.slane %v2410_v13, 5  ;;  %v4667_v4 = vrot.slane %v9010_v1, 5  ;;  %v5824_v12 = vld [vmem:[%s7133_s21 + $0x90] sm:$0xe] }
 0x115   : > { %v4202_v50 = vshll.u32 %v8555_v31, 16  ;;  %v4206_v0 = vshrl.u32 %v8555_v31, 16  ;;  %v8572_v44 = vsel %vm7411_vm5, %v4662_v30, %v4663_v33  ;;  %v4670_v55 = vrot.slane %v9011_v24, 5  ;;  %v6940_v3 = vld [vmem:[%s7133_s21 + $0x30] sm:$0xff]  }
 0x116   : > { %6476 = vmatmul.mubr.bf16.gmra.mrb[16].mxu0 %v8410_v58  ;;  %v9012_v58 = vld [vmem:[#allocation15_spill] sm:$0xff]  ;;  %v4185_v48 = vor.u32 %v4184_v5, %v8541_v59  ;;  %v2413_v23 = vor.u32 %v2412_v56, %v2409_v2  ;;  %v4669_v47 = vrot.slane %v4667_v4, 4  ;;  %v4162_v14 = vrot.slane %v4161_v34, 4  ;;  %v8593_v13 = vld [vmem:[%s7133_s21 + $0xd4] sm:$0x1]  ;;  %v9013_v2 = vld [vmem:[#allocation10_spill] sm:$0xff] }
 0x117   : > { %6268 = vmatmul.mubr.bf16.vlgmr.msra.gmra.mrb[0].mxu1 %v6937_v40  ;;  %6479 = vmatprep.mubr.bf16.mxu0 %v8412_v35  ;;  %v5870_v35 = vcombine.low %v8563_v29, %v8572_v44  ;;  %v4152_v40 = vrot.slane %v4151_v62, 4  ;;  %v4190_v18 = vrot.slane %v4188_v19, 5  ;;  %v8585_v32 = vsel %vm7411_vm5, %v5839_v7, %v4667_v4  ;;  %v6942_v19 = vld [vmem:[%s7133_s21 + $0x3c] sm:$0xff]   ;;  %v6998_v1 = vld [vmem:[%s8947_s1 + $0x110] sm:$0xff]  }
 0x118   : > { %6547 = vmatpush3.bf16.msra.mxu1 %v9012_v58  ;;  %6271 = vmatprep.mubr.bf16.mxu1 %v6939_v39  ;;  %v4195_v28 = vrot.slane %v4193_v46, 4  ;;  %v4198_v33 = vrot.slane %v4196_v52, 5  ;;  %v2414_v39 = vrot.slane %v2413_v23, 4  ;;  %v8589_v5 = vsel %vm7411_vm5, %v4669_v47, %v4670_v55  ;;  %v6999_v47 = vld [vmem:[%s7133_s21 + $0x1c] sm:$0xf] }
 0x119   : > { %6540 = vmatprep.subr.bf16.mxu1 %v6997_v6  ;;  %v8595_v53 = vrot.slane %v4202_v50, 5  ;;  %v4208_v30 = vrot.slane %v4206_v0, 4  ;;  %v5871_v62 = vcombine.low %v8585_v32, %v8589_v5  ;;  %v5840_v34 = vrot.slane %v5824_v12, 9 }
 0x11a   : > { %v4176_v7 = vrot.slane %v4175_v60, 4  ;;  %v4186_v46 = vrot.slane %v4185_v48, 4  ;;  %v2419_v52 = vsel %vm7165_vm2, %v2414_v39, %v7741_v11  ;;  %v4674_v56 = vrot.slane %v9013_v2, 5  ;;  %v9014_v11 = vld [vmem:[#allocation14_spill] sm:$0xff]  ;;  %v6943_v39 = vld [vmem:[%s7133_s21 + $0x48] sm:$0xff]  }
 0x11b   : > { %v4157_v4 = vsel %vm7165_vm2, %v4152_v40, %v8441_v49  ;;  %v4167_v60 = vsel %vm7165_vm2, %v4162_v14, %v8530_v57  ;;  %v8613_v50 = vcombine.low %v2419_v52, %v2429_v16  ;;  %v4677_v0 = vrot.slane %v9014_v11, 5  ;;  %v5814_v57 = vld [vmem:[%s7133_s21 + $0x18] sm:$0xe]  ;;  %v5825_v16 = vld [vmem:[%s7133_s21 + $0x9c] sm:$0xe] }
 0x11c   : > { %6548 = vmatpush3.bf16.msra.mxu1 %v6997_v6  ;;  %v4199_v24 = vor.u32 %v4198_v33, %v4195_v28  ;;  %v4212_v55 = vshll.u32 %v8593_v13, 16  ;;  %v8620_v58 = vsel %vm7411_vm5, %v5840_v34, %v4674_v56  ;;  %v4676_v48 = vrot.slane %v4674_v56, 4  ;;  %v7000_v40 = vld [vmem:[%s8947_s1 + $0x118] sm:$0xff]   ;;  %v7001_v2 = vld [vmem:[%s7133_s21 + $0x20] sm:$0x1] }
 0x11d   : > { %6541 = vmatprep.subr.bf16.mxu1 %v6998_v1  ;;  %v4209_v49 = vor.u32 %v4208_v30, %v8595_v53  ;;  %v4191_v23 = vsel %vm7165_vm2, %v4186_v46, %v4190_v18  ;;  %v4604_v12 = vrot.slane %v6999_v47, 5  ;;  %v5803_v6 = vcombine.low %v4157_v4, %v4167_v60  ;;  %v9015_v34 = vld [vmem:[#allocation13_spill] sm:$0xff]  ;;  %v5826_v11 = vld [vmem:[%s7133_s21 + $0xa8] sm:$0xe] }
 0x11e   : > { %6480 = vmatmul.mubr.bf16.gmra.mrb[20].mxu0 %v8518_v36  ;;  %v4181_v36 = vsel %vm7165_vm2, %v4176_v7, %v8541_v59  ;;  %v4200_v14 = vrot.slane %v4199_v24, 4  ;;  %v4214_v28 = vrot.slane %v4212_v55, 5  ;;  %v5830_v18 = vrot.slane %v5814_v57, 9  ;;  %v6945_v46 = vld [vmem:[%s7133_s21 + $0x54] sm:$0xff]   ;;  %v5815_v55 = vld [vmem:[%s7133_s21 + $0x24] sm:$0xe] }
 0x11f   : > { %6272 = vmatmul.mubr.bf16.gmra.mrb[4].mxu1 %v6940_v3  ;;  %6483 = vmatprep.mubr.bf16.mxu0 %v8528_v22  ;;  %v8634_v22 = vsel %vm7411_vm5, %v4676_v48, %v4677_v0  ;;  %v5841_v33 = vrot.slane %v5825_v16, 9  ;;  %v5804_v3 = vcombine.low %v4181_v36, %v4191_v23  ;;  %v4210_v30 = vrot.slane %v4209_v49, 4  ;;  %v7003_v48 = vld [vmem:[%s7133_s21 + $0x28] sm:$0xf]  ;;  %v7004_v36 = vld [vmem:[%s7133_s21 + $0x34] sm:$0xf] }
 0x120   : > { %6275 = vmatprep.mubr.bf16.mxu1 %v6942_v19  ;;  %6549 = vmatpush3.bf16.msra.mxu1 %v6998_v1  ;;  %v5872_v59 = vcombine.low %v8620_v58, %v8634_v22  ;;  %v4681_v19 = vrot.slane %v9015_v34, 5  ;;  %v4684_v7 = vrot.slane %v8323_v25, 5  ;;  %v4606_v52 = vrot.slane %v4604_v12, 4  ;;  %v7002_v1 = vld [vmem:[%s8947_s1 + $0x120] sm:$0xff]  }
 0x121   : > { %6542 = vmatprep.subr.bf16.mxu1 %v7000_v40  ;;  %v4607_v56 = vrot.slane %v7001_v2, 5  ;;  %v4605_v25 = vsel %vm7411_vm5, %v5830_v18, %v4604_v12  ;;  %v4205_v0 = vsel %vm7165_vm2, %v4200_v14, %v8595_v53  ;;  %v4215_v24 = vsel %vm7165_vm2, %v4210_v30, %v4214_v28  ;;  %v5816_v12 = vld [vmem:[%s7133_s21 + $0x30] sm:$0xe]  ;;  %v6946_v30 = vld [vmem:[%s7133_s21 + $0x60] sm:$0xff]  }
 0x122   : > { %v8651_v4 = vsel %vm7411_vm5, %v5841_v33, %v4681_v19  ;;  %v4683_v60 = vrot.slane %v4681_v19, 4  ;;  %v4611_v49 = vrot.slane %v7003_v48, 5  ;;  %v4618_v23 = vrot.slane %v7004_v36, 5  ;;  %v7006_v33 = vld [vmem:[%s7133_s21 + $0x2c] sm:$0x1] }
 0x123   : > { %v4608_v16 = vsel %vm7411_vm5, %v4606_v52, %v4607_v56  ;;  %v5842_v47 = vrot.slane %v5826_v11, 9  ;;  %v5805_v28 = vcombine.low %v4205_v0, %v4215_v24  ;;  %v5831_v18 = vrot.slane %v5815_v55, 9  ;;  %v6948_v52 = vld [vmem:[%s7133_s21 + $0x6c] sm:$0xff]   ;;  %v5827_v11 = vld [vmem:[%s7133_s21 + $0xb4] sm:$0xe] }
 0x124   : > { %6550 = vmatpush3.bf16.msra.mxu1 %v7000_v40  ;;  %v8665_v57 = vsel %vm7411_vm5, %v4683_v60, %v4684_v7  ;;  %v9016_v40 = vld [vmem:[#allocation16_spill] sm:$0xff]  ;;  %v5862_v34 = vcombine.low %v4605_v25, %v4608_v16  ;;  %v4613_v19 = vrot.slane %v4611_v49, 4  ;;  %v5832_v2 = vrot.slane %v5816_v12, 9  ;;  %v5817_v0 = vld [vmem:[%s7133_s21 + $0x3c] sm:$0xe] }
 0x125   : > { %6543 = vmatprep.subr.bf16.mxu1 %v7002_v1  ;;  %v5873_v53 = vcombine.low %v8651_v4, %v8665_v57  ;;  %v4688_v14 = vrot.slane %v9016_v40, 5  ;;  %v4620_v56 = vrot.slane %v4618_v23, 4  ;;  %v7008_v24 = vld [vmem:[%s7133_s21 + $0x40] sm:$0xf]  ;;  %v4612_v48 = vsel %vm7411_vm5, %v5831_v18, %v4611_v49  ;;  %v7010_v18 = vld [vmem:[%s7133_s21 + $0x44] sm:$0x1] }
 0x126   : > { %6484 = vmatmul.mubr.bf16.gmra.mrb[24].mxu0 %v5803_v6  ;;  %v7005_v6 = vld [vmem:[%s8947_s1 + $0x128] sm:$0xff]   ;;  %v4625_v55 = vrot.slane %v7008_v24, 5  ;;  %v4695_v12 = vrot.slane %v8370_v10, 5  ;;  %v4619_v49 = vsel %vm7411_vm5, %v5832_v2, %v4618_v23  ;;  %v7011_v10 = vld [vmem:[%s8947_s1 + $0x138] sm:$0xff]   ;;  %v5828_v23 = vld [vmem:[%s7133_s21 + $0xc0] sm:$0xe] }
 0x127   : > { %6276 = vmatmul.mubr.bf16.gmra.mrb[8].mxu1 %v6943_v39  ;;  %6487 = vmatprep.mubr.bf16.mxu0 %v5804_v3  ;;  %v4614_v39 = vrot.slane %v7006_v33, 5  ;;  %v4691_v3 = vrot.slane %v8358_v21, 5  ;;  %v8682_v7 = vsel %vm7411_vm5, %v5842_v47, %v4688_v14  ;;  %v7009_v21 = vld [vmem:[%s8947_s1 + $0x130] sm:$0xff]   ;;  %v5843_v47 = vrot.slane %v5827_v11, 9 }
 0x128   : > { %6279 = vmatprep.mubr.bf16.mxu1 %v6945_v46  ;;  %6551 = vmatpush3.bf16.msra.mxu1 %v7002_v1  ;;  %v4690_v46 = vrot.slane %v4688_v14, 4  ;;  %v7007_v1 = vld [vmem:[%s7133_s21 + $0x38] sm:$0x1]  ;;  %v5833_v14 = vrot.slane %v5817_v0, 9  ;;  %v4628_v33 = vrot.slane %v7010_v18, 5  ;;  %v4702_v11 = vrot.slane %v8452_v51, 5 }
 0x129   : > { %6544 = vmatprep.subr.bf16.mxu1 %v7005_v6  ;;  %v4621_v60 = vrot.slane %v7007_v1, 5  ;;  %v4615_v36 = vsel %vm7411_vm5, %v4613_v19, %v4614_v39  ;;  %v4697_v39 = vrot.slane %v4695_v12, 4  ;;  %v5518_v19 = vld [vmem:[%s7133_s21 + $0x6c] sm:$0xf]  ;;  %v6951_v18 = vld [vmem:[%s7133_s21 + $0x90] sm:$0xff]   ;;  %v2450_v20 = vshll.u32 %v7017_v63, 16 }
 0x12a   : > { %v8694_v25 = vsel %vm7411_vm5, %v4690_v46, %v4691_v3  ;;  %v5863_v3 = vcombine.low %v4612_v48, %v4615_v36  ;;  %v4626_v1 = vsel %vm7411_vm5, %v5833_v14, %v4625_v55  ;;  %v2383_v0 = vshrl.u32 %v5518_v19, 16  ;;  %v5829_v51 = vld [vmem:[%s7133_s21 + $0xcc] sm:$0xe] }
 0x12b   : > { %v5874_v16 = vcombine.low %v8682_v7, %v8694_v25  ;;  %v4622_v40 = vsel %vm7411_vm5, %v4620_v56, %v4621_v60  ;;  %v5844_v56 = vrot.slane %v5828_v23, 9  ;;  %v2386_v24 = vshll.u32 %v5518_v19, 16 }
 0x12c   : > { %6552 = vmatpush3.bf16.msra.mxu1 %v7005_v6  ;;  %v4698_v6 = vrot.slane %v8391_v27, 5  ;;  %v8714_v27 = vsel %vm7411_vm5, %v5843_v47, %v4695_v12  ;;  %v4705_v36 = vrot.slane %v8503_v26, 5  ;;  %v4704_v12 = vrot.slane %v4702_v11, 4 }
 0x12d   : > { %6545 = vmatprep.subr.bf16.mxu1 %v7009_v21  ;;  %v2388_v26 = vrot.slane %v2386_v24, 5  ;;  %v4712_v23 = vrot.slane %v8593_v13, 5 }
 0x12e   : > { %6488 = vmatmul.mubr.bf16.gmra.mrb[28].mxu0 %v5805_v28  ;;  %v4627_v28 = vrot.slane %v4625_v55, 4  ;;  %v8721_v46 = vsel %vm7411_vm5, %v4697_v39, %v4698_v6  ;;  %v8735_v55 = vsel %vm7411_vm5, %v5844_v56, %v4702_v11  ;;  %v4709_v39 = vrot.slane %v8555_v31, 5  ;;  %v7013_v56 = vld [vmem:[%s7133_s21 + $0x74] sm:$0x1] }
 0x12f   : > { %6280 = vmatmul.mubr.bf16.gmra.mrb[12].mxu1 %v6946_v30  ;;  %6507 = vmatprep.mubr.bf16.mxu0 %v5862_v34  ;;  %v6949_v30 = vld [vmem:[%s7133_s21 + $0x78] sm:$0xff]   ;;  %v5864_v34 = vcombine.low %v4619_v49, %v4622_v40  ;;  %v5875_v2 = vcombine.low %v8714_v27, %v8721_v46  ;;  %v8740_v49 = vsel %vm7411_vm5, %v4704_v12, %v4705_v36  ;;  %v2385_v40 = vrot.slane %v2383_v0, 4  ;;  %v7014_v0 = vld [vmem:[%s7133_s21 + $0x88] sm:$0xf] }
 0x130   : > { %6283 = vmatprep.mubr.bf16.mxu1 %v6948_v52  ;;  %6553 = vmatpush3.bf16.msra.mxu1 %v7009_v21  ;;  %v6950_v52 = vld [vmem:[%s7133_s21 + $0x84] sm:$0xff]   ;;  %v4629_v60 = vsel %vm7411_vm5, %v4627_v28, %v4628_v33  ;;  %v7012_v21 = vld [vmem:[%s7133_s21 + $0x70] sm:$0xf]  ;;  %v5876_v28 = vcombine.low %v8735_v55, %v8740_v49  ;;  %v4711_v19 = vrot.slane %v4709_v39, 4  ;;  %v2440_v24 = vshll.u32 %v7014_v0, 16 }
 0x131   : > { %6546 = vmatprep.subr.bf16.mxu1 %v7011_v10  ;;  %v2392_v48 = vshll.u32 %v7012_v21, 16  ;;  %v2396_v47 = vshrl.u32 %v7012_v21, 16  ;;  %v5865_v6 = vcombine.low %v4626_v1, %v4629_v60  ;;  %v2402_v1 = vshll.u32 %v7013_v56, 16 }
 0x132   : > { %v8762_v11 = vsel %vm7411_vm5, %v4711_v19, %v4712_v23  ;;  %v2444_v21 = vshrl.u32 %v7014_v0, 16  ;;  %v7016_v19 = vld [vmem:[%s7133_s21 + $0xa0] sm:$0xf] }
 0x133   : > { %v8742_v14 = vrot.slane %v2392_v48, 5  ;;  %v2398_v33 = vrot.slane %v2396_v47, 4  ;;  %v2492_v56 = vshrl.u32 %v7016_v19, 16 }
 0x134   : > { %6554 = vmatpush3.bf16.msra.mxu1 %v7011_v10  ;;  %v5845_v10 = vrot.slane %v5829_v51, 9 }
 0x135   : > { %v2399_v31 = vor.u32 %v2398_v33, %v8742_v14  ;;  %v2458_v33 = vshll.u32 %v5527_v61, 16 }
 0x136   : > { %6508 = vmatmul.mubr.bf16.vlgmr.msra.gmra.mrb[0].mxu0 %v5863_v3  ;;  %v6952_v3 = vld [vmem:[%s7133_s21 + $0x9c] sm:$0xff]  }
 0x137   : > { %6284 = vmatmul.mubr.bf16.gmra.mrb[16].mxu1 %v6949_v30  ;;  %6511 = vmatprep.mubr.bf16.mxu0 %v5864_v34  ;;  %v5524_v30 = vld [vmem:[%s7133_s21 + $0x84] sm:$0xf]  ;;  %v8753_v34 = vsel %vm7411_vm5, %v5845_v10, %v4709_v39  ;;  %v2400_v47 = vrot.slane %v2399_v31, 4  ;;  %v7015_v10 = vld [vmem:[%s7133_s21 + $0x94] sm:$0xf]  ;;  %v2460_v0 = vrot.slane %v2458_v33, 5 }
 0x138   : > { %6287 = vmatprep.mubr.bf16.mxu1 %v6950_v52  ;;  %v2389_v52 = vor.u32 %v2388_v26, %v2385_v40  ;;  %v2431_v13 = vshrl.u32 %v5524_v30, 16  ;;  %v2434_v60 = vshll.u32 %v5524_v30, 16  ;;  %v5877_v48 = vcombine.low %v8753_v34, %v8762_v11 }
 0x139   : > { %v8771_v40 = vrot.slane %v2440_v24, 5  ;;  %v2446_v26 = vrot.slane %v2444_v21, 4  ;;  %v2464_v39 = vshll.u32 %v7015_v10, 16  ;;  %v2468_v23 = vshrl.u32 %v7015_v10, 16  ;;  %v7019_v10 = vld [vmem:[%s7133_s21 + $0xa4] sm:$0x1] }
 0x13a   : > { %v2390_v36 = vrot.slane %v2389_v52, 4  ;;  %v2433_v12 = vrot.slane %v2431_v13, 4  ;;  %v2436_v51 = vrot.slane %v2434_v60, 5  ;;  %v2488_v52 = vshll.u32 %v7016_v19, 16  ;;  %v7020_v19 = vld [vmem:[%s7133_s21 + $0xac] sm:$0xf] }
 0x13b   : > { %v2447_v13 = vor.u32 %v2446_v26, %v8771_v40  ;;  %v8788_v41 = vrot.slane %v2464_v39, 5  ;;  %v2470_v42 = vrot.slane %v2468_v23, 4  ;;  %v2494_v21 = vrot.slane %v2492_v56, 4  ;;  %v5536_v23 = vld [vmem:[%s7133_s21 + $0xb4] sm:$0xf] }
 0x13c   : > { %v2498_v39 = vshll.u32 %v7019_v10, 16  ;;  %v2516_v15 = vshrl.u32 %v7020_v19, 16  ;;  %v2530_v63 = vshll.u32 %v5536_v23, 16 }
 0x13d   : > { %v2471_v26 = vor.u32 %v2470_v42, %v8788_v41 }
 0x13e   : > { %6512 = vmatmul.mubr.bf16.gmra.mrb[4].mxu0 %v5865_v6  ;;  %v5530_v6 = vld [vmem:[%s7133_s21 + $0x9c] sm:$0xf] }
 0x13f   : > { %6288 = vmatmul.mubr.bf16.gmra.mrb[20].mxu1 %v6951_v18  ;;  %6515 = vmatprep.mubr.bf16.mxu0 %v5866_v8  ;;  %v2404_v8 = vrot.slane %v2402_v1, 5  ;;  %v2455_v18 = vshrl.u32 %v5527_v61, 16  ;;  %v2482_v30 = vshll.u32 %v5530_v6, 16  ;;  %v2395_v1 = vsel %vm7165_vm2, %v2390_v36, %v8742_v14  ;;  %v6955_v61 = vld [vmem:[%s7133_s21 + $0xc0] sm:$0xff]  }
 0x140   : > { %6291 = vmatprep.mubr.bf16.mxu1 %v6952_v3  ;;  %v2479_v3 = vshrl.u32 %v5530_v6, 16  ;;  %v8790_v14 = vrot.slane %v2488_v52, 5  ;;  %v2512_v52 = vshll.u32 %v7020_v19, 16 }
 0x141   : > { %v2405_v31 = vsel %vm7165_vm2, %v2400_v47, %v2404_v8  ;;  %v2457_v60 = vrot.slane %v2455_v18, 4  ;;  %v2484_v24 = vrot.slane %v2482_v30, 5  ;;  %v2452_v8 = vrot.slane %v2450_v20, 5  ;;  %v7021_v20 = vld [vmem:[%s7133_s21 + $0xb8] sm:$0xf] }
 0x142   : > { %v2448_v47 = vrot.slane %v2447_v13, 4  ;;  %v2495_v33 = vor.u32 %v2494_v21, %v8790_v14  ;;  %v2536_v29 = vshll.u32 %v7021_v20, 16  ;;  %v2540_v44 = vshrl.u32 %v7021_v20, 16 }
 0x144   : > { %v2496_v13 = vrot.slane %v2495_v33, 4 }
 0x146   : > { %6516 = vmatmul.mubr.bf16.gmra.mrb[8].mxu0 %v5867_v54  ;;  %v2437_v54 = vor.u32 %v2436_v51, %v2433_v12  ;;  %v2461_v12 = vor.u32 %v2460_v0, %v2457_v60  ;;  %v7018_v51 = vld [vmem:[%s7133_s21 + $0x98] sm:$0x1]  ;;  %v2500_v60 = vrot.slane %v2498_v39, 5 }
 0x147   : > { %6292 = vmatmul.mubr.bf16.gmra.mrb[24].mxu1 %v6953_v45  ;;  %6519 = vmatprep.mubr.bf16.mxu0 %v5868_v17  ;;  %v2481_v17 = vrot.slane %v2479_v3, 4  ;;  %v5566_v45 = vcombine.low %v2395_v1, %v2405_v31  ;;  %v2474_v6 = vshll.u32 %v7018_v51, 16  ;;  %v2527_v31 = vshrl.u32 %v5536_v23, 16 }
 0x148   : > { %6295 = vmatprep.mubr.bf16.mxu1 %v6954_v9  ;;  %v2438_v36 = vrot.slane %v2437_v54, 4  ;;  %v5533_v9 = vld [vmem:[%s7133_s21 + $0xa8] sm:$0xf]  ;;  %v2462_v56 = vrot.slane %v2461_v12, 4  ;;  %v2501_v32 = vsel %vm7165_vm2, %v2496_v13, %v2500_v60 }
 0x149   : > { %v2485_v18 = vor.u32 %v2484_v24, %v2481_v17  ;;  %v2503_v3 = vshrl.u32 %v5533_v9, 16  ;;  %v2506_v30 = vshll.u32 %v5533_v9, 16  ;;  %v2476_v1 = vrot.slane %v2474_v6, 5 }
 0x14a   : > { %v2443_v43 = vsel %vm7165_vm2, %v2438_v36, %v8771_v40  ;;  %v2514_v17 = vrot.slane %v2512_v52, 5  ;;  %v2518_v24 = vrot.slane %v2516_v15, 4  ;;  %v2529_v21 = vrot.slane %v2527_v31, 4  ;;  %v5539_v36 = vld [vmem:[%s7133_s21 + $0xc0] sm:$0xf] }
 0x14b   : > { %v2486_v54 = vrot.slane %v2485_v18, 4  ;;  %v2505_v0 = vrot.slane %v2503_v3, 4  ;;  %v2508_v42 = vrot.slane %v2506_v30, 5  ;;  %v2551_v9 = vshrl.u32 %v5539_v36, 16  ;;  %v7023_v18 = vld [vmem:[%s7133_s21 + $0xc4] sm:$0xf] }
 0x14c   : > { %v2560_v33 = vshll.u32 %v7023_v18, 16 }
 0x14d   : > { %v2491_v51 = vsel %vm7165_vm2, %v2486_v54, %v8790_v14  ;;  %v2509_v5 = vor.u32 %v2508_v42, %v2505_v0  ;;  %v2564_v14 = vshrl.u32 %v7023_v18, 16  ;;  %v2553_v19 = vrot.slane %v2551_v9, 4 }
 0x14e   : > { %6520 = vmatmul.mubr.bf16.gmra.mrb[12].mxu0 %v5869_v38  ;;  %v2453_v38 = vsel %vm7165_vm2, %v2448_v47, %v2452_v8  ;;  %v2542_v8 = vrot.slane %v2540_v44, 4  ;;  %v2467_v47 = vsel %vm7165_vm2, %v2462_v56, %v8788_v41  ;;  %v7022_v41 = vld [vmem:[%s7133_s21 + $0xb0] sm:$0x1]  ;;  %v5570_v58 = vcombine.low %v2491_v51, %v2501_v32  ;;  %v7025_v44 = vld [vmem:[%s7133_s21 + $0xc8] sm:$0x1] }
 0x14f   : > { %6296 = vmatmul.mubr.bf16.gmra.mrb[28].mxu1 %v6955_v61  ;;  %6523 = vmatprep.mubr.bf16.mxu0 %v5870_v35  ;;  %v2472_v35 = vrot.slane %v2471_v26, 4  ;;  %v5568_v40 = vcombine.low %v2443_v43, %v2453_v38  ;;  %v2532_v61 = vrot.slane %v2530_v63, 5  ;;  %v2522_v6 = vshll.u32 %v7022_v41, 16 }
 0x150   : > { %6331 = vmatprep.mubr.bf16.mxu1 %v5566_v45  ;;  %v2538_v45 = vrot.slane %v2536_v29, 5  ;;  %v2554_v26 = vshll.u32 %v5539_v36, 16  ;;  %v2510_v22 = vrot.slane %v2509_v5, 4  ;;  %v2562_v15 = vrot.slane %v2560_v33, 5 }
 0x151   : > { %v2477_v12 = vsel %vm7165_vm2, %v2472_v35, %v2476_v1  ;;  %v2533_v10 = vor.u32 %v2532_v61, %v2529_v21  ;;  %v2524_v30 = vrot.slane %v2522_v6, 5  ;;  %v2566_v43 = vrot.slane %v2564_v14, 4 }
 0x152   : > { %v2543_v39 = vor.u32 %v2542_v8, %v2538_v45  ;;  %v5569_v3 = vcombine.low %v2467_v47, %v2477_v12  ;;  %v2556_v52 = vrot.slane %v2554_v26, 5  ;;  %v2515_v31 = vsel %vm7165_vm2, %v2510_v22, %v2514_v17 }
 0x153   : > { %v2534_v38 = vrot.slane %v2533_v10, 4  ;;  %v2567_v29 = vor.u32 %v2566_v43, %v2562_v15  ;;  %v2570_v35 = vshll.u32 %v7025_v44, 16 }
 0x154   : > { %v2544_v56 = vrot.slane %v2543_v39, 4  ;;  %v2557_v20 = vor.u32 %v2556_v52, %v2553_v19 }
 0x155   : > { %v2539_v4 = vsel %vm7165_vm2, %v2534_v38, %v2538_v45  ;;  %v2572_v54 = vrot.slane %v2570_v35, 5 }
 0x156   : > { %6524 = vmatmul.mubr.bf16.gmra.mrb[16].mxu0 %v5871_v62  ;;  %v2519_v62 = vor.u32 %v2518_v24, %v2514_v17  ;;  %v2558_v25 = vrot.slane %v2557_v20, 4 }
 0x157   : > { %6332 = vmatmul.mubr.bf16.vlgmr.msra.gmra.mrb[16].mxu1 %v8613_v50  ;;  %6527 = vmatprep.mubr.bf16.mxu0 %v5872_v59  ;;  %v7024_v50 = vld [vmem:[%s7133_s21 + $0xbc] sm:$0x1]  ;;  %s5889_s21 = sshll.u32 %s7115_s5, 8 }
 0x158   : > { %6335 = vmatprep.mubr.bf16.mxu1 %v5568_v40  ;;  %v2546_v23 = vshll.u32 %v7024_v50, 16  ;;  %v2520_v59 = vrot.slane %v2519_v62, 4  ;;  %v2563_v13 = vsel %vm7165_vm2, %v2558_v25, %v2562_v15  ;;  %s8876_s24 = scalar_lea.vmem %s8948_s2, %s5889_s21 }
 0x15a   : > { %v2548_v1 = vrot.slane %v2546_v23, 5  ;;  %v2525_v63 = vsel %vm7165_vm2, %v2520_v59, %v2524_v30 }
 0x15c   : > { %v2549_v57 = vsel %vm7165_vm2, %v2544_v56, %v2548_v1 }
 0x15d   : > { %v5572_v7 = vcombine.low %v2539_v4, %v2549_v57 }
 0x15e   : > { %6528 = vmatmul.mubr.bf16.gmra.mrb[20].mxu0 %v5873_v53  ;;  %v5571_v53 = vcombine.low %v2515_v31, %v2525_v63 }
 0x15f   : > { %6336 = vmatmul.mubr.bf16.gmra.mrb[20].mxu1 %v5569_v3  ;;  %6531 = vmatprep.mubr.bf16.mxu0 %v5874_v16  ;;  %v2568_v16 = vrot.slane %v2567_v29, 4 }
 0x160   : > { %6339 = vmatprep.mubr.bf16.mxu1 %v5570_v58 }
 0x161   : > { %v2573_v60 = vsel %vm7165_vm2, %v2568_v16, %v2572_v54 }
 0x162   : > { %v5573_v0 = vcombine.low %v2563_v13, %v2573_v60 }
 0x166   : > { %6532 = vmatmul.mubr.bf16.gmra.mrb[24].mxu0 %v5875_v2 }
 0x167   : > { %6340 = vmatmul.mubr.bf16.gmra.mrb[24].mxu1 %v5571_v53  ;;  %6535 = vmatprep.mubr.bf16.mxu0 %v5876_v28 }
 0x168   : > { %6343 = vmatprep.mubr.bf16.mxu1 %v5572_v7 }
 0x16e   : > { %6536 = vmatmul.mubr.bf16.gmra.mrb[28].mxu0 %v5877_v48 }
 0x16f   : > { %6344 = vmatmul.mubr.bf16.gmra.mrb[28].mxu1 %v5573_v0 }
 0x1ea   : > { %v6269_v27 = vpop.f32.mrb[0].mxu1 }
 0x1eb   : > { %v1983_v46 = vpop.f32.mrb[1].mxu1 }
 0x1ec   : > { %v6270_v2 = vpop.f32.mrb[2].mxu1 }
 0x1ed   : > { %v1986_v55 = vpop.f32.mrb[3].mxu1 }
 0x1f2   : > { %v6273_v49 = vpop.f32.mrb[4].mxu1 }
 0x1f3   : > { %v1999_v28 = vpop.f32.mrb[5].mxu1 }
 0x1f4   : > { %v6274_v42 = vpop.f32.mrb[6].mxu1 }
 0x1f5   : > { %v2002_v17 = vpop.f32.mrb[7].mxu1 }
 0x1fa   : > { %v6277_v24 = vpop.f32.mrb[8].mxu1 }
 0x1fb   : > { %v2015_v40 = vpop.f32.mrb[9].mxu1 }
 0x1fc   : > { %v6278_v37 = vpop.f32.mrb[10].mxu1 }
 0x1fd   : > { %v8862_v21 = vpop.f32.mrb[11].mxu1 }
 0x202   : > { %v8864_v61 = vpop.f32.mrb[12].mxu1 }
 0x203   : > { %v8866_v34 = vpop.f32.mrb[13].mxu1 }
 0x204   : > { %v8868_v11 = vpop.f32.mrb[14].mxu1 }
 0x205   : > { %v8870_v48 = vpop.f32.mrb[15].mxu1 }
 0x209   : > { %v6509_v45 = vpop.f32.mrb[0].mxu0 }
 0x20a   : > { %v6555_v8 = vadd.f32 %v6509_v45, %v6269_v27  ;;  %v4877_v36 = vpop.f32.mrb[1].mxu0 }
 0x20b   : > { %v6556_v47 = vadd.f32 %v4877_v36, %v1983_v46  ;;  %v6510_v12 = vpop.f32.mrb[2].mxu0 }
 0x20c   : > { %5038 = vst [vmem:[%s8876_s24 + $0x10] sm:$0xff] %v6555_v8  ;;  %v6557_v51 = vadd.f32 %v6510_v12, %v6270_v2  ;;  %v4880_v32 = vpop.f32.mrb[3].mxu0  ;;  %v5107_v9 = vmul.f32 %v6555_v8, %v6555_v8 }
 0x20d   : > { %5036 = vst [vmem:[%s8876_s24] sm:$0xff] %v6556_v47  ;;  %v6558_v5 = vadd.f32 %v4880_v32, %v1986_v55  ;;  %v5105_v62 = vmul.f32 %v6556_v47, %v6556_v47 }
 0x20e   : > { %5039 = vst [vmem:[%s8876_s24 + $0x18] sm:$0xff] %v6557_v51  ;;  %v5108_v39 = vmul.f32 %v6557_v51, %v6557_v51 }
 0x20f   : > { %5037 = vst [vmem:[%s8876_s24 + $0x8] sm:$0xff] %v6558_v5  ;;  %v5068_v41 = vadd.f32 %v6558_v5, %v6556_v47  ;;  %v5106_v6 = vmul.f32 %v6558_v5, %v6558_v5 }
 0x211   : > { %v5069_v26 = vadd.f32 %v6555_v8, %v5068_v41  ;;  %v5137_v18 = vadd.f32 %v5106_v6, %v5105_v62  ;;  %v6513_v33 = vpop.f32.mrb[4].mxu0 }
 0x212   : > { %v6559_v14 = vadd.f32 %v6513_v33, %v6273_v49  ;;  %v4893_v10 = vpop.f32.mrb[5].mxu0 }
 0x213   : > { %v5138_v50 = vadd.f32 %v5137_v18, %v5107_v9  ;;  %v6560_v23 = vadd.f32 %v4893_v10, %v1999_v28  ;;  %v5070_v3 = vadd.f32 %v6557_v51, %v5069_v26  ;;  %v6514_v58 = vpop.f32.mrb[6].mxu0 }
 0x214   : > { %5042 = vst [vmem:[%s8876_s24 + $0x30] sm:$0xff] %v6559_v14  ;;  %v6561_v22 = vadd.f32 %v6514_v58, %v6274_v42  ;;  %v4896_v59 = vpop.f32.mrb[7].mxu0  ;;  %v5111_v1 = vmul.f32 %v6559_v14, %v6559_v14 }
 0x215   : > { %5040 = vst [vmem:[%s8876_s24 + $0x20] sm:$0xff] %v6560_v23  ;;  %v5071_v30 = vadd.f32 %v6560_v23, %v5070_v3  ;;  %v5109_v19 = vmul.f32 %v6560_v23, %v6560_v23  ;;  %v5139_v52 = vadd.f32 %v5138_v50, %v5108_v39  ;;  %v6562_v15 = vadd.f32 %v4896_v59, %v2002_v17 }
 0x216   : > { %5043 = vst [vmem:[%s8876_s24 + $0x38] sm:$0xff] %v6561_v22  ;;  %v5112_v35 = vmul.f32 %v6561_v22, %v6561_v22 }
 0x217   : > { %v5140_v43 = vadd.f32 %v5139_v52, %v5109_v19  ;;  %5041 = vst [vmem:[%s8876_s24 + $0x28] sm:$0xff] %v6562_v15  ;;  %v5072_v38 = vadd.f32 %v6562_v15, %v5071_v30  ;;  %v5110_v56 = vmul.f32 %v6562_v15, %v6562_v15 }
 0x219   : > { %v5073_v31 = vadd.f32 %v6559_v14, %v5072_v38  ;;  %v5141_v63 = vadd.f32 %v5140_v43, %v5110_v56  ;;  %v6517_v20 = vpop.f32.mrb[8].mxu0 }
 0x21a   : > { %v6563_v29 = vadd.f32 %v6517_v20, %v6277_v24  ;;  %v4909_v44 = vpop.f32.mrb[9].mxu0 }
 0x21b   : > { %v5142_v4 = vadd.f32 %v5141_v63, %v5111_v1  ;;  %v6564_v57 = vadd.f32 %v4909_v44, %v2015_v40  ;;  %v5074_v53 = vadd.f32 %v6561_v22, %v5073_v31  ;;  %v6518_v7 = vpop.f32.mrb[10].mxu0 }
 0x21c   : > { %5046 = vst [vmem:[%s8876_s24 + $0x50] sm:$0xff] %v6563_v29  ;;  %v6565_v25 = vadd.f32 %v6518_v7, %v6278_v37  ;;  %v4912_v16 = vpop.f32.mrb[11].mxu0  ;;  %v5115_v55 = vmul.f32 %v6563_v29, %v6563_v29 }
 0x21d   : > { %5044 = vst [vmem:[%s8876_s24 + $0x40] sm:$0xff] %v6564_v57  ;;  %v5075_v54 = vadd.f32 %v6564_v57, %v5074_v53  ;;  %v5113_v13 = vmul.f32 %v6564_v57, %v6564_v57  ;;  %v5143_v60 = vadd.f32 %v5142_v4, %v5112_v35  ;;  %v6566_v0 = vadd.f32 %v4912_v16, %v8862_v21 }
 0x21e   : > { %5047 = vst [vmem:[%s8876_s24 + $0x58] sm:$0xff] %v6565_v25  ;;  %v5116_v40 = vmul.f32 %v6565_v25, %v6565_v25 }
 0x21f   : > { %v5144_v27 = vadd.f32 %v5143_v60, %v5113_v13  ;;  %5045 = vst [vmem:[%s8876_s24 + $0x48] sm:$0xff] %v6566_v0  ;;  %v5076_v46 = vadd.f32 %v6566_v0, %v5075_v54  ;;  %v5114_v2 = vmul.f32 %v6566_v0, %v6566_v0 }
 0x221   : > { %v5077_v49 = vadd.f32 %v6563_v29, %v5076_v46  ;;  %v5145_v28 = vadd.f32 %v5144_v27, %v5114_v2  ;;  %v6521_v42 = vpop.f32.mrb[12].mxu0 }
 0x222   : > { %v6567_v17 = vadd.f32 %v6521_v42, %v8864_v61  ;;  %v4925_v24 = vpop.f32.mrb[13].mxu0 }
 0x223   : > { %v5146_v37 = vadd.f32 %v5145_v28, %v5115_v55  ;;  %v6568_v21 = vadd.f32 %v4925_v24, %v8866_v34  ;;  %v5078_v45 = vadd.f32 %v6565_v25, %v5077_v49  ;;  %v6522_v8 = vpop.f32.mrb[14].mxu0 }
 0x224   : > { %5050 = vst [vmem:[%s8876_s24 + $0x70] sm:$0xff] %v6567_v17  ;;  %v6569_v36 = vadd.f32 %v6522_v8, %v8868_v11  ;;  %v4928_v47 = vpop.f32.mrb[15].mxu0  ;;  %v5119_v6 = vmul.f32 %v6567_v17, %v6567_v17 }
 0x225   : > { %5048 = vst [vmem:[%s8876_s24 + $0x60] sm:$0xff] %v6568_v21  ;;  %v5079_v12 = vadd.f32 %v6568_v21, %v5078_v45  ;;  %v5117_v51 = vmul.f32 %v6568_v21, %v6568_v21  ;;  %v5147_v32 = vadd.f32 %v5146_v37, %v5116_v40  ;;  %v6570_v5 = vadd.f32 %v4928_v47, %v8870_v48 }
 0x226   : > { %5051 = vst [vmem:[%s8876_s24 + $0x78] sm:$0xff] %v6569_v36  ;;  %v5120_v33 = vmul.f32 %v6569_v36, %v6569_v36 }
 0x227   : > { %v5148_v61 = vadd.f32 %v5147_v32, %v5117_v51  ;;  %5049 = vst [vmem:[%s8876_s24 + $0x68] sm:$0xff] %v6570_v5  ;;  %v5080_v62 = vadd.f32 %v6570_v5, %v5079_v12  ;;  %v5118_v41 = vmul.f32 %v6570_v5, %v6570_v5 }
 0x229   : > { %v5081_v34 = vadd.f32 %v6567_v17, %v5080_v62  ;;  %v5149_v9 = vadd.f32 %v5148_v61, %v5118_v41  ;;  %v6525_v26 = vpop.f32.mrb[16].mxu0 }
 0x22a   : > { %v6333_v18 = vpop.f32.mrb[16].mxu1  ;;  %v4941_v11 = vpop.f32.mrb[17].mxu0 }
 0x22b   : > { %v5150_v14 = vadd.f32 %v5149_v9, %v5119_v6  ;;  %v6571_v10 = vadd.f32 %v6525_v26, %v6333_v18  ;;  %v2801_v39 = vpop.f32.mrb[17].mxu1  ;;  %v5082_v48 = vadd.f32 %v6569_v36, %v5081_v34  ;;  %v6526_v50 = vpop.f32.mrb[18].mxu0 }
 0x22c   : > { %v6572_v23 = vadd.f32 %v4941_v11, %v2801_v39  ;;  %v6334_v3 = vpop.f32.mrb[18].mxu1  ;;  %v4944_v58 = vpop.f32.mrb[19].mxu0 }
 0x22d   : > { %5054 = vst [vmem:[%s8876_s24 + $0x90] sm:$0xff] %v6571_v10  ;;  %v5151_v22 = vadd.f32 %v5150_v14, %v5120_v33  ;;  %v6573_v59 = vadd.f32 %v6526_v50, %v6334_v3  ;;  %v2804_v30 = vpop.f32.mrb[19].mxu1  ;;  %v5123_v31 = vmul.f32 %v6571_v10, %v6571_v10 }
 0x22e   : > { %5052 = vst [vmem:[%s8876_s24 + $0x80] sm:$0xff] %v6572_v23  ;;  %v5083_v19 = vadd.f32 %v6572_v23, %v5082_v48  ;;  %v5121_v52 = vmul.f32 %v6572_v23, %v6572_v23  ;;  %v6574_v15 = vadd.f32 %v4944_v58, %v2804_v30 }
 0x22f   : > { %5055 = vst [vmem:[%s8876_s24 + $0x98] sm:$0xff] %v6573_v59  ;;  %v5124_v53 = vmul.f32 %v6573_v59, %v6573_v59 }
 0x230   : > { %v5152_v43 = vadd.f32 %v5151_v22, %v5121_v52  ;;  %5053 = vst [vmem:[%s8876_s24 + $0x88] sm:$0xff] %v6574_v15  ;;  %v5084_v38 = vadd.f32 %v6574_v15, %v5083_v19  ;;  %v5122_v56 = vmul.f32 %v6574_v15, %v6574_v15 }
 0x231   : > { %v6529_v1 = vpop.f32.mrb[20].mxu0 }
 0x232   : > { %v5085_v63 = vadd.f32 %v6571_v10, %v5084_v38  ;;  %v5153_v20 = vadd.f32 %v5152_v43, %v5122_v56  ;;  %v6337_v29 = vpop.f32.mrb[20].mxu1  ;;  %v4957_v44 = vpop.f32.mrb[21].mxu0 }
 0x233   : > { %v6575_v35 = vadd.f32 %v6529_v1, %v6337_v29  ;;  %v2817_v4 = vpop.f32.mrb[21].mxu1  ;;  %v6530_v57 = vpop.f32.mrb[22].mxu0 }
 0x234   : > { %v5154_v7 = vadd.f32 %v5153_v20, %v5123_v31  ;;  %v6576_v25 = vadd.f32 %v4957_v44, %v2817_v4  ;;  %v5086_v16 = vadd.f32 %v6573_v59, %v5085_v63  ;;  %v6338_v54 = vpop.f32.mrb[22].mxu1  ;;  %v4960_v13 = vpop.f32.mrb[23].mxu0 }
 0x235   : > { %5058 = vst [vmem:[%s8876_s24 + $0xb0] sm:$0xff] %v6575_v35  ;;  %v6577_v60 = vadd.f32 %v6530_v57, %v6338_v54  ;;  %v2820_v0 = vpop.f32.mrb[23].mxu1  ;;  %v5127_v24 = vmul.f32 %v6575_v35, %v6575_v35 }
 0x236   : > { %5056 = vst [vmem:[%s8876_s24 + $0xa0] sm:$0xff] %v6576_v25  ;;  %v5087_v27 = vadd.f32 %v6576_v25, %v5086_v16  ;;  %v5125_v46 = vmul.f32 %v6576_v25, %v6576_v25  ;;  %v5155_v2 = vadd.f32 %v5154_v7, %v5124_v53  ;;  %v6578_v55 = vadd.f32 %v4960_v13, %v2820_v0 }
 0x237   : > { %5059 = vst [vmem:[%s8876_s24 + $0xb8] sm:$0xff] %v6577_v60  ;;  %v5128_v12 = vmul.f32 %v6577_v60, %v6577_v60 }
 0x238   : > { %v5156_v49 = vadd.f32 %v5155_v2, %v5125_v46  ;;  %5057 = vst [vmem:[%s8876_s24 + $0xa8] sm:$0xff] %v6578_v55  ;;  %v5088_v28 = vadd.f32 %v6578_v55, %v5087_v27  ;;  %v5126_v42 = vmul.f32 %v6578_v55, %v6578_v55 }
 0x239   : > { %v6533_v17 = vpop.f32.mrb[24].mxu0 }
 0x23a   : > { %v5089_v40 = vadd.f32 %v6575_v35, %v5088_v28  ;;  %v5157_v37 = vadd.f32 %v5156_v49, %v5126_v42  ;;  %v6341_v21 = vpop.f32.mrb[24].mxu1  ;;  %v4973_v45 = vpop.f32.mrb[25].mxu0 }
 0x23b   : > { %v6579_v8 = vadd.f32 %v6533_v17, %v6341_v21  ;;  %v2833_v36 = vpop.f32.mrb[25].mxu1  ;;  %v6534_v47 = vpop.f32.mrb[26].mxu0 }
 0x23c   : > { %v5158_v51 = vadd.f32 %v5157_v37, %v5127_v24  ;;  %v6580_v32 = vadd.f32 %v4973_v45, %v2833_v36  ;;  %v5090_v5 = vadd.f32 %v6577_v60, %v5089_v40  ;;  %v6342_v61 = vpop.f32.mrb[26].mxu1  ;;  %v4976_v62 = vpop.f32.mrb[27].mxu0 }
 0x23d   : > { %5062 = vst [vmem:[%s8876_s24 + $0xd0] sm:$0xff] %v6579_v8  ;;  %v6581_v41 = vadd.f32 %v6534_v47, %v6342_v61  ;;  %v2836_v6 = vpop.f32.mrb[27].mxu1  ;;  %v5131_v39 = vmul.f32 %v6579_v8, %v6579_v8 }
 0x23e   : > { %5060 = vst [vmem:[%s8876_s24 + $0xc0] sm:$0xff] %v6580_v32  ;;  %v5091_v34 = vadd.f32 %v6580_v32, %v5090_v5  ;;  %v5129_v9 = vmul.f32 %v6580_v32, %v6580_v32  ;;  %v5159_v26 = vadd.f32 %v5158_v51, %v5128_v12  ;;  %v6582_v18 = vadd.f32 %v4976_v62, %v2836_v6 }
 0x23f   : > { %5063 = vst [vmem:[%s8876_s24 + $0xd8] sm:$0xff] %v6581_v41  ;;  %v5132_v30 = vmul.f32 %v6581_v41, %v6581_v41 }
 0x240   : > { %v5160_v11 = vadd.f32 %v5159_v26, %v5129_v9  ;;  %5061 = vst [vmem:[%s8876_s24 + $0xc8] sm:$0xff] %v6582_v18  ;;  %v5092_v33 = vadd.f32 %v6582_v18, %v5091_v34  ;;  %v5130_v14 = vmul.f32 %v6582_v18, %v6582_v18 }
 0x241   : > { %v6537_v10 = vpop.f32.mrb[28].mxu0 }
 0x242   : > { %v5093_v48 = vadd.f32 %v6579_v8, %v5092_v33  ;;  %v5161_v50 = vadd.f32 %v5160_v11, %v5130_v14  ;;  %v6345_v23 = vpop.f32.mrb[28].mxu1  ;;  %v4989_v3 = vpop.f32.mrb[29].mxu0 }
 0x243   : > { %v6583_v58 = vadd.f32 %v6537_v10, %v6345_v23  ;;  %v2849_v22 = vpop.f32.mrb[29].mxu1  ;;  %v6538_v59 = vpop.f32.mrb[30].mxu0 }
 0x244   : > { %v5162_v19 = vadd.f32 %v5161_v50, %v5131_v39  ;;  %v6584_v52 = vadd.f32 %v4989_v3, %v2849_v22  ;;  %v5094_v15 = vadd.f32 %v6581_v41, %v5093_v48  ;;  %v6346_v43 = vpop.f32.mrb[30].mxu1  ;;  %v4992_v38 = vpop.f32.mrb[31].mxu0 }
 0x245   : > { %5066 = vst [vmem:[%s8876_s24 + $0xf0] sm:$0xff] %v6583_v58  ;;  %v6585_v56 = vadd.f32 %v6538_v59, %v6346_v43  ;;  %v2852_v1 = vpop.f32.mrb[31].mxu1  ;;  %v5135_v57 = vmul.f32 %v6583_v58, %v6583_v58 }
 0x246   : > { %5064 = vst [vmem:[%s8876_s24 + $0xe0] sm:$0xff] %v6584_v52  ;;  %v5095_v31 = vadd.f32 %v6584_v52, %v5094_v15  ;;  %v5133_v63 = vmul.f32 %v6584_v52, %v6584_v52  ;;  %v5163_v20 = vadd.f32 %v5162_v19, %v5132_v30  ;;  %v6586_v29 = vadd.f32 %v4992_v38, %v2852_v1 }
 0x247   : > { %5067 = vst [vmem:[%s8876_s24 + $0xf8] sm:$0xff] %v6585_v56  ;;  %v5136_v25 = vmul.f32 %v6585_v56, %v6585_v56 }
 0x248   : > { %v5164_v44 = vadd.f32 %v5163_v20, %v5133_v63  ;;  %5065 = vst [vmem:[%s8876_s24 + $0xe8] sm:$0xff] %v6586_v29  ;;  %v5096_v35 = vadd.f32 %v6586_v29, %v5095_v31  ;;  %v5134_v4 = vmul.f32 %v6586_v29, %v6586_v29 }
 0x24a   : > { %v5097_v53 = vadd.f32 %v6583_v58, %v5096_v35  ;;  %v5165_v7 = vadd.f32 %v5164_v44, %v5134_v4 }
 0x24c   : > { %v5098_v16 = vadd.f32 %v6585_v56, %v5097_v53  ;;  %v5166_v54 = vadd.f32 %v5165_v7, %v5135_v57 }
 0x24e   : > { %v5099_v13 = vrot.slane %v5098_v16, 4  ;;  %v5167_v60 = vadd.f32 %v5166_v54, %v5136_v25 }
 0x250   : > { %v5100_v0 = vadd.f32 %v5099_v13, %v5098_v16  ;;  %v5168_v27 = vrot.slane %v5167_v60, 4 }
 0x252   : > { %v5101_v46 = vrot.slane %v5100_v0, 2  ;;  %v5169_v2 = vadd.f32 %v5168_v27, %v5167_v60 }
 0x254   : > { %v5102_v55 = vadd.f32 %v5101_v46, %v5100_v0  ;;  %v5170_v49 = vrot.slane %v5169_v2, 2  ;;  %5179 = sbr.rel (!%p5174_p5) target bundleno = 605 (0x25d), region = 32 }
 0x256   : > { %v5103_v28 = vrot.slane %v5102_v55, 1  ;;  %v5171_v42 = vadd.f32 %v5170_v49, %v5169_v2 }
 0x258   : > { %v5104_v17 = vadd.f32 %v5103_v28, %v5102_v55  ;;  %v5172_v24 = vrot.slane %v5171_v42, 1 }
 0x25a   : > { %v5173_v40 = vadd.f32 %v5172_v24, %v5171_v42  ;;  %5180 = vst [vmem:[%s8949_s3] sm:$0x1] (%p5174_p5), %v5104_v17 }
 0x25c   : > { %5181 = vst [vmem:[%s8950_s4] sm:$0x1] %v5173_v40 }
 0x25d PF: > { %5184 = sbr.rel (%p5174_p5) target bundleno = 616 (0x268), region = 36 }
 0x263   : > { %v5185_v37 = vld [vmem:[%s8949_s3] sm:$0x1] (!%p5174_p5) }
 0x264   : > { %v5188_v21 = vld [vmem:[%s8950_s4] sm:$0x1]  ;;  %v5186_v45 = vadd.f32 %v5185_v37, %v5104_v17 }
 0x265   : > { %v5189_v8 = vadd.f32 %v5188_v21, %v5173_v40 }
 0x266   : > { %5187 = vst [vmem:[%s8949_s3] sm:$0x1] %v5186_v45 }
 0x267   : > { %5190 = vst [vmem:[%s8950_s4] sm:$0x1] %v5189_v8 }
 0x268 PF: > { %s15_s17 = sadd.s32 1, %s7048_s17   ;;  %s9017_s15 = smov %s7044_s16 }
 0x269   : > { %p12_p6 = scmp.ge.s32.totalorder %s15_s17, 4   ;;  %s9018_s16 = smov %s9020_s18 }
 0x26b   :  { %14 = sbr.rel (!%p12_p6) target bundleno = 2 (0x2), region = 93 }

</bundles_post_ra>
